<compile_context>
chip_gen: v7x
topology: tpu7x:2x2x1
jax: 0.10.0
libtpu: 0.0.40
codegen_flags: <defaults>
</compile_context>

<pallas_src>
import functools
import math

import jax
import jax.numpy as jnp
from jax import lax
from jax.experimental import pallas as pl
from jax.experimental.pallas import tpu as pltpu


IN_DIMS = 3
NUM_FREQS = 4  # F
OUT_DIMS = IN_DIMS * (1 + 2 * NUM_FREQS)


def _freq_embedding_kernel(x_ref, o_ref, *, in_dims, num_freqs):
    """x_ref: (in_dims, TILE_N); o_ref: (in_dims*(1+2F), TILE_N), grouped layout.

    Grouped channel-major row layout (R = 2*num_freqs rows per input dim):
      row R*d + 2*k     = sin(2^k * pi * x_d)
      row R*d + 2*k + 1 = cos(2^k * pi * x_d)     (= sin(theta + pi/2))
      row in_dims*R + d = x_d                      (identity channels)
    For the default F=4, R=8 so every sin/cos slab is a full 8-sublane tile.
    """
    rows_per_dim = 2 * num_freqs

    # Compute in f32 (v5e has no bf16 VPU/EUP); cast only on store.
    x = x_ref[...].astype(jnp.float32)

    # Per-row frequency / phase columns, built from a 2-D iota (no dense literal
    # constants, no recurrence):  row j -> freq = pi * 2^(j>>1), phase = (j&1)*pi/2.
    ji = lax.broadcasted_iota(jnp.int32, (rows_per_dim, 1), 0)
    k = (ji >> 1).astype(jnp.float32)          # octave index 0,0,1,1,...
    m = (ji & 1).astype(jnp.float32)           # 0 = sin row, 1 = cos row
    pow2k = jnp.ones_like(k)
    for t in range(1, num_freqs):
        pow2k = pow2k * jnp.where(k >= float(t), 2.0, 1.0)   # exact 2^k
    freq_col = math.pi * pow2k                 # (rows_per_dim, 1)
    phase_col = m * (math.pi / 2.0)            # (rows_per_dim, 1)

    # One sublane-aligned dense slab per input dim (3 dense stores for F=4).
    for d in range(in_dims):
        xd = x[d:d + 1, :]                               # (1, TILE_N)
        theta = xd * freq_col + phase_col                # -> (rows_per_dim, TILE_N)
        o_ref[d * rows_per_dim:(d + 1) * rows_per_dim, :] = (
            jnp.sin(theta).astype(o_ref.dtype))

    # Trailing identity slab (rows 24:27 for the default config; sits at offset 0
    # of its sublane tile, so it is a single non-straddling store).
    o_ref[in_dims * rows_per_dim:, :] = x.astype(o_ref.dtype)


def frequency_embedding_grouped_cm(x_cn, *, num_freqs=NUM_FREQS, tile_n=16384,
                                   out_dtype=None):
    """Fast path: x_cn [in_dims, N] (channel-major) -> [in_dims*(1+2F), N] in the
    GROUPED channel layout documented in `_freq_embedding_kernel`.

    Consumers (e.g. the first MLP matmul) should consume this layout directly
    and fold the channel permutation into their weights.
    """
    in_dims, n = x_cn.shape
    rows_per_dim = 2 * num_freqs
    out_dims = in_dims * (1 + rows_per_dim)
    if out_dtype is None:
        out_dtype = x_cn.dtype

    # Large, 128-aligned lane tile to amortise the ~0.35 us/step grid overhead...
    tile_n = max(128, (int(tile_n) // 128) * 128)
    # ...but keep >= 2 grid steps (when N allows) so the "parallel" axis can be
    # sharded across v7x's two TensorCores.
    tile_n = min(tile_n, max(128, pl.cdiv(n, 256) * 128))

    kernel = functools.partial(
        _freq_embedding_kernel, in_dims=in_dims, num_freqs=num_freqs)

    # No wrapper-side pad/slice: the grid uses pl.cdiv and Pallas handles the
    # ragged last block (padded reads, dropped out-of-bounds writes).
    return pl.pallas_call(
        kernel,
        out_shape=jax.ShapeDtypeStruct((out_dims, n), out_dtype),
        grid=(pl.cdiv(n, tile_n),),
        in_specs=[pl.BlockSpec((in_dims, tile_n), lambda i: (0, i))],
        out_specs=pl.BlockSpec((out_dims, tile_n), lambda i: (0, i)),
        compiler_params=pltpu.CompilerParams(
            dimension_semantics=("parallel",)),
    )(x_cn)


def grouped_row_for_canonical_channel(in_dims=IN_DIMS, num_freqs=NUM_FREQS):
    """perm[c] = grouped-layout row holding canonical output channel c, where the
    canonical channel order is [x, sin f0, cos f0, sin f1, cos f1, ...]."""
    rows_per_dim = 2 * num_freqs
    perm = []
    for d in range(in_dims):                       # identity channels
        perm.append(in_dims * rows_per_dim + d)
    for k in range(num_freqs):
        for d in range(in_dims):                   # sin(2^k * pi * x_d)
            perm.append(d * rows_per_dim + 2 * k)
        for d in range(in_dims):                   # cos(2^k * pi * x_d)
            perm.append(d * rows_per_dim + 2 * k + 1)
    return jnp.asarray(perm, dtype=jnp.int32)


def frequency_embedding(x, *, num_freqs=NUM_FREQS, tile_n=16384, out_dtype=None):
    """Row-major compat path: x [N, in_dims] -> [N, in_dims*(1+2F)] in the
    canonical channel order (matches the PyTorch module contract).

    NOTE: this path pays an HBM relayout (input transpose + channel gather +
    output transpose). Prefer `frequency_embedding_grouped_cm` and fold the
    permutation into the consumer.
    """
    in_dims = x.shape[-1]
    grouped = frequency_embedding_grouped_cm(
        x.T, num_freqs=num_freqs, tile_n=tile_n, out_dtype=out_dtype)
    perm = grouped_row_for_canonical_channel(in_dims, num_freqs)
    return grouped[perm, :].T


def frequency_embedding_ref(x, num_freqs=NUM_FREQS):
    feats = [x]
    for k in range(num_freqs):
        freq = (2.0 ** k) * jnp.pi
        feats.append(jnp.sin(freq * x))
        feats.append(jnp.cos(freq * x))
    return jnp.concatenate(feats, axis=-1)


if __name__ == "__main__":
    key = jax.random.PRNGKey(0)
    N = 3000  # intentionally not a lane-tile multiple: exercises the ragged tail
    x = jax.random.normal(key, (N, IN_DIMS), dtype=jnp.float32)
    ref = frequency_embedding_ref(x)

    # Row-major compat wrapper (canonical channel order, dtype-preserving).
    out = jax.block_until_ready(frequency_embedding(x))
    assert out.shape == (N, OUT_DIMS), out.shape
    assert out.dtype == x.dtype, out.dtype
    assert jnp.allclose(out, ref, atol=1e-4, rtol=1e-4), float(
        jnp.max(jnp.abs(out - ref)))

    # Grouped channel-major fast path, small tile to exercise a multi-step grid
    # plus the partial boundary block.
    perm = grouped_row_for_canonical_channel(IN_DIMS, NUM_FREQS)
    grouped = jax.block_until_ready(
        frequency_embedding_grouped_cm(x.T, tile_n=512))
    assert grouped.shape == (OUT_DIMS, N), grouped.shape
    assert jnp.allclose(grouped[perm, :], ref.T, atol=1e-4, rtol=1e-4)

    # bf16 output option (compute stays f32 inside the kernel).
    out_bf16 = jax.block_until_ready(
        frequency_embedding(x, out_dtype=jnp.bfloat16))
    assert out_bf16.shape == (N, OUT_DIMS)
    assert out_bf16.dtype == jnp.bfloat16
    assert jnp.allclose(out_bf16.astype(jnp.float32), ref, atol=5e-2, rtol=5e-2)

    print("KERNEL_OK")
</pallas_src>

<mosaic_0001>
module attributes {stable_mosaic.version = 11 : i64} {
  func.func @_freq_embedding_kernel(%arg0: i32, %arg1: memref<3x1536xf32, #tpu.memory_space<vmem>>, %arg2: memref<27x1536xf32, #tpu.memory_space<vmem>>) attributes {dimension_semantics = [#tpu.dimension_semantics<parallel>], iteration_bounds = array<i64: 2>, scalar_prefetch = 0 : i64, scratch_operands = 0 : i64, tpu.core_type = #tpu.core_type<tc>, window_params = [{transform_indices = @transform_0, window_bounds = array<i64: 3, 1536>}, {transform_indices = @transform_1, window_bounds = array<i64: 27, 1536>}]} {
    %c0 = arith.constant 0 : index
    %c0_0 = arith.constant 0 : index
    %0 = vector.load %arg1[%c0, %c0_0] : memref<3x1536xf32, #tpu.memory_space<vmem>>, vector<3x1536xf32>
    %1 = tpu.iota {dimensions = array<i32: 0>} : vector<8x1xi32>
    %c1_i32 = arith.constant 1 : i32
    %2 = vector.broadcast %c1_i32 : i32 to vector<8x1xi32>
    %3 = arith.shrsi %1, %2 : vector<8x1xi32>
    %4 = arith.sitofp %3 : vector<8x1xi32> to vector<8x1xf32>
    %c1_i32_1 = arith.constant 1 : i32
    %5 = vector.broadcast %c1_i32_1 : i32 to vector<8x1xi32>
    %6 = arith.andi %1, %5 : vector<8x1xi32>
    %7 = arith.sitofp %6 : vector<8x1xi32> to vector<8x1xf32>
    %cst = arith.constant 1.000000e+00 : f32
    %8 = vector.broadcast %cst : f32 to vector<8x1xf32>
    %cst_2 = arith.constant 1.000000e+00 : f32
    %9 = vector.broadcast %cst_2 : f32 to vector<8x1xf32>
    %10 = arith.cmpf oge, %4, %9 : vector<8x1xf32>
    %cst_3 = arith.constant 2.000000e+00 : f32
    %cst_4 = arith.constant 1.000000e+00 : f32
    %11 = vector.broadcast %cst_3 : f32 to vector<8x1xf32>
    %12 = vector.broadcast %cst_4 : f32 to vector<8x1xf32>
    %13 = arith.select %10, %11, %12 : vector<8x1xi1>, vector<8x1xf32>
    %14 = arith.mulf %8, %13 : vector<8x1xf32>
    %cst_5 = arith.constant 2.000000e+00 : f32
    %15 = vector.broadcast %cst_5 : f32 to vector<8x1xf32>
    %16 = arith.cmpf oge, %4, %15 : vector<8x1xf32>
    %cst_6 = arith.constant 2.000000e+00 : f32
    %cst_7 = arith.constant 1.000000e+00 : f32
    %17 = vector.broadcast %cst_6 : f32 to vector<8x1xf32>
    %18 = vector.broadcast %cst_7 : f32 to vector<8x1xf32>
    %19 = arith.select %16, %17, %18 : vector<8x1xi1>, vector<8x1xf32>
    %20 = arith.mulf %14, %19 : vector<8x1xf32>
    %cst_8 = arith.constant 3.000000e+00 : f32
    %21 = vector.broadcast %cst_8 : f32 to vector<8x1xf32>
    %22 = arith.cmpf oge, %4, %21 : vector<8x1xf32>
    %cst_9 = arith.constant 2.000000e+00 : f32
    %cst_10 = arith.constant 1.000000e+00 : f32
    %23 = vector.broadcast %cst_9 : f32 to vector<8x1xf32>
    %24 = vector.broadcast %cst_10 : f32 to vector<8x1xf32>
    %25 = arith.select %22, %23, %24 : vector<8x1xi1>, vector<8x1xf32>
    %26 = arith.mulf %20, %25 : vector<8x1xf32>
    %cst_11 = arith.constant 3.14159274 : f32
    %27 = vector.broadcast %cst_11 : f32 to vector<8x1xf32>
    %28 = arith.mulf %27, %26 : vector<8x1xf32>
    %cst_12 = arith.constant 1.57079637 : f32
    %29 = vector.broadcast %cst_12 : f32 to vector<8x1xf32>
    %30 = arith.mulf %7, %29 : vector<8x1xf32>
    %31 = vector.extract_strided_slice %0 {offsets = [0, 0], sizes = [1, 1536], strides = [1, 1]} : vector<3x1536xf32> to vector<1x1536xf32>
    %32 = vector.broadcast %31 : vector<1x1536xf32> to vector<8x1536xf32>
    %33 = vector.broadcast %28 : vector<8x1xf32> to vector<8x1536xf32>
    %34 = arith.mulf %32, %33 : vector<8x1536xf32>
    %35 = vector.broadcast %30 : vector<8x1xf32> to vector<8x1536xf32>
    %36 = arith.addf %34, %35 : vector<8x1536xf32>
    %37 = math.sin %36 : vector<8x1536xf32>
    %c0_13 = arith.constant 0 : index
    %c0_14 = arith.constant 0 : index
    %38 = vector.load %arg2[%c0_13, %c0_14] : memref<27x1536xf32, #tpu.memory_space<vmem>>, vector<8x1536xf32>
    tpu.vector_store %arg2[%c0_13, %c0_14], %37 {strides = array<i32>} : memref<27x1536xf32, #tpu.memory_space<vmem>>, vector<8x1536xf32>,
    %39 = vector.extract_strided_slice %0 {offsets = [1, 0], sizes = [1, 1536], strides = [1, 1]} : vector<3x1536xf32> to vector<1x1536xf32>
    %40 = vector.broadcast %39 : vector<1x1536xf32> to vector<8x1536xf32>
    %41 = vector.broadcast %28 : vector<8x1xf32> to vector<8x1536xf32>
    %42 = arith.mulf %40, %41 : vector<8x1536xf32>
    %43 = vector.broadcast %30 : vector<8x1xf32> to vector<8x1536xf32>
    %44 = arith.addf %42, %43 : vector<8x1536xf32>
    %45 = math.sin %44 : vector<8x1536xf32>
    %c8 = arith.constant 8 : index
    %c0_15 = arith.constant 0 : index
    %46 = vector.load %arg2[%c8, %c0_15] : memref<27x1536xf32, #tpu.memory_space<vmem>>, vector<8x1536xf32>
    tpu.vector_store %arg2[%c8, %c0_15], %45 {strides = array<i32>} : memref<27x1536xf32, #tpu.memory_space<vmem>>, vector<8x1536xf32>,
    %47 = vector.extract_strided_slice %0 {offsets = [2, 0], sizes = [1, 1536], strides = [1, 1]} : vector<3x1536xf32> to vector<1x1536xf32>
    %48 = vector.broadcast %47 : vector<1x1536xf32> to vector<8x1536xf32>
    %49 = vector.broadcast %28 : vector<8x1xf32> to vector<8x1536xf32>
    %50 = arith.mulf %48, %49 : vector<8x1536xf32>
    %51 = vector.broadcast %30 : vector<8x1xf32> to vector<8x1536xf32>
    %52 = arith.addf %50, %51 : vector<8x1536xf32>
    %53 = math.sin %52 : vector<8x1536xf32>
    %c16 = arith.constant 16 : index
    %c0_16 = arith.constant 0 : index
    %54 = vector.load %arg2[%c16, %c0_16] : memref<27x1536xf32, #tpu.memory_space<vmem>>, vector<8x1536xf32>
    tpu.vector_store %arg2[%c16, %c0_16], %53 {strides = array<i32>} : memref<27x1536xf32, #tpu.memory_space<vmem>>, vector<8x1536xf32>,
    %c24 = arith.constant 24 : index
    %c0_17 = arith.constant 0 : index
    %55 = vector.load %arg2[%c24, %c0_17] : memref<27x1536xf32, #tpu.memory_space<vmem>>, vector<3x1536xf32>
    tpu.vector_store %arg2[%c24, %c0_17], %0 {strides = array<i32>} : memref<27x1536xf32, #tpu.memory_space<vmem>>, vector<3x1536xf32>,
    return
  }
  func.func @transform_0(%arg0: i32) -> (i32, i32) {
    %c0_i32 = arith.constant 0 : i32
    %c0_i32_0 = arith.constant 0 : i32
    return %c0_i32, %arg0 : i32, i32
  }
  func.func @transform_1(%arg0: i32) -> (i32, i32) {
    %c0_i32 = arith.constant 0 : i32
    %c0_i32_0 = arith.constant 0 : i32
    return %c0_i32, %arg0 : i32, i32
  }
}

</mosaic_0001>

<bundles_post_ra>
// kernel: tpu_custom_call.1
= control target key start
LH: loop header
LB: loop body
LE: loop exit
PB: predicated region body
PF: predicated region fallthrough
CT: control target
= control target key end

     0   :  { %6 = vsyncpa [#allocation3], 0  ;;  %s8534_s0 = inlined_call_operand.hbm [shape: f32[3,3000], index: 0, kind: input, shape index: {}]   ;;  %s8535_s1 = inlined_call_operand.hbm [shape: f32[27,3000], index: 1, kind: output, shape index: {}]  }
   0x1   :  { %8 = vsyncpa [#allocation3 + $0x1], 0 }
   0x2   :  { %9 = vsyncpa [#allocation4], 0 }
   0x3   :  { %11 = vsyncpa [#allocation4 + $0x1], 0  ;;  %s5077_s6 = smov 0   ;;  %s5079_s7 = smov 0  }
   0x4   :  { %s5081_s8 = smov 0   ;;  %s5083_s9 = smov 0  }
   0x5 LB: > { %s5098_s10 = sadd.s32 4294967295, %s5053_s9   ;;  %s4450_s11 = sadd.s32 4294967294, %s5053_s9   ;;  %s5053_s9 = sphi %s5083_s9, %s8634_s9   ;;  %s5049_s8 = sphi %s5081_s8, %s8633_s8   ;;  %s5045_s7 = sphi %s5079_s7, %s8632_s7   ;;  %s5041_s6 = sphi %s5077_s6, %s8631_s6  }
   0x6   : > { %s5102_s12 = sadd.s32 1, %s5053_s9   ;;  %s24_s13 = sadd.s32 1, %s5049_s8 }
   0x7   : > { %s21_s14 = ssub.s32 %s5053_s9, %s5102_s12  ;;  %p31_p0 = scmp.ne.s32.totalorder %s5049_s8, %s5045_s7 }
   0x8   : > { %p22_p1 = scmp.eq.s32.totalorder %s21_s14, 0  ;;  %p32_p2 = scmp.eq.s32.totalorder %s5053_s9, 0 }
   0x9   : > { %p37_p3 = scmp.ne.s32.totalorder %s5045_s7, %s5041_s6  ;;  %p38_p4 = scmp.eq.s32.totalorder %s5098_s10, 0 }
   0xa   : > { %s5114_s15 = scalar_select %p22_p1, %s5049_s8, %s24_s13  }
   0xb   : > { %p33_p5 = por %p32_p2, %p31_p0  ;;  %p5116_p6 = por %p38_p4, %p37_p3 }
   0xc   : > { %p61_p7 = scmp.eq.s32.totalorder %s5098_s10, 1  ;;  %p67_p8 = scmp.eq.s32.totalorder %s4450_s11, 1 }
   0xd   : > { %p4763_p10 = scmp.lt.s32.totalorder %s5053_s9, 2  ;;  %s87_s19 = sand.u32 1, %s5049_s8  }
   0xe   : > { %p5123_p11 = por %p61_p7, %p31_p0  ;;  %p5127_p12 = por %p67_p8, %p37_p3 }
   0xf   : > { %s4602_s20 = smul.u32 768, %s5053_s9  ;;  %p5138_p13 = pnand %p4763_p10, %p33_p5 }
  0x10   : > { %s8547_s17 = scalar_select %p5123_p11, 1, 0 }
  0x11   : > { %s8548_s18 = scalar_select %p5127_p12, 1, 0 }
  0x12   : > { %s4604_s21 = smul.u32 48, %s87_s19  ;;  %s5136_s24 = scalar_lea.hbm %s8534_s0, %s4602_s20 }
  0x13   : > { %s88_s28 = scalar_lea.sflag [#allocation3], %s87_s19  ;;  %s4957_s29 = scalar_lea.hbm %s5136_s24, 768 }
  0x14   : > { %s91_s26 = scalar_lea.vmem [#allocation2], %s4604_s21  ;;  %p4958_p2 = scmp.ne.s32.totalorder %s5136_s24, %s4957_s29 }
  0x15   : > { %s99_s27 = sshll.u32 %s91_s26, 4  ;;  %p4959_p3 = pneg %p5138_p13  ;;  %s5143_s27 = int_to_ptr.vmem [resolvable:$true] %s99_s27 }
  0x16   : > { %s4962_s3 = scalar_lea.hbm %s8534_s0, 1536  ;;  %p4963_p7 = scmp.lt.u32.totalorder %s5136_s24, %s8534_s0 }
  0x17   : > { %p4960_p4 = pnand %p4959_p3, %p4958_p2  ;;  %p4964_p8 = scmp.lt.u32.totalorder %s4962_s3, %s4957_s29 }
  0x18   : > { %p4966_p9 = scmp.lt.u32.totalorder %s4957_s29, %s5136_s24 }
  0x19   : > { %p4961_p5 = pneg %p4960_p4  ;;  %p4965_p10 = por %p4964_p8, %p4963_p7 }
  0x1b   : > { %p4967_p0 = por %p4966_p9, %p4965_p10 }
  0x1d   : > { %p4968_p1 = pnand %p4967_p0, %p4961_p5 }
  0x1f   : > { %4971 = shalt.err (!%p4968_p1)
}
  0x20   : > { %s4972_s11 = scalar_lea.vmem %s5143_s27, 768  ;;  %s5055_s13 = smov [#allocation2]  }
  0x21   : > { %p4973_p2 = scmp.ne.s32.totalorder %s5143_s27, %s4972_s11  ;;  %s4977_s14 = sshll.u32 %s5055_s13, 4  ;;  %s4978_s14 = int_to_ptr.vmem [resolvable:$false] %s4977_s14 }
  0x22   : > { %s4979_s19 = scalar_lea.vmem %s4978_s14, 1536  ;;  %p4980_p11 = scmp.lt.s32.totalorder %s5143_s27, %s4978_s14 }
  0x23   : > { %p4975_p4 = pnand %p4973_p2, %p4959_p3  ;;  %p4981_p7 = scmp.lt.s32.totalorder %s4979_s19, %s4972_s11 }
  0x25   : > { %p4976_p12 = pneg %p4975_p4  ;;  %p4982_p8 = por %p4981_p7, %p4980_p11 }
  0x27   : > { %p4983_p9 = pnand %p4982_p8, %p4976_p12 }
  0x29   : > { %4986 = shalt.err (!%p4983_p9)
}
  0x2a   : > { %4758 = dma.hbm_to_vmem [thread:$0]  (!%p5138_p13), %s5136_s24, 768, %s5143_s27, %s88_s28  }
  0x2b   : > { %p8550_p0 = scmp.lt.s32.totalorder %s5053_s9, 3  ;;  %p8551_p1 = scmp.ge.s32.totalorder %s5053_s9, 1 }
  0x2d   : > { %p105_p3 = pnand %p8551_p1, %p8550_p0 }
  0x2e   : > { %s5176_s20 = sand.u32 (!%p105_p3), 1, %s5045_s7  }
  0x2f   : > { %108 = sbr.rel (%p105_p3) target bundleno = 1043 (0x413), region = 24  ;;  %s111_s22 = scalar_lea.sflag (!%p105_p3), [#allocation3], %s5176_s20 }
  0x30   : > { %s4605_s21 = smul.u32 (!%p105_p3), 48, %s5176_s20 }
  0x32   : > { %s114_s23 = scalar_lea.vmem (!%p105_p3), [#allocation2], %s4605_s21 }
  0x36   : > { %5032 = dma.done.wait (%p5116_p6), %s111_s22, 768  }
  0x37   : > { %5034 = vsyncadd (%p5116_p6), %s111_s22, 4294966528  ;;  %v141_v0 = vlaneseq  ;;  %s4606_s24 = smul.u32 384, %s5176_s20  ;;  %v5193_v7 = vld [vmem:[%s114_s23] sm:$0x77]  ;;  %v5195_v8 = vld [vmem:[%s114_s23 + $0x8] sm:$0x77] }
  0x38   : > { %v5197_v9 = vld [vmem:[%s114_s23 + $0x10] sm:$0x77]  ;;  %v5199_v10 = vld [vmem:[%s114_s23 + $0x18] sm:$0x77]  ;;  %v5201_v11 = vld [vmem:[%s114_s23 + $0x20] sm:$0x77] }
  0x39   : > { %v5185_v1 = vshrl.u32 %v141_v0, 7  ;;  %v5203_v12 = vld [vmem:[%s114_s23 + $0x28] sm:$0x77]  ;;  %s5207_s16 = scalar_lea.vmem [#allocation5], %s4606_s24  ;;  %v5056_v15 = vmov 1.0   ;;  %s4603_s25 = smul.u32 1536, %s5098_s10 }
  0x3a   : > { %4351 = vst [vmem:[%s5207_s16 + $0x120] sm:$0x7] %v5193_v7  ;;  %4353 = vst [vmem:[%s5207_s16 + $0x130] sm:$0x7] %v5195_v8  ;;  %s4377_s26 = sshll.u32 %s5207_s16, 4  ;;  %s4364_s10 = scalar_lea.sflag [#allocation4], %s5176_s20  ;;  %s8489_s26 = int_to_ptr.vmem [resolvable:$true] %s4377_s26 }
  0x3b   : > { %v143_v2 = vshra.s32 %v5185_v1, 1  ;;  %v5189_v3 = vsub.s32 0, %v5185_v1  ;;  %v169_v4 = vsub.s32 4, %v5185_v1  ;;  %v145_v6 = vand.u32 1, %v5185_v1  ;;  %4355 = vst [vmem:[%s5207_s16 + $0x140] sm:$0x7] %v5197_v9  ;;  %s8487_s29 = scalar_lea.hbm %s8535_s1, %s4603_s25 }
  0x3c   : > { %4357 = vst [vmem:[%s5207_s16 + $0x150] sm:$0x7] %v5199_v10  ;;  %4359 = vst [vmem:[%s5207_s16 + $0x160] sm:$0x7] %v5201_v11  ;;  %s4987_s30 = scalar_lea.vmem %s8489_s26, 6144  ;;  %p8628_p11 = scmp.ne.s32.totalorder %s8547_s17, 0 }
  0x3d   : > { %v144_v5 = vcvt.s32.f32 %v143_v2  ;;  %v166_v13 = vrot.slane %v5193_v7, %v5189_v3  ;;  %v170_v14 = vrot.slane %v5193_v7, %v169_v4  ;;  %4361 = vst [vmem:[%s5207_s16 + $0x170] sm:$0x7] %v5203_v12  ;;  %v174_v19 = vrot.slane %v5195_v8, %v5189_v3  ;;  %p4988_p6 = scmp.ne.s32.totalorder %s8489_s26, %s4987_s30  ;;  %s5063_s2 = smov [#allocation5]  }
  0x3e   : > { %v186_v21 = vrot.slane %v5197_v9, %v169_v4  ;;  %v194_v22 = vrot.slane %v5199_v10, %v169_v4  ;;  %v146_v23 = vcvt.s32.f32 %v145_v6  ;;  %v202_v24 = vrot.slane %v5201_v11, %v169_v4  ;;  %s4991_s3 = sshll.u32 %s5063_s2, 4  ;;  %s4992_s3 = int_to_ptr.vmem [resolvable:$false] %s4991_s3 }
  0x3f   : > { %vm147_vm0 = vcmp.ge.f32.partialorder %v144_v5, 1.0  ;;  %vm149_vm1 = vcmp.ge.f32.partialorder %v144_v5, 2.0  ;;  %vm152_vm2 = vcmp.ge.f32.partialorder %v144_v5, 3.0  ;;  %v210_v25 = vrot.slane %v5203_v12, %v169_v4  ;;  %p4989_p12 = pnand %p4988_p6, %p8628_p11  ;;  %s4993_s4 = scalar_lea.vmem %s4992_s3, 12288 }
  0x40   : > { %v148_v16 = vsel %vm147_vm0, 2.0, %v5056_v15  ;;  %v150_v17 = vsel %vm149_vm1, 2.0, %v5056_v15  ;;  %v153_v18 = vsel %vm152_vm2, 2.0, %v5056_v15  ;;  %v226_v27 = vrot.slane %v166_v13, %v5189_v3  ;;  %p4994_p5 = scmp.lt.s32.totalorder %s8489_s26, %s4992_s3  ;;  %p4995_p10 = scmp.lt.s32.totalorder %s4993_s4, %s4987_s30 }
  0x41   : > { %v151_v20 = vmul.f32 %v150_v17, %v148_v16  ;;  %v230_v28 = vrot.slane %v170_v14, %v5189_v3  ;;  %v234_v29 = vrot.slane %v174_v19, %v5189_v3  ;;  %v246_v30 = vrot.slane %v186_v21, %v5189_v3  ;;  %p4990_p13 = pneg %p4989_p12 }
  0x42   : > { %v5235_v32 = vrot.slane %v194_v22, %v5189_v3  ;;  %v5238_v33 = vrot.slane %v202_v24, %v5189_v3  ;;  %v5240_v34 = vmul.f32 1.5707964, %v146_v23  ;;  %v5243_v35 = vrot.slane %v210_v25, %v5189_v3  ;;  %p4996_p2 = por %p4995_p10, %p4994_p5 }
  0x43   : > { %v154_v26 = vmul.f32 %v153_v18, %v151_v20  ;;  %v178_v39 = vrot.slane %v5195_v8, %v169_v4  ;;  %v182_v43 = vrot.slane %v5197_v9, %v5189_v3  ;;  %v190_v54 = vrot.slane %v5199_v10, %v5189_v3 }
  0x44   : > { %v198_v4 = vrot.slane %v5201_v11, %v5189_v3  ;;  %v5057_v25 = vmov 683565275   ;;  %p4997_p4 = pnand %p4996_p2, %p4990_p13 }
  0x45   : > { %v5232_v31 = vmul.f32 3.1415927, %v154_v26  ;;  %v238_v46 = vrot.slane %v178_v39, %v5189_v3  ;;  %v242_v55 = vrot.slane %v182_v43, %v5189_v3  ;;  %v5278_v5 = vrot.slane %v190_v54, %v5189_v3 }
  0x47   : > { %v271_v36 = vmul.f32 %v226_v27, %v5232_v31  ;;  %v272_v37 = vmul.f32 %v230_v28, %v5232_v31  ;;  %v273_v38 = vmul.f32 %v234_v29, %v5232_v31  ;;  %v274_v57 = vmul.f32 %v238_v46, %v5232_v31 }
  0x48   : > { %v5281_v6 = vmul.f32 %v242_v55, %v5232_v31  ;;  %v5284_v13 = vmul.f32 %v246_v30, %v5232_v31  ;;  %v5058_v27 = vmov 2475754826   ;;  %v8543_v29 = vmov 2131351028  }
  0x49   : > { %v5250_v40 = vadd.f32 %v271_v36, %v5240_v34  ;;  %v5253_v41 = vadd.f32 %v272_v37, %v5240_v34  ;;  %v5256_v42 = vadd.f32 %v273_v38, %v5240_v34  ;;  %v5287_v14 = vadd.f32 %v274_v57, %v5240_v34 }
  0x4a   : > { %v8539_v36 = vmov 2102212464   ;;  %v5061_v38 = vmov 920167782  }
  0x4b   : > { %v295_v44 = vand.u32 2147483647, %v5250_v40  ;;  %v298_v45 = vand.u32 2139095040, %v5250_v40  ;;  %v399_v47 = vand.u32 2147483647, %v5253_v41  ;;  %v402_v48 = vand.u32 2139095040, %v5253_v41 }
  0x4c   : > { %v506_v53 = vand.u32 2139095040, %v5256_v42  ;;  %v8538_v0 = vand.u32 2147483647, %v5256_v42  ;;  %vm297_vm15 = vcmp.lt.s32.totalorder %v5250_v40, 0 }
  0x4d   : > { %v299_v49 = vshrl.u32 %v298_v45, 23  ;;  %v302_v50 = vand.u32 8388607, %v295_v44  ;;  %v403_v51 = vshrl.u32 %v402_v48, 23  ;;  %v406_v52 = vand.u32 8388607, %v399_v47 }
  0x4e   : > { %v507_v59 = vshrl.u32 %v506_v53, 23  ;;  %v5295_v22 = vand.u32 8388607, %v8538_v0  ;;  %vm5402_vm1 = vcmp.le.f32.partialorder %v295_v44, 0.7853982 }
  0x4f   : > { %v4455_v56 = vadd.s32 4294967169, %v299_v49  ;;  %v4459_v58 = vadd.s32 4294967169, %v403_v51  ;;  %v303_v60 = vor.u32 8388608, %v302_v50  ;;  %v407_v62 = vor.u32 8388608, %v406_v52 }
  0x50   : > { %v4463_v2 = vadd.s32 4294967169, %v507_v59  ;;  %v5062_v51 = vmov 1326507024  }
  0x51   : > { %v305_v61 = vadd.s32 1, %v4455_v56  ;;  %v409_v63 = vadd.s32 1, %v4459_v58  ;;  %v5289_v18 = vshll.u32 %v303_v60, 8  ;;  %v5291_v21 = vshll.u32 %v407_v62, 8 }
  0x52   : > { %v5297_v23 = vadd.s32 1, %v4463_v2 }
  0x53   : > { %vm306_vm3 = vcmp.gt.s32.totalorder %v305_v61, 0  ;;  %vm410_vm4 = vcmp.gt.s32.totalorder %v409_v63, 0 }
  0x54   : > { %v307_v15 = vsel %vm306_vm3, %v305_v61, 0  ;;  %v411_v19 = vsel %vm410_vm4, %v409_v63, 0  ;;  %vm514_vm9 = vcmp.gt.s32.totalorder %v5297_v23, 0 }
  0x55   : > { %v308_v16 = vshrl.u32 %v307_v15, 5  ;;  %v309_v17 = vand.u32 31, %v307_v15  ;;  %v413_v20 = vand.u32 31, %v411_v19  ;;  %v5304_v43 = vshrl.u32 %v411_v19, 5 }
  0x57   : > { %v310_v24 = vsub.s32 32, %v309_v17  ;;  %v312_v26 = vshll.u32 %v5057_v25, %v309_v17  ;;  %v315_v28 = vshll.u32 %v5058_v27, %v309_v17  ;;  %v318_v30 = vshll.u32 %v8543_v29, %v309_v17 }
  0x58   : > { %v321_v37 = vshll.u32 %v8539_v36, %v309_v17  ;;  %v324_v39 = vshll.u32 %v5061_v38, %v309_v17  ;;  %vm327_vm5 = vcmp.lt.s32.totalorder %v308_v16, 1  ;;  %vm328_vm6 = vcmp.lt.s32.totalorder %v308_v16, 2 }
  0x59   : > { %v311_v45 = vshrl.u32 %v5057_v25, %v310_v24  ;;  %v313_v46 = vshrl.u32 %v5058_v27, %v310_v24  ;;  %v316_v48 = vshrl.u32 %v8543_v29, %v310_v24  ;;  %v319_v49 = vshrl.u32 %v8539_v36, %v310_v24 }
  0x5a   : > { %v322_v50 = vshrl.u32 %v5061_v38, %v310_v24  ;;  %v325_v52 = vshrl.u32 %v5062_v51, %v310_v24  ;;  %vm330_vm7 = vcmp.lt.s32.totalorder %v308_v16, 4  ;;  %v414_v56 = vsub.s32 32, %v413_v20 }
  0x5b   : > { %v314_v53 = vor.u32 %v313_v46, %v312_v26  ;;  %v317_v54 = vor.u32 %v316_v48, %v315_v28  ;;  %v320_v55 = vor.u32 %v319_v49, %v318_v30  ;;  %vm329_vm8 = vcmp.lt.s32.totalorder %v308_v16, 3 }
  0x5c   : > { %v323_v57 = vor.u32 %v322_v50, %v321_v37  ;;  %v326_v58 = vor.u32 %v325_v52, %v324_v39  ;;  %v416_v59 = vshll.u32 %v5057_v25, %v413_v20  ;;  %v419_v19 = vshll.u32 %v5058_v27, %v413_v20 }
  0x5d   : > { %v331_v60 = vsel %vm327_vm5, %v311_v45, %v314_v53  ;;  %v332_v61 = vsel %vm330_vm7, %v320_v55, 2102212464  ;;  %v335_v62 = vsel %vm327_vm5, %v314_v53, %v317_v54  ;;  %v339_v63 = vsel %vm327_vm5, %v317_v54, %v320_v55 }
  0x5e   : > { %v333_v2 = vsel %vm329_vm8, %v317_v54, %v332_v61  ;;  %v336_v15 = vsel %vm330_vm7, %v323_v57, 920167782  ;;  %v340_v17 = vsel %vm330_vm7, %v326_v58, 1326507024  ;;  %v415_v28 = vshrl.u32 %v5057_v25, %v414_v56 }
  0x5f   : > { %v337_v24 = vsel %vm329_vm8, %v320_v55, %v336_v15  ;;  %v341_v26 = vsel %vm329_vm8, %v323_v57, %v340_v17  ;;  %v417_v30 = vshrl.u32 %v5058_v27, %v414_v56  ;;  %v334_v37 = vsel %vm328_vm6, %v331_v60, %v333_v2 }
  0x60   : > { %v338_v39 = vsel %vm328_vm6, %v335_v62, %v337_v24  ;;  %v342_v45 = vsel %vm328_vm6, %v339_v63, %v341_v26  ;;  %v420_v46 = vshrl.u32 %v8543_v29, %v414_v56  ;;  %v422_v55 = vshll.u32 %v8543_v29, %v413_v20 }
  0x61   : > { %v5325_v48 = vmul.u32.u64.low %v5289_v18, %v342_v45  ;;  %v5326_v49 = vmul.u32.u64.high %v5289_v18, %v342_v45, %v5325_v48  ;;  %v5329_v50 = vmul.u32.u64.low %v5289_v18, %v338_v39  ;;  %v5330_v52 = vmul.u32.u64.high %v5289_v18, %v338_v39, %v5329_v50 }
  0x62   : > { %v418_v53 = vor.u32 %v417_v30, %v416_v59  ;;  %v421_v54 = vor.u32 %v420_v46, %v419_v19  ;;  %v423_v57 = vshrl.u32 %v8539_v36, %v414_v56  ;;  %v425_v16 = vshll.u32 %v8539_v36, %v413_v20 }
  0x63   : > { %v426_v58 = vshrl.u32 %v5061_v38, %v414_v56  ;;  %v428_v60 = vshll.u32 %v5061_v38, %v413_v20  ;;  %v429_v61 = vshrl.u32 %v5062_v51, %v414_v56  ;;  %v350_v62 = vmul.u32 %v5289_v18, %v334_v37 }
  0x64   : > { %v424_v63 = vor.u32 %v423_v57, %v422_v55  ;;  %vm431_vm10 = vcmp.lt.s32.totalorder %v5304_v43, 1  ;;  %vm432_vm11 = vcmp.lt.s32.totalorder %v5304_v43, 2  ;;  %vm352_vm12 = vc.u32 %v5326_v49, %v5329_v50 }
  0x65   : > { %v353_v59 = vadd.s32 1, %v5330_v52  ;;  %v427_v2 = vor.u32 %v426_v58, %v425_v16  ;;  %vm433_vm13 = vcmp.lt.s32.totalorder %v5304_v43, 3  ;;  %v430_v15 = vor.u32 %v429_v61, %v428_v60 }
  0x66   : > { %vm434_vm14 = vcmp.lt.s32.totalorder %v5304_v43, 4  ;;  %v435_v20 = vsel %vm431_vm10, %v415_v28, %v418_v53  ;;  %v439_v56 = vsel %vm431_vm10, %v418_v53, %v421_v54  ;;  %v443_v24 = vsel %vm431_vm10, %v421_v54, %v424_v63 }
  0x67   : > { %v354_v18 = vsel %vm352_vm12, %v353_v59, %v5330_v52  ;;  %v436_v17 = vsel %vm434_vm14, %v424_v63, 2102212464  ;;  %v440_v19 = vsel %vm434_vm14, %v427_v2, 920167782  ;;  %v444_v39 = vsel %vm434_vm14, %v430_v15, 1326507024 }
  0x68   : > { %v355_v26 = vadd.s32 %v354_v18, %v350_v62  ;;  %v437_v30 = vsel %vm433_vm13, %v421_v54, %v436_v17  ;;  %v441_v37 = vsel %vm433_vm13, %v424_v63, %v440_v19  ;;  %v445_v48 = vsel %vm433_vm13, %v427_v2, %v444_v39 }
  0x69   : > { %v438_v45 = vsel %vm432_vm11, %v435_v20, %v437_v30  ;;  %v442_v46 = vsel %vm432_vm11, %v439_v56, %v441_v37  ;;  %v515_v28 = vsel %vm514_vm9, %v5297_v23, 0  ;;  %v446_v52 = vsel %vm432_vm11, %v443_v24, %v445_v48 }
  0x6a   : > { %v356_v53 = vadd.s32 536870912, %v355_v26  ;;  %v5358_v55 = vmul.u32.u64.low %v5291_v21, %v442_v46  ;;  %v5359_v54 = vmul.u32.u64.high %v5291_v21, %v442_v46, %v5358_v55  ;;  %v511_v58 = vor.u32 8388608, %v5295_v22 }
  0x6b   : > { %v5363_v57 = vmul.u32.u64.low %v5291_v21, %v446_v52  ;;  %v5364_v16 = vmul.u32.u64.high %v5291_v21, %v446_v52, %v5363_v57  ;;  %v8537_v60 = vand.u32 2147483647, %v5287_v14  ;;  %v5374_v43 = vrot.slane %v198_v4, %v5189_v3 }
  0x6c   : > { %v357_v61 = vshrl.u32 %v356_v53, 30  ;;  %v517_v62 = vand.u32 31, %v515_v28  ;;  %v5378_v63 = vmul.f32 %v5278_v5, %v5232_v31  ;;  %v5382_v22 = vadd.f32 %v5281_v6, %v5240_v34 }
  0x6d   : > { %v5386_v59 = vadd.f32 %v5284_v13, %v5240_v34  ;;  %v454_v2 = vmul.u32 %v5291_v21, %v438_v45  ;;  %v457_v15 = vadd.s32 1, %v5359_v54  ;;  %vm456_vm0 = vc.u32 %v5364_v16, %v5358_v55 }
  0x6e   : > { %v358_v4 = vshll.u32 %v357_v61, 30  ;;  %v518_v20 = vsub.s32 32, %v517_v62  ;;  %v5393_v5 = vshll.u32 %v511_v58, 8  ;;  %v610_v6 = vand.u32 2139095040, %v5287_v14 }
  0x6f   : > { %v5398_v56 = vand.u32 8388607, %v8537_v60  ;;  %v381_v18 = vsub.s32 4, %v357_v61  ;;  %v458_v17 = vsel %vm456_vm0, %v457_v15, %v5359_v54  ;;  %v516_v19 = vshrl.u32 %v515_v28, 5 }
  0x70   : > { %v5406_v21 = vsub.s32 %v355_v26, %v358_v4  ;;  %v459_v24 = vadd.s32 %v458_v17, %v454_v2  ;;  %v520_v30 = vshll.u32 %v5057_v25, %v517_v62  ;;  %v521_v37 = vshrl.u32 %v5058_v27, %v518_v20 }
  0x71   : > { %v523_v39 = vshll.u32 %v5058_v27, %v517_v62  ;;  %v524_v44 = vshrl.u32 %v8543_v29, %v518_v20  ;;  %v526_v46 = vshll.u32 %v8543_v29, %v517_v62  ;;  %v527_v26 = vshrl.u32 %v8539_v36, %v518_v20 }
  0x72   : > { %v361_v45 = vsub.s32 0, %v5406_v21  ;;  %v351_v48 = vadd.s32 %v5329_v50, %v5326_v49  ;;  %v460_v53 = vadd.s32 536870912, %v459_v24  ;;  %v529_v28 = vshll.u32 %v8539_v36, %v517_v62 }
  0x73   : > { %v611_v52 = vshrl.u32 %v610_v6, 23  ;;  %v382_v57 = vsel %vm297_vm15, %v381_v18, %v357_v61  ;;  %v530_v58 = vshrl.u32 %v5061_v38, %v518_v20  ;;  %vm538_vm2 = vcmp.lt.s32.totalorder %v516_v19, 4 }
  0x74   : > { %v4456_v54 = vmin.u32 %v361_v45, %v5406_v21  ;;  %v5423_v2 = vshrl.u32 %v460_v53, 30  ;;  %v519_v4 = vshrl.u32 %v5057_v25, %v518_v20  ;;  %v532_v15 = vshll.u32 %v5061_v38, %v517_v62 }
  0x75   : > { %v533_v49 = vshrl.u32 %v5062_v51, %v518_v20  ;;  %v522_v17 = vor.u32 %v521_v37, %v520_v30  ;;  %v525_v23 = vor.u32 %v524_v44, %v523_v39  ;;  %v528_v6 = vor.u32 %v527_v26, %v526_v46 }
  0x76   : > { %v363_v50 = vclz %v4456_v54  ;;  %v462_v45 = vshll.u32 %v5423_v2, 30  ;;  %v531_v60 = vor.u32 %v530_v58, %v529_v28  ;;  %vm535_vm3 = vcmp.lt.s32.totalorder %v516_v19, 1 }
  0x77   : > { %vm537_vm4 = vcmp.lt.s32.totalorder %v516_v19, 3  ;;  %v534_v18 = vor.u32 %v533_v49, %v532_v15  ;;  %v540_v53 = vsel %vm538_vm2, %v528_v6, 2102212464  ;;  %v4467_v0 = vadd.s32 4294967169, %v611_v52 }
  0x78   : > { %v4457_v61 = vadd.s32 4294967294, %v363_v50  ;;  %v384_v36 = vsel %vm5402_vm1, 0, %v382_v57  ;;  %v5432_v62 = vsub.s32 %v459_v24, %v462_v45  ;;  %vm536_vm5 = vcmp.lt.s32.totalorder %v516_v19, 2 }
  0x79   : > { %v544_v20 = vsel %vm538_vm2, %v531_v60, 920167782  ;;  %v539_v30 = vsel %vm535_vm3, %v519_v4, %v522_v17  ;;  %v543_v37 = vsel %vm535_vm3, %v522_v17, %v525_v23  ;;  %v541_v26 = vsel %vm537_vm4, %v525_v23, %v540_v53 }
  0x7a   : > { %vm4458_vm6 = vcmp.lt.s32.totalorder %v4457_v61, 0  ;;  %v545_v39 = vsel %vm537_vm4, %v528_v6, %v544_v20  ;;  %v465_v46 = vsub.s32 0, %v5432_v62  ;;  %v547_v28 = vsel %vm535_vm3, %v525_v23, %v528_v6 }
  0x7b   : > { %v366_v44 = vsel %vm4458_vm6, 0, %v4457_v61  ;;  %v548_v57 = vsel %vm538_vm2, %v534_v18, 1326507024  ;;  %vm401_vm7 = vcmp.lt.s32.totalorder %v5253_v41, 0  ;;  %v546_v4 = vsel %vm536_vm5, %v543_v37, %v545_v39 }
  0x7c   : > { %v367_v52 = vsub.s32 32, %v366_v44  ;;  %v368_v24 = vshll.u32 %v5406_v21, %v366_v44  ;;  %v371_v54 = vsub.s32 4294967266, %v366_v44  ;;  %v4460_v58 = vmin.u32 %v465_v46, %v5432_v62 }
  0x7d   : > { %v549_v15 = vsel %vm537_vm4, %v531_v60, %v548_v57  ;;  %v617_v45 = vadd.s32 1, %v4467_v0  ;;  %v388_v23 = vadd.s32 3, %v384_v36  ;;  %v542_v21 = vsel %vm536_vm5, %v539_v30, %v541_v26 }
  0x7e   : > { %v369_v49 = vshrl.u32 %v351_v48, %v367_v52  ;;  %v372_v50 = vadd.s32 127, %v371_v54  ;;  %v550_v17 = vsel %vm536_vm5, %v547_v28, %v549_v15  ;;  %v467_v6 = vclz %v4460_v58 }
  0x7f   : > { %v615_v61 = vor.u32 8388608, %v5398_v56  ;;  %v5451_v20 = vmul.u32.u64.low %v5393_v5, %v550_v17  ;;  %v5452_v44 = vmul.u32.u64.high %v5393_v5, %v550_v17, %v5451_v20  ;;  %vm618_vm8 = vcmp.gt.s32.totalorder %v617_v45, 0 }
  0x80   : > { %v370_v18 = vor.u32 %v369_v49, %v368_v24  ;;  %v373_v53 = vshll.u32 %v372_v50, 23  ;;  %v4461_v37 = vadd.s32 4294967294, %v467_v6  ;;  %v485_v19 = vsub.s32 4, %v5423_v2 }
  0x81   : > { %v5455_v60 = vmul.u32.u64.low %v5393_v5, %v546_v4  ;;  %v5456_v48 = vmul.u32.u64.high %v5393_v5, %v546_v4, %v5455_v60  ;;  %v619_v30 = vsel %vm618_vm8, %v617_v45, 0  ;;  %v5460_v39 = vand.u32 3, %v388_v23 }
  0x82   : > { %v374_v0 = vor.u32 4788187, %v373_v53  ;;  %v377_v36 = vcvt.s32.f32 %v370_v18  ;;  %v455_v46 = vadd.s32 %v5358_v55, %v5364_v16  ;;  %vm4462_vm9 = vcmp.lt.s32.totalorder %v4461_v37, 0 }
  0x83   : > { %v621_v26 = vand.u32 31, %v619_v30  ;;  %v470_v52 = vsel %vm4462_vm9, 0, %v4461_v37  ;;  %v558_v24 = vmul.u32 %v5393_v5, %v542_v21  ;;  %vm560_vm10 = vc.u32 %v5452_v44, %v5455_v60 }
  0x84   : > { %v375_v28 = vand.u32 2147483647, %v374_v0  ;;  %vm5469_vm11 = vcmp.le.f32.partialorder %v399_v47, 0.7853982  ;;  %v471_v57 = vsub.s32 32, %v470_v52  ;;  %v472_v58 = vshll.u32 %v5432_v62, %v470_v52 }
  0x85   : > { %v475_v4 = vsub.s32 4294967266, %v470_v52  ;;  %v561_v55 = vadd.s32 1, %v5456_v48  ;;  %v486_v5 = vsel %vm401_vm7, %v485_v19, %v5423_v2  ;;  %v5478_v15 = vshrl.u32 %v619_v30, 5 }
  0x86   : > { %v378_v16 = vmul.f32 %v377_v36, %v375_v28  ;;  %v622_v49 = vsub.s32 32, %v621_v26  ;;  %v473_v50 = vshrl.u32 %v455_v46, %v471_v57  ;;  %v624_v45 = vshll.u32 %v5057_v25, %v621_v26 }
  0x87   : > { %v476_v17 = vadd.s32 127, %v475_v4  ;;  %v562_v47 = vsel %vm560_vm10, %v561_v55, %v5456_v48  ;;  %v627_v21 = vshll.u32 %v5058_v27, %v621_v26  ;;  %v630_v2 = vshll.u32 %v8543_v29, %v621_v26 }
  0x88   : > { %v379_v23 = vxor.u32 2147483648, %v378_v16  ;;  %v563_v6 = vadd.s32 %v562_v47, %v558_v24  ;;  %v625_v62 = vshrl.u32 %v5058_v27, %v622_v49  ;;  %v474_v18 = vor.u32 %v473_v50, %v472_v58 }
  0x89   : > { %v477_v53 = vshll.u32 %v476_v17, 23  ;;  %v628_v20 = vshrl.u32 %v8543_v29, %v622_v49  ;;  %v8556_v36 = vmov 2102212464   ;;  %v634_v58 = vshrl.u32 %v5061_v38, %v622_v49 }
  0x8a   : > { %v380_v37 = vsel %vm297_vm15, %v379_v23, %v378_v16  ;;  %v564_v0 = vadd.s32 536870912, %v563_v6  ;;  %v631_v48 = vshrl.u32 %v8556_v36, %v622_v49  ;;  %v633_v19 = vshll.u32 %v8556_v36, %v621_v26 }
  0x8b   : > { %v383_v30 = vsel %vm5402_vm1, %v5250_v40, %v380_v37  ;;  %v478_v46 = vor.u32 4788187, %v477_v53  ;;  %v481_v28 = vcvt.s32.f32 %v474_v18  ;;  %v626_v52 = vor.u32 %v625_v62, %v624_v45 }
  0x8c   : > { %4813 = vcosq.f32 %v383_v30  ;;  %v5493_v24 = vshrl.u32 %v564_v0, 30  ;;  %v629_v57 = vor.u32 %v628_v20, %v627_v21  ;;  %v636_v55 = vshll.u32 %v5061_v38, %v621_v26 }
  0x8d   : > { %4815 = vsinq.f32 %v383_v30  ;;  %v479_v4 = vand.u32 2147483647, %v478_v46  ;;  %v637_v16 = vshrl.u32 %v5062_v51, %v622_v49  ;;  %v488_v50 = vsel %vm5469_vm11, 0, %v486_v5 }
  0x8e   : > { %v566_v13 = vshll.u32 %v5493_v24, 30  ;;  %v635_v17 = vor.u32 %v634_v58, %v633_v19  ;;  %vm639_vm12 = vcmp.lt.s32.totalorder %v5478_v15, 1  ;;  %v623_v45 = vshrl.u32 %v5057_v25, %v622_v49 }
  0x8f   : > { %v482_v47 = vmul.f32 %v481_v28, %v479_v4  ;;  %v632_v23 = vor.u32 %v631_v48, %v630_v2  ;;  %v5505_v62 = vshll.u32 %v615_v61, 8  ;;  %vm390_vm13 = vcmp.lt.s32.totalorder %v5460_v39, 2 }
  0x90   : > { %v5508_v26 = vsub.s32 %v563_v6, %v566_v13  ;;  %v638_v21 = vor.u32 %v637_v16, %v636_v55  ;;  %vm641_vm14 = vcmp.lt.s32.totalorder %v5478_v15, 3  ;;  %vm642_vm15 = vcmp.lt.s32.totalorder %v5478_v15, 4 }
  0x91   : > { %vm387_vm0 = vweird.f32 %v5250_v40  ;;  %v483_v5 = vxor.u32 2147483648, %v482_v47  ;;  %vm505_vm1 = vcmp.lt.s32.totalorder %v5256_v42, 0  ;;  %vm640_vm2 = vcmp.lt.s32.totalorder %v5478_v15, 2 }
  0x92   : > { %v644_v56 = vsel %vm642_vm15, %v632_v23, 2102212464  ;;  %v647_v61 = vsel %vm639_vm12, %v626_v52, %v629_v57  ;;  %vm391_vm3 = vcmp.eq.s32.totalorder %v5460_v39, 0  ;;  %v492_v49 = vadd.s32 3, %v488_v50 }
  0x93   : > { %v569_v6 = vsub.s32 0, %v5508_v26  ;;  %v648_v18 = vsel %vm642_vm15, %v635_v17, 920167782  ;;  %v484_v53 = vsel %vm401_vm7, %v483_v5, %v482_v47  ;;  %v643_v20 = vsel %vm639_vm12, %v623_v45, %v626_v52 }
  0x94   : > { %v645_v2 = vsel %vm641_vm14, %v629_v57, %v644_v56  ;;  %v649_v37 = vsel %vm641_vm14, %v632_v23, %v648_v18  ;;  %v487_v0 = vsel %vm5469_vm11, %v5253_v41, %v484_v53  ;;  %v8557_v48 = vand.u32 2147483647, %v5256_v42 }
  0x95   : > { %v4464_v30 = vmin.u32 %v569_v6, %v5508_v26  ;;  %v650_v46 = vsel %vm640_vm2, %v647_v61, %v649_v37  ;;  %v651_v28 = vsel %vm639_vm12, %v629_v57, %v632_v23  ;;  %4817 = vcosq.f32 %v487_v0 }
  0x96   : > { %vm5536_vm4 = vcmp.le.f32.partialorder %v8557_v48, 0.7853982  ;;  %v652_v52 = vsel %vm642_vm15, %v638_v21, 1326507024  ;;  %v5548_v54 = vmul.u32.u64.low %v5505_v62, %v650_v46  ;;  %v5549_v58 = vmul.u32.u64.high %v5505_v62, %v650_v46, %v5548_v54  ;;  %v4814_v4 = vpop.eup %4813 }
  0x97   : > { %vm394_vm5 = vcmp.eq.s32.totalorder %v5460_v39, 2  ;;  %4819 = vsinq.f32 %v487_v0  ;;  %v571_v55 = vclz %v4464_v30  ;;  %v589_v16 = vsub.s32 4, %v5493_v24  ;;  %v4816_v50 = vpop.eup %4815 }
  0x98   : > { %v395_v13 = vxor.u32 2147483648, %v4814_v4  ;;  %v493_v47 = vand.u32 3, %v492_v49  ;;  %v559_v57 = vadd.s32 %v5455_v60, %v5452_v44  ;;  %v653_v45 = vsel %vm641_vm14, %v635_v17, %v652_v52 }
  0x99   : > { %v392_v23 = vxor.u32 2147483648, %v4816_v50  ;;  %v4465_v21 = vadd.s32 4294967294, %v571_v55  ;;  %v646_v5 = vsel %vm640_vm2, %v643_v20, %v645_v2  ;;  %v654_v56 = vsel %vm640_vm2, %v651_v28, %v653_v45 }
  0x9a   : > { %v396_v61 = vsel %vm394_vm5, %v395_v13, %v4816_v50  ;;  %v5563_v6 = vmul.u32.u64.low %v5505_v62, %v654_v56  ;;  %v5564_v18 = vmul.u32.u64.high %v5505_v62, %v654_v56, %v5563_v6  ;;  %v711_v49 = vand.u32 2147483647, %v5382_v22 }
  0x9b   : > { %v393_v44 = vsel %vm391_vm3, %v4814_v4, %v392_v23  ;;  %vm491_vm6 = vweird.f32 %v5253_v41  ;;  %vm4466_vm7 = vcmp.lt.s32.totalorder %v4465_v21, 0  ;;  %v590_v60 = vsel %vm505_vm1, %v589_v16, %v5493_v24 }
  0x9c   : > { %v665_v15 = vadd.s32 1, %v5549_v58  ;;  %v397_v17 = vsel %vm390_vm13, %v393_v44, %v396_v61  ;;  %v574_v53 = vsel %vm4466_vm7, 0, %v4465_v21  ;;  %v662_v20 = vmul.u32 %v5505_v62, %v646_v5 }
  0x9d   : > { %v714_v2 = vand.u32 2139095040, %v5382_v22  ;;  %v398_v37 = vsel %vm387_vm0, nan, %v397_v17  ;;  %v575_v0 = vsub.s32 32, %v574_v53  ;;  %v576_v48 = vshll.u32 %v5508_v26, %v574_v53 }
  0x9e   : > { %v579_v30 = vsub.s32 4294967266, %v574_v53  ;;  %v592_v24 = vsel %vm5536_vm4, 0, %v590_v60  ;;  %vm664_vm8 = vc.u32 %v5564_v18, %v5548_v54  ;;  %v718_v46 = vand.u32 8388607, %v711_v49  ;;  %1543 = vst [vmem:[%s5207_s16] sm:$0xff] %v398_v37 }
  0x9f   : > { %v715_v39 = vshrl.u32 %v714_v2, 23  ;;  %vm494_vm9 = vcmp.lt.s32.totalorder %v493_v47, 2  ;;  %v577_v62 = vshrl.u32 %v559_v57, %v575_v0  ;;  %v666_v40 = vsel %vm664_vm8, %v665_v15, %v5549_v58  ;;  %v4818_v52 = vpop.eup %4817 }
  0xa0   : > { %v580_v28 = vadd.s32 127, %v579_v30  ;;  %vm495_vm10 = vcmp.eq.s32.totalorder %v493_v47, 0  ;;  %vm498_vm11 = vcmp.eq.s32.totalorder %v493_v47, 2  ;;  %v667_v26 = vadd.s32 %v666_v40, %v662_v20 }
  0xa1   : > { %v4471_v4 = vadd.s32 4294967169, %v715_v39  ;;  %v4820_v55 = vpop.eup %4819  ;;  %v499_v16 = vxor.u32 2147483648, %v4818_v52  ;;  %v578_v50 = vor.u32 %v577_v62, %v576_v48  ;;  %v596_v45 = vadd.s32 3, %v592_v24 }
  0xa2   : > { %v581_v13 = vshll.u32 %v580_v28, 23  ;;  %v496_v23 = vxor.u32 2147483648, %v4820_v55  ;;  %v668_v21 = vadd.s32 536870912, %v667_v26  ;;  %v719_v5 = vor.u32 8388608, %v718_v46 }
  0xa3   : > { %v721_v56 = vadd.s32 1, %v4471_v4  ;;  %v500_v61 = vsel %vm498_vm11, %v499_v16, %v4820_v55  ;;  %v585_v57 = vcvt.s32.f32 %v578_v50  ;;  %v818_v44 = vand.u32 2139095040, %v5386_v59 }
  0xa4   : > { %v582_v6 = vor.u32 4788187, %v581_v13  ;;  %v497_v58 = vsel %vm495_vm10, %v4818_v52, %v496_v23  ;;  %v669_v60 = vshrl.u32 %v668_v21, 30  ;;  %v815_v15 = vand.u32 2147483647, %v5386_v59 }
  0xa5   : > { %vm722_vm12 = vcmp.gt.s32.totalorder %v721_v56, 0  ;;  %v5594_v17 = vmul.f32 %v5235_v32, %v5232_v31  ;;  %v501_v53 = vsel %vm494_vm9, %v497_v58, %v500_v61  ;;  %v5599_v37 = vadd.f32 %v5378_v63, %v5240_v34 }
  0xa6   : > { %v583_v20 = vand.u32 2147483647, %v582_v6  ;;  %v723_v2 = vsel %vm722_vm12, %v721_v56, 0  ;;  %v502_v0 = vsel %vm491_vm6, nan, %v501_v53  ;;  %v670_v48 = vshll.u32 %v669_v60, 30 }
  0xa7   : > { %v819_v30 = vshrl.u32 %v818_v44, 23  ;;  %v5603_v39 = vand.u32 3, %v596_v45  ;;  %vm609_vm13 = vcmp.lt.s32.totalorder %v5287_v14, 0  ;;  %v725_v32 = vand.u32 31, %v723_v2  ;;  %1544 = vst [vmem:[%s5207_s16 + $0x8] sm:$0xff] %v502_v0 }
  0xa8   : > { %v586_v24 = vmul.f32 %v585_v57, %v583_v20  ;;  %v663_v47 = vadd.s32 %v5548_v54, %v5564_v18  ;;  %v5609_v46 = vsub.s32 %v667_v26, %v670_v48  ;;  %v5611_v62 = vshll.u32 %v719_v5, 8 }
  0xa9   : > { %v5615_v41 = vand.u32 8388607, %v815_v15  ;;  %v693_v28 = vsub.s32 4, %v669_v60  ;;  %v5617_v40 = vshrl.u32 %v723_v2, 5  ;;  %v726_v52 = vsub.s32 32, %v725_v32 }
  0xaa   : > { %v587_v63 = vxor.u32 2147483648, %v586_v24  ;;  %v673_v4 = vsub.s32 0, %v5609_v46  ;;  %v728_v55 = vshll.u32 %v5057_v25, %v725_v32  ;;  %v731_v16 = vshll.u32 %v5058_v27, %v725_v32 }
  0xab   : > { %v4475_v54 = vadd.s32 4294967169, %v819_v30  ;;  %v729_v26 = vshrl.u32 %v5058_v27, %v726_v52  ;;  %v732_v50 = vshrl.u32 %v8543_v29, %v726_v52  ;;  %v734_v13 = vshll.u32 %v8543_v29, %v725_v32 }
  0xac   : > { %v588_v18 = vsel %vm505_vm1, %v587_v63, %v586_v24  ;;  %v4468_v23 = vmin.u32 %v673_v4, %v5609_v46  ;;  %v735_v21 = vshrl.u32 %v8556_v36, %v726_v52  ;;  %v823_v5 = vor.u32 8388608, %v5615_v41 }
  0xad   : > { %v591_v45 = vsel %vm5536_vm4, %v5256_v42, %v588_v18  ;;  %v5635_v56 = vsel %vm609_vm13, %v693_v28, %v669_v60  ;;  %v727_v61 = vshrl.u32 %v5057_v25, %v726_v52  ;;  %v737_v6 = vshll.u32 %v8556_v36, %v725_v32 }
  0xae   : > { %4821 = vcosq.f32 %v591_v45  ;;  %v8560_v57 = vand.u32 2147483647, %v5287_v14  ;;  %v675_v44 = vclz %v4468_v23  ;;  %v730_v58 = vor.u32 %v729_v26, %v728_v55 }
  0xaf   : > { %4823 = vsinq.f32 %v591_v45  ;;  %v733_v53 = vor.u32 %v732_v50, %v731_v16  ;;  %vm602_vm15 = vcmp.eq.s32.totalorder %v5603_v39, 2  ;;  %v736_v20 = vor.u32 %v735_v21, %v734_v13 }
  0xb0   : > { %vm5641_vm14 = vcmp.le.f32.partialorder %v8560_v57, 0.7853982  ;;  %v738_v60 = vshrl.u32 %v5061_v38, %v726_v52  ;;  %v740_v2 = vshll.u32 %v5061_v38, %v725_v32  ;;  %vm743_vm0 = vcmp.lt.s32.totalorder %v5617_v40, 1 }
  0xb1   : > { %vm599_vm1 = vcmp.eq.s32.totalorder %v5603_v39, 0  ;;  %v4469_v0 = vadd.s32 4294967294, %v675_v44  ;;  %v741_v48 = vshrl.u32 %v5062_v51, %v726_v52  ;;  %vm744_vm2 = vcmp.lt.s32.totalorder %v5617_v40, 2 }
  0xb2   : > { %vm746_vm3 = vcmp.lt.s32.totalorder %v5617_v40, 4  ;;  %vm598_vm4 = vcmp.lt.s32.totalorder %v5603_v39, 2  ;;  %v739_v30 = vor.u32 %v738_v60, %v737_v6  ;;  %vm745_vm5 = vcmp.lt.s32.totalorder %v5617_v40, 3 }
  0xb3   : > { %v747_v24 = vsel %vm743_vm0, %v727_v61, %v730_v58  ;;  %v748_v32 = vsel %vm746_vm3, %v736_v20, 2102212464  ;;  %vm595_vm6 = vweird.f32 %v5256_v42  ;;  %vm4470_vm7 = vcmp.lt.s32.totalorder %v4469_v0, 0 }
  0xb4   : > { %v742_v63 = vor.u32 %v741_v48, %v740_v2  ;;  %v749_v28 = vsel %vm745_vm5, %v733_v53, %v748_v32  ;;  %v751_v52 = vsel %vm743_vm0, %v730_v58, %v733_v53  ;;  %v678_v4 = vsel %vm4470_vm7, 0, %v4469_v0 }
  0xb5   : > { %v752_v55 = vsel %vm746_vm3, %v739_v30, 920167782  ;;  %v755_v16 = vsel %vm743_vm0, %v733_v53, %v736_v20  ;;  %v825_v18 = vadd.s32 1, %v4475_v54  ;;  %v679_v26 = vsub.s32 32, %v678_v4 }
  0xb6   : > { %v680_v50 = vshll.u32 %v5609_v46, %v678_v4  ;;  %v683_v13 = vsub.s32 4294967266, %v678_v4  ;;  %v753_v45 = vsel %vm745_vm5, %v736_v20, %v752_v55  ;;  %v750_v23 = vsel %vm744_vm2, %v747_v24, %v749_v28 }
  0xb7   : > { %v754_v21 = vsel %vm744_vm2, %v751_v52, %v753_v45  ;;  %v756_v61 = vsel %vm746_vm3, %v742_v63, 1326507024  ;;  %vm826_vm8 = vcmp.gt.s32.totalorder %v825_v18, 0  ;;  %v681_v6 = vshrl.u32 %v663_v47, %v679_v26 }
  0xb8   : > { %v684_v57 = vadd.s32 127, %v683_v13  ;;  %v757_v54 = vsel %vm745_vm5, %v739_v30, %v756_v61  ;;  %v827_v46 = vsel %vm826_vm8, %v825_v18, 0  ;;  %v4822_v44 = vpop.eup %4821  ;;  %v696_v58 = vsel %vm5641_vm14, 0, %v5635_v56 }
  0xb9   : > { %v758_v53 = vsel %vm744_vm2, %v755_v16, %v757_v54  ;;  %v5685_v20 = vmul.u32.u64.low %v5611_v62, %v754_v21  ;;  %v5686_v60 = vmul.u32.u64.high %v5611_v62, %v754_v21, %v5685_v20  ;;  %v4824_v2 = vpop.eup %4823  ;;  %v603_v47 = vxor.u32 2147483648, %v4822_v44 }
  0xba   : > { %v682_v0 = vor.u32 %v681_v6, %v680_v50  ;;  %v685_v48 = vshll.u32 %v684_v57, 23  ;;  %v829_v24 = vand.u32 31, %v827_v46  ;;  %v600_v30 = vxor.u32 2147483648, %v4824_v2 }
  0xbb   : > { %v5690_v32 = vmul.u32.u64.low %v5611_v62, %v758_v53  ;;  %v5691_v63 = vmul.u32.u64.high %v5611_v62, %v758_v53, %v5690_v32  ;;  %v766_v56 = vmul.u32 %v5611_v62, %v750_v23  ;;  %v604_v40 = vsel %vm602_vm15, %v603_v47, %v4824_v2 }
  0xbc   : > { %v686_v28 = vor.u32 4788187, %v685_v48  ;;  %v689_v52 = vcvt.s32.f32 %v682_v0  ;;  %v830_v4 = vsub.s32 32, %v829_v24  ;;  %v601_v55 = vsel %vm599_vm1, %v4822_v44, %v600_v30 }
  0xbd   : > { %v769_v16 = vadd.s32 1, %v5686_v60  ;;  %v832_v18 = vshll.u32 %v5057_v25, %v829_v24  ;;  %v835_v26 = vshll.u32 %v5058_v27, %v829_v24  ;;  %v605_v50 = vsel %vm598_vm4, %v601_v55, %v604_v40 }
  0xbe   : > { %v687_v62 = vand.u32 2147483647, %v686_v28  ;;  %v700_v13 = vadd.s32 3, %v696_v58  ;;  %v833_v45 = vshrl.u32 %v5058_v27, %v830_v4  ;;  %v606_v23 = vsel %vm595_vm6, nan, %v605_v50 }
  0xbf   : > { %vm768_vm9 = vc.u32 %v5691_v63, %v5685_v20  ;;  %v828_v21 = vshrl.u32 %v827_v46, 5  ;;  %v836_v61 = vshrl.u32 %v8543_v29, %v830_v4  ;;  %v838_v39 = vshll.u32 %v8543_v29, %v829_v24  ;;  %1545 = vst [vmem:[%s5207_s16 + $0x10] sm:$0xff] %v606_v23 }
  0xc0   : > { %v690_v6 = vmul.f32 %v689_v52, %v687_v62  ;;  %v770_v57 = vsel %vm768_vm9, %v769_v16, %v5686_v60  ;;  %v834_v54 = vor.u32 %v833_v45, %v832_v18  ;;  %v839_v53 = vshrl.u32 %v8556_v36, %v830_v4 }
  0xc1   : > { %v771_v44 = vadd.s32 %v770_v57, %v766_v56  ;;  %v837_v58 = vor.u32 %v836_v61, %v835_v26  ;;  %v841_v42 = vshll.u32 %v8556_v36, %v829_v24  ;;  %v842_v47 = vshrl.u32 %v5061_v38, %v830_v4 }
  0xc2   : > { %v691_v2 = vxor.u32 2147483648, %v690_v6  ;;  %v844_v46 = vshll.u32 %v5061_v38, %v829_v24  ;;  %v845_v0 = vshrl.u32 %v5062_v51, %v830_v4  ;;  %v831_v60 = vshrl.u32 %v5057_v25, %v830_v4 }
  0xc3   : > { %v772_v48 = vadd.s32 536870912, %v771_v44  ;;  %v840_v30 = vor.u32 %v839_v53, %v838_v39  ;;  %vm847_vm10 = vcmp.lt.s32.totalorder %v828_v21, 1  ;;  %v843_v56 = vor.u32 %v842_v47, %v841_v42 }
  0xc4   : > { %v692_v32 = vsel %vm609_vm13, %v691_v2, %v690_v6  ;;  %v846_v40 = vor.u32 %v845_v0, %v844_v46  ;;  %vm850_vm11 = vcmp.lt.s32.totalorder %v828_v21, 4  ;;  %vm849_vm12 = vcmp.lt.s32.totalorder %v828_v21, 3 }
  0xc5   : > { %v695_v28 = vsel %vm5641_vm14, %v5287_v14, %v692_v32  ;;  %v773_v52 = vshrl.u32 %v772_v48, 30  ;;  %v852_v24 = vsel %vm850_vm11, %v840_v30, 2102212464  ;;  %vm848_vm15 = vcmp.lt.s32.totalorder %v828_v21, 2 }
  0xc6   : > { %4825 = vcosq.f32 %v695_v28  ;;  %v855_v55 = vsel %vm847_vm10, %v834_v54, %v837_v58  ;;  %v856_v4 = vsel %vm850_vm11, %v843_v56, 920167782  ;;  %v851_v18 = vsel %vm847_vm10, %v831_v60, %v834_v54 }
  0xc7   : > { %4827 = vsinq.f32 %v695_v28  ;;  %v774_v16 = vshll.u32 %v773_v52, 30  ;;  %v853_v26 = vsel %vm849_vm12, %v837_v58, %v852_v24  ;;  %v857_v50 = vsel %vm849_vm12, %v840_v30, %v856_v4 }
  0xc8   : > { %v859_v62 = vsel %vm847_vm10, %v837_v58, %v840_v30  ;;  %v860_v19 = vsel %vm850_vm11, %v846_v40, 1326507024  ;;  %v863_v45 = vshll.u32 %v823_v5, 8  ;;  %v797_v61 = vsub.s32 4, %v773_v52 }
  0xc9   : > { %v5730_v23 = vsub.s32 %v771_v44, %v774_v16  ;;  %v858_v6 = vsel %vm848_vm15, %v855_v55, %v857_v50  ;;  %v861_v57 = vsel %vm849_vm12, %v843_v56, %v860_v19  ;;  %v701_v39 = vand.u32 3, %v700_v13 }
  0xca   : > { %v862_v54 = vsel %vm848_vm15, %v859_v62, %v861_v57  ;;  %v5735_v53 = vmul.u32.u64.low %v863_v45, %v858_v6  ;;  %v5736_v42 = vmul.u32.u64.high %v863_v45, %v858_v6, %v5735_v53  ;;  %v854_v58 = vsel %vm848_vm15, %v851_v18, %v853_v26 }
  0xcb   : > { %v777_v2 = vsub.s32 0, %v5730_v23  ;;  %v5740_v47 = vmul.u32.u64.low %v863_v45, %v862_v54  ;;  %v5741_v41 = vmul.u32.u64.high %v863_v45, %v862_v54, %v5740_v47  ;;  %v8563_v5 = vrot.slane %v5203_v12, %v5189_v3 }
  0xcc   : > { %vm713_vm13 = vcmp.lt.s32.totalorder %v5382_v22, 0  ;;  %v5752_v13 = vmul.f32 %v5374_v43, %v5232_v31  ;;  %v922_v0 = vand.u32 2139095040, %v5599_v37  ;;  %v5760_v48 = vadd.f32 %v5594_v17, %v5240_v34 }
  0xcd   : > { %v5747_v44 = vrot.slane %v8563_v5, %v5189_v3  ;;  %v4472_v46 = vmin.u32 %v777_v2, %v5730_v23  ;;  %v798_v21 = vsel %vm713_vm13, %v797_v61, %v773_v52  ;;  %vm699_vm14 = vweird.f32 %v5287_v14 }
  0xce   : > { %v870_v3 = vmul.u32 %v863_v45, %v854_v58  ;;  %v873_v60 = vadd.s32 1, %v5736_v42  ;;  %vm702_vm0 = vcmp.lt.s32.totalorder %v701_v39, 2  ;;  %vm5766_vm1 = vcmp.le.f32.partialorder %v711_v49, 0.7853982 }
  0xcf   : > { %v779_v30 = vclz %v4472_v46  ;;  %v919_v32 = vand.u32 2147483647, %v5599_v37  ;;  %vm706_vm2 = vcmp.eq.s32.totalorder %v701_v39, 2  ;;  %v800_v17 = vsel %vm5766_vm1, 0, %v798_v21 }
  0xd0   : > { %v4826_v56 = vpop.eup %4825  ;;  %vm872_vm3 = vc.u32 %v5741_v41, %v5735_v53  ;;  %v923_v40 = vshrl.u32 %v922_v0, 23  ;;  %vm703_vm4 = vcmp.eq.s32.totalorder %v701_v39, 0  ;;  %v767_v4 = vadd.s32 %v5685_v20, %v5691_v63 }
  0xd1   : > { %v4828_v28 = vpop.eup %4827  ;;  %v707_v52 = vxor.u32 2147483648, %v4826_v56  ;;  %v4473_v24 = vadd.s32 4294967294, %v779_v30  ;;  %v874_v49 = vsel %vm872_vm3, %v873_v60, %v5736_v42  ;;  %v804_v50 = vadd.s32 3, %v800_v17 }
  0xd2   : > { %v704_v55 = vxor.u32 2147483648, %v4828_v28  ;;  %v875_v16 = vadd.s32 %v874_v49, %v870_v3  ;;  %v4479_v18 = vadd.s32 4294967169, %v923_v40  ;;  %v926_v62 = vand.u32 8388607, %v919_v32 }
  0xd3   : > { %v708_v26 = vsel %vm706_vm2, %v707_v52, %v4828_v28  ;;  %vm4474_vm5 = vcmp.lt.s32.totalorder %v4473_v24, 0  ;;  %v1026_v58 = vand.u32 2139095040, %v5760_v48  ;;  %v5787_v39 = vmul.f32 %v5238_v33, %v5232_v31 }
  0xd4   : > { %v705_v19 = vsel %vm703_vm4, %v4826_v56, %v704_v55  ;;  %v782_v45 = vsel %vm4474_vm5, 0, %v4473_v24  ;;  %v876_v61 = vadd.s32 536870912, %v875_v16  ;;  %v929_v6 = vadd.s32 1, %v4479_v18 }
  0xd5   : > { %v709_v57 = vsel %vm702_vm0, %v705_v19, %v708_v26  ;;  %v783_v54 = vsub.s32 32, %v782_v45  ;;  %v784_v42 = vshll.u32 %v5730_v23, %v782_v45  ;;  %v787_v2 = vsub.s32 4294967266, %v782_v45 }
  0xd6   : > { %v710_v20 = vsel %vm699_vm14, nan, %v709_v57  ;;  %v877_v63 = vshrl.u32 %v876_v61, 30  ;;  %vm930_vm6 = vcmp.gt.s32.totalorder %v929_v6, 0  ;;  %v927_v46 = vor.u32 8388608, %v926_v62 }
  0xd7   : > { %v785_v47 = vshrl.u32 %v767_v4, %v783_v54  ;;  %v788_v5 = vadd.s32 127, %v787_v2  ;;  %v931_v21 = vsel %vm930_vm6, %v929_v6, 0  ;;  %1546 = vst [vmem:[%s5207_s16 + $0x18] sm:$0xff] %v710_v20  ;;  %vm817_vm7 = vcmp.lt.s32.totalorder %v5386_v59, 0 }
  0xd8   : > { %v878_v23 = vshll.u32 %v877_v63, 30  ;;  %v933_v0 = vand.u32 31, %v931_v21  ;;  %v5790_v60 = vand.u32 3, %v804_v50  ;;  %v871_v30 = vadd.s32 %v5735_v53, %v5741_v41 }
  0xd9   : > { %v786_v3 = vor.u32 %v785_v47, %v784_v42  ;;  %v789_v14 = vshll.u32 %v788_v5, 23  ;;  %v1023_v40 = vand.u32 2147483647, %v5760_v48  ;;  %v1027_v28 = vshrl.u32 %v1026_v58, 23 }
  0xda   : > { %v5793_v56 = vsub.s32 %v875_v16, %v878_v23  ;;  %v934_v17 = vsub.s32 32, %v933_v0  ;;  %v901_v33 = vsub.s32 4, %v877_v63  ;;  %v5796_v49 = vshll.u32 %v927_v46, 8 }
  0xdb   : > { %v790_v52 = vor.u32 4788187, %v789_v14  ;;  %v793_v24 = vcvt.s32.f32 %v786_v3  ;;  %v936_v4 = vshll.u32 %v5057_v25, %v933_v0  ;;  %v939_v26 = vshll.u32 %v5058_v27, %v933_v0 }
  0xdc   : > { %v881_v55 = vsub.s32 0, %v5793_v56  ;;  %v937_v18 = vshrl.u32 %v5058_v27, %v934_v17  ;;  %v940_v41 = vshrl.u32 %v8543_v29, %v934_v17  ;;  %v942_v16 = vshll.u32 %v8543_v29, %v933_v0 }
  0xdd   : > { %v791_v53 = vand.u32 2147483647, %v790_v52  ;;  %v943_v50 = vshrl.u32 %v8556_v36, %v934_v17  ;;  %vm5807_vm8 = vcmp.le.f32.partialorder %v815_v15, 0.7853982  ;;  %v932_v45 = vshrl.u32 %v931_v21, 5 }
  0xde   : > { %v4476_v19 = vmin.u32 %v881_v55, %v5793_v56  ;;  %v945_v61 = vshll.u32 %v8556_v36, %v933_v0  ;;  %v4483_v6 = vadd.s32 4294967169, %v1027_v28  ;;  %v902_v54 = vsel %vm817_vm7, %v901_v33, %v877_v63 }
  0xdf   : > { %v794_v57 = vmul.f32 %v793_v24, %v791_v53  ;;  %v935_v42 = vshrl.u32 %v5057_v25, %v934_v17  ;;  %v946_v2 = vshrl.u32 %v5061_v38, %v934_v17  ;;  %v938_v58 = vor.u32 %v937_v18, %v936_v4 }
  0xe0   : > { %v883_v20 = vclz %v4476_v19  ;;  %v941_v15 = vor.u32 %v940_v41, %v939_v26  ;;  %v944_v47 = vor.u32 %v943_v50, %v942_v16  ;;  %v948_v23 = vshll.u32 %v5061_v38, %v933_v0 }
  0xe1   : > { %v795_v5 = vxor.u32 2147483648, %v794_v57  ;;  %v947_v46 = vor.u32 %v946_v2, %v945_v61  ;;  %v949_v21 = vshrl.u32 %v5062_v51, %v934_v17  ;;  %vm951_vm9 = vcmp.lt.s32.totalorder %v932_v45, 1 }
  0xe2   : > { %v4477_v3 = vadd.s32 4294967294, %v883_v20  ;;  %vm952_vm10 = vcmp.lt.s32.totalorder %v932_v45, 2  ;;  %vm953_vm11 = vcmp.lt.s32.totalorder %v932_v45, 3  ;;  %vm954_vm12 = vcmp.lt.s32.totalorder %v932_v45, 4 }
  0xe3   : > { %v796_v63 = vsel %vm713_vm13, %v795_v5, %v794_v57  ;;  %v950_v14 = vor.u32 %v949_v21, %v948_v23  ;;  %v955_v28 = vsel %vm951_vm9, %v935_v42, %v938_v58  ;;  %v956_v0 = vsel %vm954_vm12, %v944_v47, 2102212464 }
  0xe4   : > { %v799_v52 = vsel %vm5766_vm1, %v5382_v22, %v796_v63  ;;  %vm4478_vm15 = vcmp.lt.s32.totalorder %v4477_v3, 0  ;;  %v959_v17 = vsel %vm951_vm9, %v938_v58, %v941_v15  ;;  %v957_v33 = vsel %vm953_vm11, %v941_v15, %v956_v0 }
  0xe5   : > { %4829 = vcosq.f32 %v799_v52  ;;  %v886_v24 = vsel %vm4478_vm15, 0, %v4477_v3  ;;  %v960_v55 = vsel %vm954_vm12, %v947_v46, 920167782  ;;  %v904_v43 = vsel %vm5807_vm8, 0, %v902_v54 }
  0xe6   : > { %4831 = vsinq.f32 %v799_v52  ;;  %v887_v4 = vsub.s32 32, %v886_v24  ;;  %v888_v18 = vshll.u32 %v5793_v56, %v886_v24  ;;  %v891_v26 = vsub.s32 4294967266, %v886_v24 }
  0xe7   : > { %v961_v53 = vsel %vm953_vm11, %v944_v47, %v960_v55  ;;  %v963_v41 = vsel %vm951_vm9, %v941_v15, %v944_v47  ;;  %v964_v16 = vsel %vm954_vm12, %v950_v14, 1326507024  ;;  %v958_v42 = vsel %vm952_vm10, %v955_v28, %v957_v33 }
  0xe8   : > { %v889_v50 = vshrl.u32 %v871_v30, %v887_v4  ;;  %v892_v19 = vadd.s32 127, %v891_v26  ;;  %v962_v61 = vsel %vm952_vm10, %v959_v17, %v961_v53  ;;  %v965_v57 = vsel %vm953_vm11, %v947_v46, %v964_v16 }
  0xe9   : > { %v966_v56 = vsel %vm952_vm10, %v963_v41, %v965_v57  ;;  %v5840_v2 = vmul.u32.u64.low %v5796_v49, %v962_v61  ;;  %v5841_v20 = vmul.u32.u64.high %v5796_v49, %v962_v61, %v5840_v2  ;;  %v5850_v30 = vadd.f32 %v5752_v13, %v5240_v34 }
  0xea   : > { %v890_v54 = vor.u32 %v889_v50, %v888_v18  ;;  %v893_v58 = vshll.u32 %v892_v19, 23  ;;  %v5845_v15 = vmul.u32.u64.low %v5796_v49, %v966_v56  ;;  %v5846_v47 = vmul.u32.u64.high %v5796_v49, %v966_v56, %v5845_v15 }
  0xeb   : > { %v5854_v5 = vadd.f32 %v5787_v39, %v5240_v34  ;;  %v1030_v45 = vand.u32 8388607, %v1023_v40  ;;  %v1033_v46 = vadd.s32 1, %v4483_v6  ;;  %v908_v3 = vadd.s32 3, %v904_v43 }
  0xec   : > { %v894_v23 = vor.u32 4788187, %v893_v58  ;;  %v897_v21 = vcvt.s32.f32 %v890_v54  ;;  %v974_v63 = vmul.u32 %v5796_v49, %v958_v42  ;;  %vm803_vm13 = vweird.f32 %v5382_v22 }
  0xed   : > { %vm806_vm14 = vcmp.lt.s32.totalorder %v5790_v60, 2  ;;  %v977_v13 = vadd.s32 1, %v5841_v20  ;;  %vm1034_vm0 = vcmp.gt.s32.totalorder %v1033_v46, 0  ;;  %vm807_vm1 = vcmp.eq.s32.totalorder %v5790_v60, 0 }
  0xee   : > { %v895_v39 = vand.u32 2147483647, %v894_v23  ;;  %vm976_vm2 = vc.u32 %v5846_v47, %v5840_v2  ;;  %v1035_v14 = vsel %vm1034_vm0, %v1033_v46, 0  ;;  %vm810_vm3 = vcmp.eq.s32.totalorder %v5790_v60, 2 }
  0xef   : > { %v4830_v6 = vpop.eup %4829  ;;  %v978_v28 = vsel %vm976_vm2, %v977_v13, %v5841_v20  ;;  %v1031_v49 = vor.u32 8388608, %v1030_v45  ;;  %v1037_v52 = vand.u32 31, %v1035_v14  ;;  %v5867_v33 = vand.u32 3, %v908_v3 }
  0xf0   : > { %v4832_v0 = vpop.eup %4831  ;;  %v811_v17 = vxor.u32 2147483648, %v4830_v6  ;;  %v898_v24 = vmul.f32 %v897_v21, %v895_v39  ;;  %v979_v55 = vadd.s32 %v978_v28, %v974_v63  ;;  %v5869_v18 = vshrl.u32 %v1035_v14, 5 }
  0xf1   : > { %v808_v4 = vxor.u32 2147483648, %v4832_v0  ;;  %v1038_v26 = vsub.s32 32, %v1037_v52  ;;  %v1040_v43 = vshll.u32 %v5057_v25, %v1037_v52  ;;  %v1043_v50 = vshll.u32 %v5058_v27, %v1037_v52 }
  0xf2   : > { %v812_v53 = vsel %vm810_vm3, %v811_v17, %v4832_v0  ;;  %v899_v41 = vxor.u32 2147483648, %v898_v24  ;;  %v980_v16 = vadd.s32 536870912, %v979_v55  ;;  %v1046_v42 = vshll.u32 %v8543_v29, %v1037_v52 }
  0xf3   : > { %v809_v19 = vsel %vm807_vm1, %v4830_v6, %v808_v4  ;;  %v1041_v61 = vshrl.u32 %v5058_v27, %v1038_v26  ;;  %v1044_v57 = vshrl.u32 %v8543_v29, %v1038_v26  ;;  %v1047_v58 = vshrl.u32 %v8556_v36, %v1038_v26 }
  0xf4   : > { %v813_v56 = vsel %vm806_vm14, %v809_v19, %v812_v53  ;;  %v900_v20 = vsel %vm817_vm7, %v899_v41, %v898_v24  ;;  %v981_v54 = vshrl.u32 %v980_v16, 30  ;;  %v1039_v46 = vshrl.u32 %v5057_v25, %v1038_v26 }
  0xf5   : > { %v814_v15 = vsel %vm803_vm13, nan, %v813_v56  ;;  %v903_v45 = vsel %vm5807_vm8, %v5386_v59, %v900_v20  ;;  %v1130_v23 = vand.u32 2139095040, %v5850_v30  ;;  %v1042_v21 = vor.u32 %v1041_v61, %v1040_v43 }
  0xf6   : > { %4833 = vcosq.f32 %v903_v45  ;;  %v982_v60 = vshll.u32 %v981_v54, 30  ;;  %v1045_v3 = vor.u32 %v1044_v57, %v1043_v50  ;;  %1547 = vst [vmem:[%s5207_s16 + $0x20] sm:$0xff] %v814_v15  ;;  %v1049_v63 = vshll.u32 %v8556_v36, %v1037_v52 }
  0xf7   : > { %4835 = vsinq.f32 %v903_v45  ;;  %v1050_v13 = vshrl.u32 %v5061_v38, %v1038_v26  ;;  %v1052_v22 = vshll.u32 %v5061_v38, %v1037_v52  ;;  %v1048_v62 = vor.u32 %v1047_v58, %v1046_v42 }
  0xf8   : > { %v5894_v39 = vsub.s32 %v979_v55, %v982_v60  ;;  %v1053_v14 = vshrl.u32 %v5062_v51, %v1038_v26  ;;  %vm1055_vm4 = vcmp.lt.s32.totalorder %v5869_v18, 1  ;;  %vm921_vm5 = vcmp.lt.s32.totalorder %v5599_v37, 0 }
  0xf9   : > { %v1051_v6 = vor.u32 %v1050_v13, %v1049_v63  ;;  %vm1057_vm6 = vcmp.lt.s32.totalorder %v5869_v18, 3  ;;  %v1071_v28 = vshll.u32 %v1031_v49, 8  ;;  %vm910_vm7 = vcmp.lt.s32.totalorder %v5867_v33, 2 }
  0xfa   : > { %v985_v0 = vsub.s32 0, %v5894_v39  ;;  %v1054_v17 = vor.u32 %v1053_v14, %v1052_v22  ;;  %vm1056_vm8 = vcmp.lt.s32.totalorder %v5869_v18, 2  ;;  %vm1058_vm9 = vcmp.lt.s32.totalorder %v5869_v18, 4 }
  0xfb   : > { %vm907_vm10 = vweird.f32 %v5386_v59  ;;  %v1060_v52 = vsel %vm1058_vm9, %v1048_v62, 2102212464  ;;  %v1063_v24 = vsel %vm1055_vm4, %v1042_v21, %v1045_v3  ;;  %v1064_v55 = vsel %vm1058_vm9, %v1051_v6, 920167782 }
  0xfc   : > { %v1127_v4 = vand.u32 2147483647, %v5850_v30  ;;  %vm5910_vm11 = vcmp.le.f32.partialorder %v919_v32, 0.7853982  ;;  %v4480_v26 = vmin.u32 %v985_v0, %v5894_v39  ;;  %v1059_v43 = vsel %vm1055_vm4, %v1039_v46, %v1042_v21 }
  0xfd   : > { %v1065_v53 = vsel %vm1057_vm6, %v1048_v62, %v1064_v55  ;;  %v1131_v41 = vshrl.u32 %v1130_v23, 23  ;;  %v1061_v16 = vsel %vm1057_vm6, %v1045_v3, %v1060_v52  ;;  %v1067_v32 = vsel %vm1055_vm4, %v1045_v3, %v1048_v62 }
  0xfe   : > { %v1066_v50 = vsel %vm1056_vm8, %v1063_v24, %v1065_v53  ;;  %v1068_v19 = vsel %vm1058_vm9, %v1054_v17, 1326507024  ;;  %vm911_vm12 = vcmp.eq.s32.totalorder %v5867_v33, 0  ;;  %vm914_vm15 = vcmp.eq.s32.totalorder %v5867_v33, 2 }
  0xff   : > { %v987_v61 = vclz %v4480_v26  ;;  %v1005_v57 = vsub.s32 4, %v981_v54  ;;  %v1069_v42 = vsel %vm1057_vm6, %v1051_v6, %v1068_v19  ;;  %v5935_v58 = vand.u32 8388607, %v1127_v4 }
 0x100   : > { %v5929_v56 = vmul.u32.u64.low %v1071_v28, %v1066_v50  ;;  %v5930_v20 = vmul.u32.u64.high %v1071_v28, %v1066_v50, %v5929_v56  ;;  %v4834_v15 = vpop.eup %4833  ;;  %v1062_v46 = vsel %vm1056_vm8, %v1059_v43, %v1061_v16  ;;  %v1070_v23 = vsel %vm1056_vm8, %v1067_v32, %v1069_v42 }
 0x101   : > { %v4481_v45 = vadd.s32 4294967294, %v987_v61  ;;  %v4487_v60 = vadd.s32 4294967169, %v1131_v41  ;;  %v4836_v21 = vpop.eup %4835  ;;  %v915_v3 = vxor.u32 2147483648, %v4834_v15  ;;  %v975_v63 = vadd.s32 %v5840_v2, %v5846_v47 }
 0x102   : > { %v5943_v13 = vmul.u32.u64.low %v1071_v28, %v1070_v23  ;;  %v5944_v22 = vmul.u32.u64.high %v1071_v28, %v1070_v23, %v5943_v13  ;;  %v912_v62 = vxor.u32 2147483648, %v4836_v21  ;;  %v1006_v14 = vsel %vm921_vm5, %v1005_v57, %v981_v54 }
 0x103   : > { %vm4482_vm13 = vcmp.lt.s32.totalorder %v4481_v45, 0  ;;  %v1137_v6 = vadd.s32 1, %v4487_v60  ;;  %v916_v0 = vsel %vm914_vm15, %v915_v3, %v4836_v21  ;;  %v1078_v17 = vmul.u32 %v1071_v28, %v1062_v46 }
 0x104   : > { %v990_v18 = vsel %vm4482_vm13, 0, %v4481_v45  ;;  %v1081_v52 = vadd.s32 1, %v5930_v20  ;;  %v913_v2 = vsel %vm911_vm12, %v4834_v15, %v912_v62  ;;  %v1008_v54 = vsel %vm5910_vm11, 0, %v1006_v14 }
 0x105   : > { %v991_v47 = vsub.s32 32, %v990_v18  ;;  %v992_v24 = vshll.u32 %v5894_v39, %v990_v18  ;;  %v995_v55 = vsub.s32 4294967266, %v990_v18  ;;  %v917_v26 = vsel %vm910_vm7, %v913_v2, %v916_v0 }
 0x106   : > { %vm1080_vm14 = vc.u32 %v5944_v22, %v5929_v56  ;;  %vm1138_vm0 = vcmp.gt.s32.totalorder %v1137_v6, 0  ;;  %v918_v28 = vsel %vm907_vm10, nan, %v917_v26  ;;  %v281_v19 = vmul.f32 %v5747_v44, %v5232_v31 }
 0x107   : > { %v993_v43 = vshrl.u32 %v975_v63, %v991_v47  ;;  %v996_v53 = vadd.s32 127, %v995_v55  ;;  %v1082_v41 = vsel %vm1080_vm14, %v1081_v52, %v5930_v20  ;;  %v1139_v39 = vsel %vm1138_vm0, %v1137_v6, 0  ;;  %1548 = vst [vmem:[%s5207_s16 + $0x28] sm:$0xff] %v918_v28 }
 0x108   : > { %v1083_v16 = vadd.s32 %v1082_v41, %v1078_v17  ;;  %v1141_v32 = vand.u32 31, %v1139_v39  ;;  %v1012_v61 = vadd.s32 3, %v1008_v54  ;;  %v1135_v42 = vor.u32 8388608, %v5935_v58 }
 0x109   : > { %v994_v50 = vor.u32 %v993_v43, %v992_v24  ;;  %v997_v33 = vshll.u32 %v996_v53, 23  ;;  %v1234_v46 = vand.u32 2139095040, %v5854_v5  ;;  %v1140_v20 = vshrl.u32 %v1139_v39, 5 }
 0x10a   : > { %v1084_v57 = vadd.s32 536870912, %v1083_v16  ;;  %v1142_v45 = vsub.s32 32, %v1141_v32  ;;  %v1144_v60 = vshll.u32 %v5057_v25, %v1141_v32  ;;  %v1147_v21 = vshll.u32 %v5058_v27, %v1141_v32 }
 0x10b   : > { %v998_v15 = vor.u32 4788187, %v997_v33  ;;  %v1001_v59 = vcvt.s32.f32 %v994_v50  ;;  %v1153_v13 = vshll.u32 %v8556_v36, %v1141_v32  ;;  %v1150_v58 = vshll.u32 %v8543_v29, %v1141_v32 }
 0x10c   : > { %v1085_v23 = vshrl.u32 %v1084_v57, 30  ;;  %v1145_v63 = vshrl.u32 %v5058_v27, %v1142_v45  ;;  %v1148_v44 = vshrl.u32 %v8543_v29, %v1142_v45  ;;  %v1151_v14 = vshrl.u32 %v8556_v36, %v1142_v45 }
 0x10d   : > { %v999_v3 = vand.u32 2147483647, %v998_v15  ;;  %v1154_v6 = vshrl.u32 %v5061_v38, %v1142_v45  ;;  %v5978_v0 = vmul.f32 %v5243_v35, %v5232_v31  ;;  %v5981_v18 = vadd.f32 %v281_v19, %v5240_v34 }
 0x10e   : > { %v1086_v62 = vshll.u32 %v1085_v23, 30  ;;  %v5983_v52 = vand.u32 3, %v1012_v61  ;;  %v1146_v47 = vor.u32 %v1145_v63, %v1144_v60  ;;  %v1156_v24 = vshll.u32 %v5061_v38, %v1141_v32 }
 0x10f   : > { %v1002_v17 = vmul.f32 %v1001_v59, %v999_v3  ;;  %v5988_v55 = vshll.u32 %v1135_v42, 8  ;;  %vm1025_vm1 = vcmp.lt.s32.totalorder %v5760_v48, 0  ;;  %v1149_v54 = vor.u32 %v1148_v44, %v1147_v21 }
 0x110   : > { %v5985_v2 = vsub.s32 %v1083_v16, %v1086_v62  ;;  %v1155_v28 = vor.u32 %v1154_v6, %v1153_v13  ;;  %v1157_v35 = vshrl.u32 %v5062_v51, %v1142_v45  ;;  %v1152_v53 = vor.u32 %v1151_v14, %v1150_v58 }
 0x111   : > { %v1003_v26 = vxor.u32 2147483648, %v1002_v17  ;;  %vm1159_vm2 = vcmp.lt.s32.totalorder %v1140_v20, 1  ;;  %v1235_v41 = vshrl.u32 %v1234_v46, 23  ;;  %v1143_v39 = vshrl.u32 %v5057_v25, %v1142_v45 }
 0x112   : > { %v1089_v43 = vsub.s32 0, %v5985_v2  ;;  %vm1161_vm3 = vcmp.lt.s32.totalorder %v1140_v20, 3  ;;  %vm1162_vm4 = vcmp.lt.s32.totalorder %v1140_v20, 4  ;;  %v1158_v32 = vor.u32 %v1157_v35, %v1156_v24 }
 0x113   : > { %v1004_v16 = vsel %vm921_vm5, %v1003_v26, %v1002_v17  ;;  %v1164_v19 = vsel %vm1162_vm4, %v1152_v53, 2102212464  ;;  %vm6003_vm6 = vcmp.le.f32.partialorder %v1023_v40, 0.7853982  ;;  %vm1160_vm5 = vcmp.lt.s32.totalorder %v1140_v20, 2 }
 0x114   : > { %v1007_v50 = vsel %vm5910_vm11, %v5599_v37, %v1004_v16  ;;  %v4484_v33 = vmin.u32 %v1089_v43, %v5985_v2  ;;  %v1167_v57 = vsel %vm1159_vm2, %v1146_v47, %v1149_v54  ;;  %v1168_v42 = vsel %vm1162_vm4, %v1155_v28, 920167782 }
 0x115   : > { %4837 = vcosq.f32 %v1007_v50  ;;  %v1109_v15 = vsub.s32 4, %v1085_v23  ;;  %v1231_v59 = vand.u32 2147483647, %v5854_v5  ;;  %v1163_v45 = vsel %vm1159_vm2, %v1143_v39, %v1146_v47 }
 0x116   : > { %4839 = vsinq.f32 %v1007_v50  ;;  %v1091_v49 = vclz %v4484_v33  ;;  %v1165_v46 = vsel %vm1161_vm3, %v1149_v54, %v1164_v19  ;;  %v1169_v60 = vsel %vm1161_vm3, %v1152_v53, %v1168_v42 }
 0x117   : > { %v1171_v40 = vsel %vm1159_vm2, %v1149_v54, %v1152_v53  ;;  %v1079_v21 = vadd.s32 %v5929_v56, %v5944_v22  ;;  %v1170_v63 = vsel %vm1160_vm5, %v1167_v57, %v1169_v60  ;;  %v1172_v44 = vsel %vm1162_vm4, %v1158_v32, 1326507024 }
 0x118   : > { %v4485_v3 = vadd.s32 4294967294, %v1091_v49  ;;  %v1173_v13 = vsel %vm1161_vm3, %v1155_v28, %v1172_v44  ;;  %v6020_v62 = vmul.u32.u64.low %v5988_v55, %v1170_v63  ;;  %v6021_v58 = vmul.u32.u64.high %v5988_v55, %v1170_v63, %v6020_v62 }
 0x119   : > { %v4491_v14 = vadd.s32 4294967169, %v1235_v41  ;;  %vm1011_vm7 = vweird.f32 %v5599_v37  ;;  %v1110_v6 = vsel %vm1025_vm1, %v1109_v15, %v1085_v23  ;;  %v1166_v56 = vsel %vm1160_vm5, %v1163_v45, %v1165_v46 }
 0x11a   : > { %vm4486_vm8 = vcmp.lt.s32.totalorder %v4485_v3, 0  ;;  %v1174_v22 = vsel %vm1160_vm5, %v1171_v40, %v1173_v13  ;;  %vm1014_vm9 = vcmp.lt.s32.totalorder %v5983_v52, 2  ;;  %v1182_v43 = vmul.u32 %v5988_v55, %v1166_v56 }
 0x11b   : > { %v1094_v17 = vsel %vm4486_vm8, 0, %v4485_v3  ;;  %v6030_v47 = vmul.u32.u64.low %v5988_v55, %v1174_v22  ;;  %v6031_v24 = vmul.u32.u64.high %v5988_v55, %v1174_v22, %v6030_v47  ;;  %v1241_v26 = vadd.s32 1, %v4491_v14 }
 0x11c   : > { %v1095_v54 = vsub.s32 32, %v1094_v17  ;;  %v1096_v28 = vshll.u32 %v5985_v2, %v1094_v17  ;;  %v1099_v35 = vsub.s32 4294967266, %v1094_v17  ;;  %v1185_v23 = vadd.s32 1, %v6021_v58 }
 0x11d   : > { %v1238_v20 = vand.u32 8388607, %v1231_v59  ;;  %vm1242_vm10 = vcmp.gt.s32.totalorder %v1241_v26, 0  ;;  %v1112_v16 = vsel %vm6003_vm6, 0, %v1110_v6  ;;  %vm1015_vm11 = vcmp.eq.s32.totalorder %v5983_v52, 0 }
 0x11e   : > { %v1097_v53 = vshrl.u32 %v1079_v21, %v1095_v54  ;;  %v1100_v41 = vadd.s32 127, %v1099_v35  ;;  %v1243_v39 = vsel %vm1242_vm10, %v1241_v26, 0  ;;  %vm1018_vm12 = vcmp.eq.s32.totalorder %v5983_v52, 2 }
 0x11f   : > { %v4838_v50 = vpop.eup %4837  ;;  %vm1184_vm15 = vc.u32 %v6031_v24, %v6020_v62  ;;  %v1245_v2 = vand.u32 31, %v1243_v39  ;;  %v1116_v49 = vadd.s32 3, %v1112_v16  ;;  %v1239_v21 = vor.u32 8388608, %v1238_v20 }
 0x120   : > { %v4840_v55 = vpop.eup %4839  ;;  %v1019_v33 = vxor.u32 2147483648, %v4838_v50  ;;  %v1098_v32 = vor.u32 %v1097_v53, %v1096_v28  ;;  %v1101_v19 = vshll.u32 %v1100_v41, 23  ;;  %v1186_v57 = vsel %vm1184_vm15, %v1185_v23, %v6021_v58 }
 0x121   : > { %v1016_v42 = vxor.u32 2147483648, %v4840_v55  ;;  %v1187_v15 = vadd.s32 %v1186_v57, %v1182_v43  ;;  %v1246_v45 = vsub.s32 32, %v1245_v2  ;;  %v1248_v44 = vshll.u32 %v5057_v25, %v1245_v2 }
 0x122   : > { %v1020_v46 = vsel %vm1018_vm12, %v1019_v33, %v4840_v55  ;;  %v1102_v60 = vor.u32 4788187, %v1101_v19  ;;  %v1105_v40 = vcvt.s32.f32 %v1098_v32  ;;  %v1251_v13 = vshll.u32 %v5058_v27, %v1245_v2 }
 0x123   : > { %v1017_v3 = vsel %vm1015_vm11, %v4838_v50, %v1016_v42  ;;  %v1188_v63 = vadd.s32 536870912, %v1187_v15  ;;  %v1249_v6 = vshrl.u32 %v5058_v27, %v1246_v45  ;;  %v1252_v56 = vshrl.u32 %v8543_v29, %v1246_v45 }
 0x124   : > { %v1021_v58 = vsel %vm1014_vm9, %v1017_v3, %v1020_v46  ;;  %v1103_v14 = vand.u32 2147483647, %v1102_v60  ;;  %v1254_v47 = vshll.u32 %v8543_v29, %v1245_v2  ;;  %v1255_v26 = vshrl.u32 %v8556_v36, %v1246_v45 }
 0x125   : > { %v1022_v22 = vsel %vm1011_vm7, nan, %v1021_v58  ;;  %v6056_v17 = vshrl.u32 %v1188_v63, 30  ;;  %v1244_v28 = vshrl.u32 %v1243_v39, 5  ;;  %v1257_v35 = vshll.u32 %v8556_v36, %v1245_v2 }
 0x126   : > { %v1106_v54 = vmul.f32 %v1105_v40, %v1103_v14  ;;  %v1258_v52 = vshrl.u32 %v5061_v38, %v1246_v45  ;;  %1549 = vst [vmem:[%s5207_s16 + $0x30] sm:$0xff] %v1022_v22  ;;  %v1260_v23 = vshll.u32 %v5061_v38, %v1245_v2  ;;  %v6065_v20 = vshll.u32 %v1239_v21, 8 }
 0x127   : > { %v1190_v43 = vshll.u32 %v6056_v17, 30  ;;  %v1338_v37 = vand.u32 2139095040, %v5981_v18  ;;  %v1247_v41 = vshrl.u32 %v5057_v25, %v1246_v45  ;;  %v1261_v50 = vshrl.u32 %v5062_v51, %v1246_v45 }
 0x128   : > { %v1107_v53 = vxor.u32 2147483648, %v1106_v54  ;;  %v1259_v16 = vor.u32 %v1258_v52, %v1257_v35  ;;  %v1250_v55 = vor.u32 %v1249_v6, %v1248_v44  ;;  %v1253_v33 = vor.u32 %v1252_v56, %v1251_v13 }
 0x129   : > { %v6070_v39 = vsub.s32 %v1187_v15, %v1190_v43  ;;  %v1256_v32 = vor.u32 %v1255_v26, %v1254_v47  ;;  %v1262_v57 = vor.u32 %v1261_v50, %v1260_v23  ;;  %vm1263_vm13 = vcmp.lt.s32.totalorder %v1244_v28, 1 }
 0x12a   : > { %v1108_v19 = vsel %vm1025_vm1, %v1107_v53, %v1106_v54  ;;  %vm1266_vm14 = vcmp.lt.s32.totalorder %v1244_v28, 4  ;;  %vm1264_vm0 = vcmp.lt.s32.totalorder %v1244_v28, 2  ;;  %vm1265_vm2 = vcmp.lt.s32.totalorder %v1244_v28, 3 }
 0x12b   : > { %v1111_v2 = vsel %vm6003_vm6, %v5760_v48, %v1108_v19  ;;  %v1193_v42 = vsub.s32 0, %v6070_v39  ;;  %v1267_v15 = vsel %vm1263_vm13, %v1247_v41, %v1250_v55  ;;  %v1268_v45 = vsel %vm1266_vm14, %v1256_v32, 2102212464 }
 0x12c   : > { %4841 = vcosq.f32 %v1111_v2  ;;  %v1272_v46 = vsel %vm1266_vm14, %v1259_v16, 920167782  ;;  %v1269_v40 = vsel %vm1265_vm2, %v1253_v33, %v1268_v45  ;;  %v1271_v21 = vsel %vm1263_vm13, %v1250_v55, %v1253_v33 }
 0x12d   : > { %4843 = vsinq.f32 %v1111_v2  ;;  %v4488_v60 = vmin.u32 %v1193_v42, %v6070_v39  ;;  %v1273_v3 = vsel %vm1265_vm2, %v1256_v32, %v1272_v46  ;;  %v1275_v63 = vsel %vm1263_vm13, %v1253_v33, %v1256_v32 }
 0x12e   : > { %v1276_v44 = vsel %vm1266_vm14, %v1262_v57, 1326507024  ;;  %v6083_v61 = vadd.f32 %v5978_v0, %v5240_v34  ;;  %v1117_v13 = vand.u32 3, %v1116_v49  ;;  %v1335_v14 = vand.u32 2147483647, %v5981_v18 }
 0x12f   : > { %v1195_v58 = vclz %v4488_v60  ;;  %v1270_v6 = vsel %vm1264_vm0, %v1267_v15, %v1269_v40  ;;  %v1274_v56 = vsel %vm1264_vm0, %v1271_v21, %v1273_v3  ;;  %v1277_v22 = vsel %vm1265_vm2, %v1259_v16, %v1276_v44 }
 0x130   : > { %v1339_v47 = vshrl.u32 %v1338_v37, 23  ;;  %vm1115_vm1 = vweird.f32 %v5760_v48  ;;  %v1278_v54 = vsel %vm1264_vm0, %v1275_v63, %v1277_v22  ;;  %v1213_v49 = vsub.s32 4, %v6056_v17 }
 0x131   : > { %v4489_v26 = vadd.s32 4294967294, %v1195_v58  ;;  %v6092_v35 = vmul.u32.u64.low %v6065_v20, %v1274_v56  ;;  %v6093_v0 = vmul.u32.u64.high %v6065_v20, %v1274_v56, %v6092_v35  ;;  %vm1119_vm3 = vcmp.eq.s32.totalorder %v1117_v13, 0 }
 0x132   : > { %v6098_v52 = vmul.u32.u64.low %v6065_v20, %v1278_v54  ;;  %v6099_v43 = vmul.u32.u64.high %v6065_v20, %v1278_v54, %v6098_v52  ;;  %v4495_v23 = vadd.s32 4294967169, %v1339_v47  ;;  %vm1129_vm4 = vcmp.lt.s32.totalorder %v5850_v30, 0 }
 0x133   : > { %v1183_v37 = vadd.s32 %v6020_v62, %v6031_v24  ;;  %vm4490_vm6 = vcmp.lt.s32.totalorder %v4489_v26, 0  ;;  %vm1122_vm5 = vcmp.eq.s32.totalorder %v1117_v13, 2  ;;  %v1286_v53 = vmul.u32 %v6065_v20, %v1270_v6 }
 0x134   : > { %v1198_v28 = vsel %vm4490_vm6, 0, %v4489_v26  ;;  %v1345_v41 = vadd.s32 1, %v4495_v23  ;;  %v1289_v33 = vadd.s32 1, %v6093_v0  ;;  %v1214_v19 = vsel %vm1129_vm4, %v1213_v49, %v6056_v17 }
 0x135   : > { %v1199_v16 = vsub.s32 32, %v1198_v28  ;;  %v1200_v50 = vshll.u32 %v6070_v39, %v1198_v28  ;;  %v1203_v55 = vsub.s32 4294967266, %v1198_v28  ;;  %vm1288_vm7 = vc.u32 %v6099_v43, %v6092_v35 }
 0x136   : > { %v4842_v32 = vpop.eup %4841  ;;  %v1342_v62 = vand.u32 8388607, %v1335_v14  ;;  %vm1346_vm8 = vcmp.gt.s32.totalorder %v1345_v41, 0  ;;  %v1290_v39 = vsel %vm1288_vm7, %v1289_v33, %v6093_v0  ;;  %vm1118_vm9 = vcmp.lt.s32.totalorder %v1117_v13, 2 }
 0x137   : > { %v4844_v24 = vpop.eup %4843  ;;  %v1123_v20 = vxor.u32 2147483648, %v4842_v32  ;;  %v1201_v57 = vshrl.u32 %v1183_v37, %v1199_v16  ;;  %v1204_v2 = vadd.s32 127, %v1203_v55  ;;  %v1291_v15 = vadd.s32 %v1290_v39, %v1286_v53 }
 0x138   : > { %v1120_v42 = vxor.u32 2147483648, %v4844_v24  ;;  %v1347_v45 = vsel %vm1346_vm8, %v1345_v41, 0  ;;  %vm6118_vm10 = vcmp.le.f32.partialorder %v1127_v4, 0.7853982  ;;  %v1343_v22 = vor.u32 8388608, %v1342_v62 }
 0x139   : > { %v1124_v46 = vsel %vm1122_vm5, %v1123_v20, %v4844_v24  ;;  %v1202_v60 = vor.u32 %v1201_v57, %v1200_v50  ;;  %v1205_v40 = vshll.u32 %v1204_v2, 23  ;;  %v1216_v3 = vsel %vm6118_vm10, 0, %v1214_v19 }
 0x13a   : > { %v1121_v21 = vsel %vm1119_vm3, %v4842_v32, %v1120_v42  ;;  %v1292_v63 = vadd.s32 536870912, %v1291_v15  ;;  %v1349_v44 = vand.u32 31, %v1347_v45  ;;  %v1442_v54 = vand.u32 2139095040, %v6083_v61 }
 0x13b   : > { %v1125_v58 = vsel %vm1118_vm9, %v1121_v21, %v1124_v46  ;;  %v1206_v6 = vor.u32 4788187, %v1205_v40  ;;  %v1209_v56 = vcvt.s32.f32 %v1202_v60  ;;  %v1348_v0 = vshrl.u32 %v1347_v45, 5 }
 0x13c   : > { %v1126_v4 = vsel %vm1115_vm1, nan, %v1125_v58  ;;  %v6127_v47 = vshrl.u32 %v1292_v63, 30  ;;  %v1350_v26 = vsub.s32 32, %v1349_v44  ;;  %v1352_v49 = vshll.u32 %v5057_v25, %v1349_v44 }
 0x13d   : > { %v1207_v13 = vand.u32 2147483647, %v1206_v6  ;;  %v1355_v52 = vshll.u32 %v5058_v27, %v1349_v44  ;;  %1550 = vst [vmem:[%s5207_s16 + $0x38] sm:$0xff] %v1126_v4  ;;  %v1358_v28 = vshll.u32 %v8543_v29, %v1349_v44  ;;  %v1361_v48 = vshll.u32 %v8556_v36, %v1349_v44 }
 0x13e   : > { %v1294_v23 = vshll.u32 %v6127_v47, 30  ;;  %v1353_v37 = vshrl.u32 %v5058_v27, %v1350_v26  ;;  %v1356_v41 = vshrl.u32 %v8543_v29, %v1350_v26  ;;  %v1359_v16 = vshrl.u32 %v8556_v36, %v1350_v26 }
 0x13f   : > { %v1210_v53 = vmul.f32 %v1209_v56, %v1207_v13  ;;  %v1362_v50 = vshrl.u32 %v5061_v38, %v1350_v26  ;;  %v1220_v55 = vadd.s32 3, %v1216_v3  ;;  %v1364_v32 = vshll.u32 %v5061_v38, %v1349_v44 }
 0x140   : > { %v6140_v33 = vsub.s32 %v1291_v15, %v1294_v23  ;;  %v1351_v62 = vshrl.u32 %v5057_v25, %v1350_v26  ;;  %v6144_v24 = vshll.u32 %v1343_v22, 8  ;;  %v1443_v20 = vshrl.u32 %v1442_v54, 23 }
 0x141   : > { %v1211_v19 = vxor.u32 2147483648, %v1210_v53  ;;  %v1354_v2 = vor.u32 %v1353_v37, %v1352_v49  ;;  %v1357_v39 = vor.u32 %v1356_v41, %v1355_v52  ;;  %v1365_v42 = vshrl.u32 %v5062_v51, %v1350_v26 }
 0x142   : > { %v1297_v57 = vsub.s32 0, %v6140_v33  ;;  %v1360_v46 = vor.u32 %v1359_v16, %v1358_v28  ;;  %v1363_v15 = vor.u32 %v1362_v50, %v1361_v48  ;;  %vm1367_vm11 = vcmp.lt.s32.totalorder %v1348_v0, 1 }
 0x143   : > { %v1212_v45 = vsel %vm1129_vm4, %v1211_v19, %v1210_v53  ;;  %v1366_v21 = vor.u32 %v1365_v42, %v1364_v32  ;;  %vm1370_vm12 = vcmp.lt.s32.totalorder %v1348_v0, 4  ;;  %vm1368_vm15 = vcmp.lt.s32.totalorder %v1348_v0, 2 }
 0x144   : > { %v1215_v60 = vsel %vm6118_vm10, %v5850_v30, %v1212_v45  ;;  %v4492_v40 = vmin.u32 %v1297_v57, %v6140_v33  ;;  %vm1369_vm13 = vcmp.lt.s32.totalorder %v1348_v0, 3  ;;  %v1372_v3 = vsel %vm1370_vm12, %v1360_v46, 2102212464 }
 0x145   : > { %4845 = vcosq.f32 %v1215_v60  ;;  %v1371_v44 = vsel %vm1367_vm11, %v1351_v62, %v1354_v2  ;;  %v1375_v58 = vsel %vm1367_vm11, %v1354_v2, %v1357_v39  ;;  %v1221_v6 = vand.u32 3, %v1220_v55 }
 0x146   : > { %4847 = vsinq.f32 %v1215_v60  ;;  %v1299_v63 = vclz %v4492_v40  ;;  %v1373_v56 = vsel %vm1369_vm13, %v1357_v39, %v1372_v3  ;;  %v1376_v17 = vsel %vm1370_vm12, %v1363_v15, 920167782 }
 0x147   : > { %v1379_v22 = vsel %vm1367_vm11, %v1357_v39, %v1360_v46  ;;  %v1287_v4 = vadd.s32 %v6092_v35, %v6099_v43  ;;  %v1377_v54 = vsel %vm1369_vm13, %v1360_v46, %v1376_v17  ;;  %v1380_v13 = vsel %vm1370_vm12, %v1366_v21, 1326507024 }
 0x148   : > { %v4493_v26 = vadd.s32 4294967294, %v1299_v63  ;;  %v1374_v49 = vsel %vm1368_vm15, %v1371_v44, %v1373_v56  ;;  %v1378_v52 = vsel %vm1368_vm15, %v1375_v58, %v1377_v54  ;;  %v1381_v23 = vsel %vm1369_vm13, %v1363_v15, %v1380_v13 }
 0x149   : > { %v4499_v37 = vadd.s32 4294967169, %v1443_v20  ;;  %vm1219_vm14 = vweird.f32 %v5850_v30  ;;  %v1382_v28 = vsel %vm1368_vm15, %v1379_v22, %v1381_v23  ;;  %v1317_v53 = vsub.s32 4, %v6127_v47 }
 0x14a   : > { %vm4494_vm0 = vcmp.lt.s32.totalorder %v4493_v26, 0  ;;  %v6170_v48 = vmul.u32.u64.low %v6144_v24, %v1378_v52  ;;  %v6171_v35 = vmul.u32.u64.high %v6144_v24, %v1378_v52, %v6170_v48  ;;  %vm1223_vm2 = vcmp.eq.s32.totalorder %v1221_v6, 0 }
 0x14b   : > { %v1302_v43 = vsel %vm4494_vm0, 0, %v4493_v26  ;;  %v6176_v41 = vmul.u32.u64.low %v6144_v24, %v1382_v28  ;;  %v6177_v16 = vmul.u32.u64.high %v6144_v24, %v1382_v28, %v6176_v41  ;;  %v1449_v19 = vadd.s32 1, %v4499_v37 }
 0x14c   : > { %v1303_v50 = vsub.s32 32, %v1302_v43  ;;  %v1304_v55 = vshll.u32 %v6140_v33, %v1302_v43  ;;  %v1307_v32 = vsub.s32 4294967266, %v1302_v43  ;;  %vm1226_vm1 = vcmp.eq.s32.totalorder %v1221_v6, 2 }
 0x14d   : > { %vm1233_vm3 = vcmp.lt.s32.totalorder %v5854_v5, 0  ;;  %v1390_v0 = vmul.u32 %v6144_v24, %v1374_v49  ;;  %v1393_v57 = vadd.s32 1, %v6171_v35  ;;  %vm1450_vm4 = vcmp.gt.s32.totalorder %v1449_v19, 0 }
 0x14e   : > { %v1305_v62 = vshrl.u32 %v1287_v4, %v1303_v50  ;;  %v1308_v20 = vadd.s32 127, %v1307_v32  ;;  %v1318_v39 = vsel %vm1233_vm3, %v1317_v53, %v6127_v47  ;;  %vm1392_vm6 = vc.u32 %v6177_v16, %v6170_v48 }
 0x14f   : > { %v4846_v2 = vpop.eup %4845  ;;  %v1439_v33 = vand.u32 2147483647, %v6083_v61  ;;  %v1451_v42 = vsel %vm1450_vm4, %v1449_v19, 0  ;;  %v1394_v60 = vsel %vm1392_vm6, %v1393_v57, %v6171_v35  ;;  %vm1222_vm5 = vcmp.lt.s32.totalorder %v1221_v6, 2 }
 0x150   : > { %v4848_v45 = vpop.eup %4847  ;;  %v1227_v46 = vxor.u32 2147483648, %v4846_v2  ;;  %v1306_v15 = vor.u32 %v1305_v62, %v1304_v55  ;;  %v1309_v24 = vshll.u32 %v1308_v20, 23  ;;  %v1395_v21 = vadd.s32 %v1394_v60, %v1390_v0 }
 0x151   : > { %v1224_v40 = vxor.u32 2147483648, %v4848_v45  ;;  %v1453_v3 = vand.u32 31, %v1451_v42  ;;  %vm6193_vm7 = vcmp.le.f32.partialorder %v1231_v59, 0.7853982  ;;  %v1446_v13 = vand.u32 8388607, %v1439_v33 }
 0x152   : > { %v1228_v63 = vsel %vm1226_vm1, %v1227_v46, %v4848_v45  ;;  %v1310_v44 = vor.u32 4788187, %v1309_v24  ;;  %v1313_v58 = vcvt.s32.f32 %v1306_v15  ;;  %v1320_v17 = vsel %vm6193_vm7, 0, %v1318_v39 }
 0x153   : > { %v1225_v56 = vsel %vm1223_vm2, %v4846_v2, %v1224_v40  ;;  %v1396_v22 = vadd.s32 536870912, %v1395_v21  ;;  %v1454_v4 = vsub.s32 32, %v1453_v3  ;;  %v1452_v49 = vshrl.u32 %v1451_v42, 5 }
 0x154   : > { %v1229_v26 = vsel %vm1222_vm5, %v1225_v56, %v1228_v63  ;;  %v1311_v54 = vand.u32 2147483647, %v1310_v44  ;;  %v1456_v6 = vshll.u32 %v5057_v25, %v1453_v3  ;;  %v1459_v23 = vshll.u32 %v5058_v27, %v1453_v3 }
 0x155   : > { %v1230_v59 = vsel %vm1219_vm14, nan, %v1229_v26  ;;  %v6204_v52 = vshrl.u32 %v1396_v22, 30  ;;  %v1457_v28 = vshrl.u32 %v5058_v27, %v1454_v4  ;;  %v1460_v35 = vshrl.u32 %v8543_v29, %v1454_v4 }
 0x156   : > { %v1314_v37 = vmul.f32 %v1313_v58, %v1311_v54  ;;  %v1465_v43 = vshll.u32 %v8556_v36, %v1453_v3  ;;  %1551 = vst [vmem:[%s5207_s16 + $0x40] sm:$0xff] %v1230_v59  ;;  %v1462_v41 = vshll.u32 %v8543_v29, %v1453_v3  ;;  %v1463_v30 = vshrl.u32 %v8556_v36, %v1454_v4 }
 0x157   : > { %v1398_v53 = vshll.u32 %v6204_v52, 30  ;;  %v1466_v50 = vshrl.u32 %v5061_v38, %v1454_v4  ;;  %v1468_v32 = vshll.u32 %v5061_v38, %v1453_v3  ;;  %v1324_v19 = vadd.s32 3, %v1320_v17 }
 0x158   : > { %v1315_v55 = vxor.u32 2147483648, %v1314_v37  ;;  %v1447_v62 = vor.u32 8388608, %v1446_v13  ;;  %v1469_v20 = vshrl.u32 %v5062_v51, %v1454_v4  ;;  %v1458_v2 = vor.u32 %v1457_v28, %v1456_v6 }
 0x159   : > { %v6217_v0 = vsub.s32 %v1395_v21, %v1398_v53  ;;  %v1461_v39 = vor.u32 %v1460_v35, %v1459_v23  ;;  %v1467_v42 = vor.u32 %v1466_v50, %v1465_v43  ;;  %v1464_v15 = vor.u32 %v1463_v30, %v1462_v41 }
 0x15a   : > { %v1316_v57 = vsel %vm1233_vm3, %v1315_v55, %v1314_v37  ;;  %vm1471_vm8 = vcmp.lt.s32.totalorder %v1452_v49, 1  ;;  %v1455_v24 = vshrl.u32 %v5057_v25, %v1454_v4  ;;  %v1470_v60 = vor.u32 %v1469_v20, %v1468_v32 }
 0x15b   : > { %v1319_v45 = vsel %vm6193_vm7, %v5854_v5, %v1316_v57  ;;  %v1401_v46 = vsub.s32 0, %v6217_v0  ;;  %vm1474_vm9 = vcmp.lt.s32.totalorder %v1452_v49, 4  ;;  %vm1473_vm10 = vcmp.lt.s32.totalorder %v1452_v49, 3 }
 0x15c   : > { %4849 = vcosq.f32 %v1319_v45  ;;  %v1476_v21 = vsel %vm1474_vm9, %v1464_v15, 2102212464  ;;  %vm1472_vm11 = vcmp.lt.s32.totalorder %v1452_v49, 2  ;;  %v1479_v3 = vsel %vm1471_vm8, %v1458_v2, %v1461_v39 }
 0x15d   : > { %4851 = vsinq.f32 %v1319_v45  ;;  %v4496_v40 = vmin.u32 %v1401_v46, %v6217_v0  ;;  %v1480_v63 = vsel %vm1474_vm9, %v1467_v42, 920167782  ;;  %v1487_v47 = vshll.u32 %v1447_v62, 8 }
 0x15e   : > { %v1325_v44 = vand.u32 3, %v1324_v19  ;;  %v1483_v56 = vsel %vm1471_vm8, %v1461_v39, %v1464_v15  ;;  %v6233_v17 = vsub.s32 1, %v5185_v1  ;;  %v1475_v22 = vsel %vm1471_vm8, %v1455_v24, %v1458_v2 }
 0x15f   : > { %v1403_v58 = vclz %v4496_v40  ;;  %v1477_v4 = vsel %vm1473_vm10, %v1461_v39, %v1476_v21  ;;  %v1481_v26 = vsel %vm1473_vm10, %v1464_v15, %v1480_v63  ;;  %v1484_v54 = vsel %vm1474_vm9, %v1470_v60, 1326507024 }
 0x160   : > { %vm1323_vm12 = vweird.f32 %v5854_v5  ;;  %v1391_v13 = vadd.s32 %v6170_v48, %v6177_v16  ;;  %v1482_v6 = vsel %vm1472_vm11, %v1479_v3, %v1481_v26  ;;  %v1485_v23 = vsel %vm1473_vm10, %v1467_v42, %v1484_v54 }
 0x161   : > { %v4497_v59 = vadd.s32 4294967294, %v1403_v58  ;;  %v1421_v37 = vsub.s32 4, %v6204_v52  ;;  %v1486_v28 = vsel %vm1472_vm11, %v1483_v56, %v1485_v23  ;;  %v1478_v53 = vsel %vm1472_vm11, %v1475_v22, %v1477_v4 }
 0x162   : > { %v6246_v35 = vmul.u32.u64.low %v1487_v47, %v1482_v6  ;;  %v6247_v43 = vmul.u32.u64.high %v1487_v47, %v1482_v6, %v6246_v35  ;;  %v6251_v41 = vmul.u32.u64.low %v1487_v47, %v1486_v28  ;;  %v6252_v30 = vmul.u32.u64.high %v1487_v47, %v1486_v28, %v6251_v41 }
 0x163   : > { %vm4498_vm15 = vcmp.lt.s32.totalorder %v4497_v59, 0  ;;  %vm1326_vm13 = vcmp.lt.s32.totalorder %v1325_v44, 2  ;;  %vm1337_vm14 = vcmp.lt.s32.totalorder %v5981_v18, 0  ;;  %v6256_v16 = vsub.s32 5, %v5185_v1 }
 0x164   : > { %v1406_v48 = vsel %vm4498_vm15, 0, %v4497_v59  ;;  %vm1327_vm0 = vcmp.eq.s32.totalorder %v1325_v44, 0  ;;  %vm1330_vm2 = vcmp.eq.s32.totalorder %v1325_v44, 2  ;;  %v1494_v62 = vmul.u32 %v1487_v47, %v1478_v53 }
 0x165   : > { %v1407_v50 = vsub.s32 32, %v1406_v48  ;;  %v1408_v55 = vshll.u32 %v6217_v0, %v1406_v48  ;;  %v1411_v32 = vsub.s32 4294967266, %v1406_v48  ;;  %v1497_v49 = vadd.s32 1, %v6247_v43 }
 0x166   : > { %v4850_v19 = vpop.eup %4849  ;;  %v1558_v20 = vrot.slane %v5193_v7, %v6233_v17  ;;  %v1422_v45 = vsel %vm1337_vm14, %v1421_v37, %v6204_v52  ;;  %vm1496_vm1 = vc.u32 %v6252_v30, %v6246_v35  ;;  %v1578_v0 = vrot.slane %v5197_v9, %v6256_v16 }
 0x167   : > { %v4852_v57 = vpop.eup %4851  ;;  %v1331_v2 = vxor.u32 2147483648, %v4850_v19  ;;  %v1409_v39 = vshrl.u32 %v1391_v13, %v1407_v50  ;;  %v1412_v42 = vadd.s32 127, %v1411_v32  ;;  %v1586_v15 = vrot.slane %v5199_v10, %v6256_v16 }
 0x168   : > { %v1328_v46 = vxor.u32 2147483648, %v4852_v57  ;;  %v1498_v21 = vsel %vm1496_vm1, %v1497_v49, %v6247_v43  ;;  %v1594_v52 = vrot.slane %v5201_v11, %v6256_v16  ;;  %v1602_v47 = vrot.slane %v5203_v12, %v6256_v16 }
 0x169   : > { %v1332_v24 = vsel %vm1330_vm2, %v1331_v2, %v4852_v57  ;;  %v1410_v60 = vor.u32 %v1409_v39, %v1408_v55  ;;  %v1413_v40 = vshll.u32 %v1412_v42, 23  ;;  %v1499_v63 = vadd.s32 %v1498_v21, %v1494_v62 }
 0x16a   : > { %v1329_v3 = vsel %vm1327_vm0, %v4850_v19, %v1328_v46  ;;  %vm6280_vm3 = vcmp.le.f32.partialorder %v1335_v14, 0.7853982  ;;  %v1562_v13 = vrot.slane %v5193_v7, %v6256_v16  ;;  %v6289_v59 = vrot.slane %v1578_v0, %v6233_v17 }
 0x16b   : > { %v1333_v58 = vsel %vm1326_vm13, %v1329_v3, %v1332_v24  ;;  %v1414_v22 = vor.u32 4788187, %v1413_v40  ;;  %v1417_v4 = vcvt.s32.f32 %v1410_v60  ;;  %v1500_v54 = vadd.s32 536870912, %v1499_v63 }
 0x16c   : > { %v1334_v26 = vsel %vm1323_vm12, nan, %v1333_v58  ;;  %v1424_v6 = vsel %vm6280_vm3, 0, %v1422_v45  ;;  %v6295_v14 = vrot.slane %v1586_v15, %v6233_v17  ;;  %v1618_v37 = vrot.slane %v1558_v20, %v6233_v17 }
 0x16d   : > { %v1415_v44 = vand.u32 2147483647, %v1414_v22  ;;  %1552 = vst [vmem:[%s5207_s16 + $0x48] sm:$0xff] %v1334_v26  ;;  %v1501_v23 = vshrl.u32 %v1500_v54, 30  ;;  %v6299_v5 = vrot.slane %v1594_v52, %v6233_v17  ;;  %v6302_v28 = vrot.slane %v1602_v47, %v6233_v17 }
 0x16e   : > { %v1622_v41 = vrot.slane %v1562_v13, %v6233_v17  ;;  %v1428_v50 = vadd.s32 3, %v1424_v6  ;;  %v1663_v32 = vmul.f32 %v1618_v37, %v5232_v31  ;;  %v1566_v49 = vrot.slane %v5195_v8, %v6233_v17 }
 0x16f   : > { %v1418_v43 = vmul.f32 %v1417_v4, %v1415_v44  ;;  %v1502_v53 = vshll.u32 %v1501_v23, 30  ;;  %v1525_v62 = vsub.s32 4, %v1501_v23  ;;  %vm1441_vm4 = vcmp.lt.s32.totalorder %v6083_v61, 0 }
 0x170   : > { %v1664_v2 = vmul.f32 %v1622_v41, %v5232_v31  ;;  %v1429_v39 = vand.u32 3, %v1428_v50  ;;  %v6316_v45 = vadd.f32 %v1663_v32, %v5240_v34  ;;  %v1570_v0 = vrot.slane %v5195_v8, %v6256_v16 }
 0x171   : > { %v1419_v48 = vxor.u32 2147483648, %v1418_v43  ;;  %v1503_v55 = vsub.s32 %v1499_v63, %v1502_v53  ;;  %v1526_v46 = vsel %vm1441_vm4, %v1525_v62, %v1501_v23  ;;  %v1626_v15 = vrot.slane %v1566_v49, %v6233_v17 }
 0x172   : > { %v6324_v60 = vadd.f32 %v1664_v2, %v5240_v34  ;;  %vm1430_vm6 = vcmp.lt.s32.totalorder %v1429_v39, 2  ;;  %vm1431_vm5 = vcmp.eq.s32.totalorder %v1429_v39, 0  ;;  %vm6328_vm7 = vcmp.le.f32.partialorder %v1439_v33, 0.7853982 }
 0x173   : > { %v1420_v19 = vsel %vm1337_vm14, %v1419_v48, %v1418_v43  ;;  %v1505_v57 = vsub.s32 0, %v1503_v55  ;;  %v1687_v21 = vand.u32 2147483647, %v6316_v45  ;;  %vm1427_vm8 = vweird.f32 %v5981_v18 }
 0x174   : > { %v1423_v20 = vsel %vm6280_vm3, %v5981_v18, %v1420_v19  ;;  %vm1434_vm9 = vcmp.eq.s32.totalorder %v1429_v39, 2  ;;  %v1528_v3 = vsel %vm6328_vm7, 0, %v1526_v46  ;;  %v1690_v63 = vand.u32 2139095040, %v6316_v45 }
 0x175   : > { %4853 = vcosq.f32 %v1423_v20  ;;  %v4500_v42 = vmin.u32 %v1505_v57, %v1503_v55  ;;  %v1630_v52 = vrot.slane %v1570_v0, %v6233_v17  ;;  %v1665_v47 = vmul.f32 %v1626_v15, %v5232_v31 }
 0x176   : > { %4855 = vsinq.f32 %v1423_v20  ;;  %v1694_v33 = vand.u32 8388607, %v1687_v21  ;;  %v1791_v58 = vand.u32 2147483647, %v6324_v60  ;;  %v1495_v56 = vadd.s32 %v6246_v35, %v6252_v30 }
 0x177   : > { %v1507_v24 = vclz %v4500_v42  ;;  %v1691_v22 = vshrl.u32 %v1690_v63, 23  ;;  %v1794_v4 = vand.u32 2139095040, %v6324_v60  ;;  %v1532_v54 = vadd.s32 3, %v1528_v3 }
 0x178   : > { %v1574_v13 = vrot.slane %v5197_v9, %v6233_v17  ;;  %v1798_v44 = vand.u32 8388607, %v1791_v58  ;;  %v6350_v41 = vmul.f32 %v1630_v52, %v5232_v31  ;;  %v6353_v35 = vadd.f32 %v1665_v47, %v5240_v34 }
 0x179   : > { %v4501_v16 = vadd.s32 4294967294, %v1507_v24  ;;  %v4503_v43 = vadd.s32 4294967169, %v1691_v22  ;;  %v1695_v30 = vor.u32 8388608, %v1694_v33  ;;  %v1795_v48 = vshrl.u32 %v1794_v4, 23 }
 0x17a   : > { %v6355_v57 = vand.u32 3, %v1532_v54  ;;  %v1799_v2 = vor.u32 8388608, %v1798_v44 }
 0x17b   : > { %vm4502_vm10 = vcmp.lt.s32.totalorder %v4501_v16, 0  ;;  %v1697_v49 = vadd.s32 1, %v4503_v43 }
 0x17c   : > { %v1510_v26 = vsel %vm4502_vm10, 0, %v4501_v16  ;;  %v6359_v16 = vshll.u32 %v1695_v30, 8  ;;  %v6364_v4 = vshll.u32 %v1799_v2, 8  ;;  %vm1538_vm2 = vcmp.eq.s32.totalorder %v6355_v57, 2 }
 0x17d   : > { %v1511_v6 = vsub.s32 32, %v1510_v26  ;;  %v1512_v23 = vshll.u32 %v1503_v55, %v1510_v26  ;;  %v1515_v37 = vsub.s32 4294967266, %v1510_v26  ;;  %v4507_v55 = vadd.s32 4294967169, %v1795_v48 }
 0x17e   : > { %vm1698_vm11 = vcmp.gt.s32.totalorder %v1697_v49, 0  ;;  %vm1535_vm1 = vcmp.eq.s32.totalorder %v6355_v57, 0  ;;  %vm1534_vm3 = vcmp.lt.s32.totalorder %v6355_v57, 2  ;;  %vm1689_vm10 = vcmp.lt.s32.totalorder %v6316_v45, 0 }
 0x17f   : > { %v4854_v53 = vpop.eup %4853  ;;  %v1513_v19 = vshrl.u32 %v1495_v56, %v1511_v6  ;;  %v1516_v62 = vadd.s32 127, %v1515_v37  ;;  %v1699_v24 = vsel %vm1698_vm11, %v1697_v49, 0  ;;  %v1801_v3 = vadd.s32 1, %v4507_v55 }
 0x180   : > { %v4856_v50 = vpop.eup %4855  ;;  %v1435_v32 = vxor.u32 2147483648, %v4854_v53  ;;  %v1700_v33 = vshrl.u32 %v1699_v24, 5  ;;  %v1701_v22 = vand.u32 31, %v1699_v24  ;;  %vm6485_vm11 = vcmp.le.f32.partialorder %v1687_v21, 0.7853982 }
 0x181   : > { %v1432_v20 = vxor.u32 2147483648, %v4856_v50  ;;  %v1514_v46 = vor.u32 %v1513_v19, %v1512_v23  ;;  %v1517_v0 = vshll.u32 %v1516_v62, 23  ;;  %vm1802_vm12 = vcmp.gt.s32.totalorder %v1801_v3, 0 }
 0x182   : > { %v1436_v42 = vsel %vm1434_vm9, %v1435_v32, %v4856_v50  ;;  %vm1719_vm15 = vcmp.lt.s32.totalorder %v1700_v33, 1  ;;  %vm1720_vm13 = vcmp.lt.s32.totalorder %v1700_v33, 2  ;;  %vm1721_vm14 = vcmp.lt.s32.totalorder %v1700_v33, 3 }
 0x183   : > { %v1433_v15 = vsel %vm1431_vm5, %v4854_v53, %v1432_v20  ;;  %v1518_v52 = vor.u32 4788187, %v1517_v0  ;;  %v1521_v47 = vcvt.s32.f32 %v1514_v46  ;;  %v1702_v54 = vsub.s32 32, %v1701_v22 }
 0x184   : > { %v1437_v63 = vsel %vm1430_vm6, %v1433_v15, %v1436_v42  ;;  %v1704_v44 = vshll.u32 %v5057_v25, %v1701_v22  ;;  %v1707_v39 = vshll.u32 %v5058_v27, %v1701_v22  ;;  %v1710_v6 = vshll.u32 %v8543_v29, %v1701_v22 }
 0x185   : > { %v1438_v56 = vsel %vm1427_vm8, nan, %v1437_v63  ;;  %v1519_v26 = vand.u32 2147483647, %v1518_v52  ;;  %v1713_v18 = vshll.u32 %v8556_v36, %v1701_v22  ;;  %v1716_v37 = vshll.u32 %v5061_v38, %v1701_v22 }
 0x186   : > { %1553 = vst [vmem:[%s5207_s16 + $0x50] sm:$0xff] %v1438_v56  ;;  %vm1722_vm0 = vcmp.lt.s32.totalorder %v1700_v33, 4  ;;  %v1703_v43 = vshrl.u32 %v5057_v25, %v1702_v54  ;;  %v1705_v53 = vshrl.u32 %v5058_v27, %v1702_v54  ;;  %v1708_v30 = vshrl.u32 %v8543_v29, %v1702_v54 }
 0x187   : > { %v1522_v23 = vmul.f32 %v1521_v47, %v1519_v26  ;;  %v1711_v48 = vshrl.u32 %v8556_v36, %v1702_v54  ;;  %v1714_v32 = vshrl.u32 %v5061_v38, %v1702_v54  ;;  %v1717_v19 = vshrl.u32 %v5062_v51, %v1702_v54 }
 0x188   : > { %v1803_v62 = vsel %vm1802_vm12, %v1801_v3, 0  ;;  %v1706_v49 = vor.u32 %v1705_v53, %v1704_v44  ;;  %v1709_v20 = vor.u32 %v1708_v30, %v1707_v39 }
 0x189   : > { %v1523_v50 = vxor.u32 2147483648, %v1522_v23  ;;  %v1712_v55 = vor.u32 %v1711_v48, %v1710_v6  ;;  %v6379_v2 = vshrl.u32 %v1803_v62, 5  ;;  %v1715_v46 = vor.u32 %v1714_v32, %v1713_v18 }
 0x18a   : > { %v1718_v0 = vor.u32 %v1717_v19, %v1716_v37  ;;  %v1805_v15 = vand.u32 31, %v1803_v62  ;;  %v1723_v63 = vsel %vm1719_vm15, %v1703_v43, %v1706_v49  ;;  %v1727_v3 = vsel %vm1719_vm15, %v1706_v49, %v1709_v20 }
 0x18b   : > { %v1524_v42 = vsel %vm1441_vm4, %v1523_v50, %v1522_v23  ;;  %v1724_v52 = vsel %vm1722_vm0, %v1712_v55, 2102212464  ;;  %v1728_v56 = vsel %vm1722_vm0, %v1715_v46, 920167782  ;;  %v1731_v22 = vsel %vm1719_vm15, %v1709_v20, %v1712_v55 }
 0x18c   : > { %v1527_v24 = vsel %vm6328_vm7, %v6083_v61, %v1524_v42  ;;  %v1725_v47 = vsel %vm1721_vm14, %v1709_v20, %v1724_v52  ;;  %v1729_v54 = vsel %vm1721_vm14, %v1712_v55, %v1728_v56  ;;  %v1732_v40 = vsel %vm1722_vm0, %v1718_v0, 1326507024 }
 0x18d   : > { %4857 = vcosq.f32 %v1527_v24  ;;  %v1726_v26 = vsel %vm1720_vm13, %v1723_v63, %v1725_v47  ;;  %v1730_v44 = vsel %vm1720_vm13, %v1727_v3, %v1729_v54  ;;  %v1733_v39 = vsel %vm1721_vm14, %v1715_v46, %v1732_v40 }
 0x18e   : > { %4859 = vsinq.f32 %v1527_v24  ;;  %v1742_v6 = vmul.u32 %v6359_v16, %v1726_v26  ;;  %v1806_v23 = vsub.s32 32, %v1805_v15  ;;  %v1734_v18 = vsel %vm1720_vm13, %v1731_v22, %v1733_v39 }
 0x18f   : > { %v6402_v37 = vmul.u32.u64.low %v6359_v16, %v1730_v44  ;;  %v6403_v43 = vmul.u32.u64.high %v6359_v16, %v1730_v44, %v6402_v37  ;;  %v1808_v53 = vshll.u32 %v5057_v25, %v1805_v15  ;;  %vm1531_vm4 = vweird.f32 %v6083_v61 }
 0x190   : > { %v6409_v30 = vmul.u32.u64.low %v6359_v16, %v1734_v18  ;;  %v6410_v48 = vmul.u32.u64.high %v6359_v16, %v1734_v18, %v6409_v30  ;;  %v1807_v50 = vshrl.u32 %v5057_v25, %v1806_v23  ;;  %v1809_v32 = vshrl.u32 %v5058_v27, %v1806_v23 }
 0x191   : > { %v1811_v33 = vshll.u32 %v5058_v27, %v1805_v15  ;;  %v1812_v19 = vshrl.u32 %v8543_v29, %v1806_v23  ;;  %v1814_v62 = vshll.u32 %v8543_v29, %v1805_v15  ;;  %v1815_v49 = vshrl.u32 %v8556_v36, %v1806_v23 }
 0x192   : > { %v1810_v20 = vor.u32 %v1809_v32, %v1808_v53  ;;  %v1817_v55 = vshll.u32 %v8556_v36, %v1805_v15  ;;  %v1818_v16 = vshrl.u32 %v5061_v38, %v1806_v23  ;;  %v1820_v42 = vshll.u32 %v5061_v38, %v1805_v15 }
 0x193   : > { %v1745_v46 = vadd.s32 1, %v6403_v43  ;;  %v1813_v0 = vor.u32 %v1812_v19, %v1811_v33  ;;  %v1816_v24 = vor.u32 %v1815_v49, %v1814_v62  ;;  %v1821_v63 = vshrl.u32 %v5062_v51, %v1806_v23 }
 0x194   : > { %vm1744_vm6 = vc.u32 %v6410_v48, %v6402_v37  ;;  %v1819_v52 = vor.u32 %v1818_v16, %v1817_v55  ;;  %vm1823_vm5 = vcmp.lt.s32.totalorder %v6379_v2, 1  ;;  %v1898_v3 = vand.u32 2139095040, %v6353_v35 }
 0x195   : > { %v1746_v47 = vsel %vm1744_vm6, %v1745_v46, %v6403_v43  ;;  %v1822_v56 = vor.u32 %v1821_v63, %v1820_v42  ;;  %vm1824_vm7 = vcmp.lt.s32.totalorder %v6379_v2, 2  ;;  %vm1825_vm8 = vcmp.lt.s32.totalorder %v6379_v2, 3 }
 0x196   : > { %v1747_v22 = vadd.s32 %v1746_v47, %v1742_v6  ;;  %vm1826_vm9 = vcmp.lt.s32.totalorder %v6379_v2, 4  ;;  %v1827_v26 = vsel %vm1823_vm5, %v1807_v50, %v1810_v20  ;;  %v1831_v54 = vsel %vm1823_vm5, %v1810_v20, %v1813_v0 }
 0x197   : > { %v4858_v15 = vpop.eup %4857  ;;  %v1828_v39 = vsel %vm1826_vm9, %v1816_v24, 2102212464  ;;  %v1832_v23 = vsel %vm1826_vm9, %v1819_v52, 920167782  ;;  %v1835_v18 = vsel %vm1823_vm5, %v1813_v0, %v1816_v24  ;;  %v1836_v33 = vsel %vm1826_vm9, %v1822_v56, 1326507024 }
 0x198   : > { %v4860_v40 = vpop.eup %4859  ;;  %v1539_v44 = vxor.u32 2147483648, %v4858_v15  ;;  %v1748_v30 = vadd.s32 536870912, %v1747_v22  ;;  %v1829_v43 = vsel %vm1825_vm8, %v1813_v0, %v1828_v39  ;;  %v1833_v32 = vsel %vm1825_vm8, %v1816_v24, %v1832_v23 }
 0x199   : > { %v1536_v53 = vxor.u32 2147483648, %v4860_v40  ;;  %v1834_v50 = vsel %vm1824_vm7, %v1831_v54, %v1833_v32  ;;  %v8542_v19 = vand.u32 2147483647, %v6353_v35  ;;  %v1830_v20 = vsel %vm1824_vm7, %v1827_v26, %v1829_v43 }
 0x19a   : > { %v1540_v6 = vsel %vm1538_vm2, %v1539_v44, %v4860_v40  ;;  %v1749_v49 = vshrl.u32 %v1748_v30, 30  ;;  %v1837_v55 = vsel %vm1825_vm8, %v1819_v52, %v1836_v33  ;;  %v1899_v56 = vshrl.u32 %v1898_v3, 23 }
 0x19b   : > { %v1537_v62 = vsel %vm1535_vm1, %v4858_v15, %v1536_v53  ;;  %v1838_v42 = vsel %vm1824_vm7, %v1835_v18, %v1837_v55  ;;  %v6452_v46 = vmul.u32.u64.low %v6364_v4, %v1834_v50  ;;  %v6453_v0 = vmul.u32.u64.high %v6364_v4, %v1834_v50, %v6452_v46 }
 0x19c   : > { %v1541_v16 = vsel %vm1534_vm3, %v1537_v62, %v1540_v6  ;;  %v1750_v63 = vshll.u32 %v1749_v49, 30  ;;  %v1773_v47 = vsub.s32 4, %v1749_v49  ;;  %v1582_v52 = vrot.slane %v5199_v10, %v6233_v17 }
 0x19d   : > { %v1542_v24 = vsel %vm1531_vm4, nan, %v1541_v16  ;;  %v6462_v57 = vmul.u32.u64.low %v6364_v4, %v1838_v42  ;;  %v6463_v2 = vmul.u32.u64.high %v6364_v4, %v1838_v42, %v6462_v57  ;;  %v1634_v15 = vrot.slane %v1574_v13, %v6233_v17 }
 0x19e   : > { %1554 = vst [vmem:[%s5207_s16 + $0x58] sm:$0xff] %v1542_v24  ;;  %v6469_v61 = vsub.s32 %v1747_v22, %v1750_v63  ;;  %v1774_v3 = vsel %vm1689_vm10, %v1773_v47, %v1749_v49  ;;  %v4511_v26 = vadd.s32 4294967169, %v1899_v56  ;;  %v1590_v54 = vrot.slane %v5201_v11, %v6233_v17 }
 0x19f   : > { %v1846_v40 = vmul.u32 %v6364_v4, %v1830_v20  ;;  %v1849_v44 = vadd.s32 1, %v6453_v0  ;;  %v1902_v39 = vand.u32 8388607, %v8542_v19  ;;  %v6481_v23 = vadd.f32 %v6350_v41, %v5240_v34 }
 0x1a0   : > { %v1753_v22 = vsub.s32 0, %v6469_v61  ;;  %v1905_v18 = vadd.s32 1, %v4511_v26  ;;  %v1598_v4 = vrot.slane %v5203_v12, %v6233_v17  ;;  %v1642_v53 = vrot.slane %v1582_v52, %v6233_v17 }
 0x1a1   : > { %v1776_v30 = vsel %vm6485_vm11, 0, %v1774_v3  ;;  %vm1848_vm12 = vc.u32 %v6463_v2, %v6452_v46  ;;  %v1667_v41 = vmul.f32 %v1634_v15, %v5232_v31  ;;  %v6500_v32 = vrot.slane %v1590_v54, %v6233_v17 }
 0x1a2   : > { %v4504_v21 = vmin.u32 %v1753_v22, %v6469_v61  ;;  %v1850_v43 = vsel %vm1848_vm12, %v1849_v44, %v6453_v0  ;;  %vm1906_vm15 = vcmp.gt.s32.totalorder %v1905_v18, 0  ;;  %v1903_v50 = vor.u32 8388608, %v1902_v39 }
 0x1a3   : > { %v1851_v6 = vadd.s32 %v1850_v43, %v1846_v40  ;;  %v1907_v33 = vsel %vm1906_vm15, %v1905_v18, 0  ;;  %v1780_v49 = vadd.s32 3, %v1776_v30  ;;  %v8541_v20 = vand.u32 2147483647, %v6481_v23 }
 0x1a4   : > { %v1755_v62 = vclz %v4504_v21  ;;  %v2002_v55 = vand.u32 2139095040, %v6481_v23  ;;  %v6505_v16 = vrot.slane %v1598_v4, %v6233_v17  ;;  %v6509_v42 = vmul.f32 %v6289_v59, %v5232_v31 }
 0x1a5   : > { %v1852_v0 = vadd.s32 536870912, %v1851_v6  ;;  %v1909_v24 = vand.u32 31, %v1907_v33  ;;  %v6512_v63 = vmul.f32 %v1642_v53, %v5232_v31  ;;  %v6515_v47 = vadd.f32 %v1667_v41, %v5240_v34 }
 0x1a6   : > { %v1743_v56 = vadd.s32 %v6402_v37, %v6410_v48  ;;  %v4505_v52 = vadd.s32 4294967294, %v1755_v62  ;;  %v6520_v57 = vadd.s32 %v6452_v46, %v6463_v2  ;;  %v6522_v3 = vshll.u32 %v1903_v50, 8 }
 0x1a7   : > { %v1853_v17 = vshrl.u32 %v1852_v0, 30  ;;  %v1910_v15 = vsub.s32 32, %v1909_v24  ;;  %v6524_v59 = vand.u32 3, %v1780_v49  ;;  %vm1793_vm14 = vcmp.lt.s32.totalorder %v6324_v60, 0 }
 0x1a8   : > { %vm4506_vm13 = vcmp.lt.s32.totalorder %v4505_v52, 0  ;;  %v2003_v26 = vshrl.u32 %v2002_v55, 23  ;;  %v6529_v54 = vand.u32 8388607, %v8541_v20  ;;  %v1912_v48 = vshll.u32 %v5057_v25, %v1909_v24 }
 0x1a9   : > { %v1758_v40 = vsel %vm4506_vm13, 0, %v4505_v52  ;;  %v1854_v37 = vshll.u32 %v1853_v17, 30  ;;  %v1915_v46 = vshll.u32 %v5058_v27, %v1909_v24  ;;  %v1918_v22 = vshll.u32 %v8543_v29, %v1909_v24 }
 0x1aa   : > { %v1759_v2 = vsub.s32 32, %v1758_v40  ;;  %v1760_v44 = vshll.u32 %v6469_v61, %v1758_v40  ;;  %v1763_v39 = vsub.s32 4294967266, %v1758_v40  ;;  %vm6537_vm0 = vcmp.le.f32.partialorder %v1791_v58, 0.7853982 }
 0x1ab   : > { %v6541_v4 = vsub.s32 %v1851_v6, %v1854_v37  ;;  %v1913_v53 = vshrl.u32 %v5058_v27, %v1910_v15  ;;  %v1916_v30 = vshrl.u32 %v8543_v29, %v1910_v15  ;;  %v1919_v41 = vshrl.u32 %v8556_v36, %v1910_v15 }
 0x1ac   : > { %v1761_v21 = vshrl.u32 %v1743_v56, %v1759_v2  ;;  %v1764_v43 = vadd.s32 127, %v1763_v39  ;;  %v1908_v61 = vshrl.u32 %v1907_v33, 5  ;;  %v1921_v50 = vshll.u32 %v8556_v36, %v1909_v24 }
 0x1ad   : > { %v1857_v62 = vsub.s32 0, %v6541_v4  ;;  %v1877_v49 = vsub.s32 4, %v1853_v17  ;;  %v1924_v58 = vshll.u32 %v5061_v38, %v1909_v24  ;;  %v4515_v55 = vadd.s32 4294967169, %v2003_v26 }
 0x1ae   : > { %v1762_v0 = vor.u32 %v1761_v21, %v1760_v44  ;;  %v1765_v6 = vshll.u32 %v1764_v43, 23  ;;  %v1922_v52 = vshrl.u32 %v5061_v38, %v1910_v15  ;;  %v1925_v40 = vshrl.u32 %v5062_v51, %v1910_v15 }
 0x1af   : > { %v4508_v37 = vmin.u32 %v1857_v62, %v6541_v4  ;;  %v1914_v20 = vor.u32 %v1913_v53, %v1912_v48  ;;  %v1917_v56 = vor.u32 %v1916_v30, %v1915_v46  ;;  %v1920_v2 = vor.u32 %v1919_v41, %v1918_v22 }
 0x1b0   : > { %v1766_v33 = vor.u32 4788187, %v1765_v6  ;;  %v1769_v39 = vcvt.s32.f32 %v1762_v0  ;;  %v1923_v19 = vor.u32 %v1922_v52, %v1921_v50  ;;  %vm1927_vm2 = vcmp.lt.s32.totalorder %v1908_v61, 1 }
 0x1b1   : > { %v1859_v29 = vclz %v4508_v37  ;;  %v1878_v24 = vsel %vm1793_vm14, %v1877_v49, %v1853_v17  ;;  %v1911_v26 = vshrl.u32 %v5057_v25, %v1910_v15  ;;  %v1926_v44 = vor.u32 %v1925_v40, %v1924_v58 }
 0x1b2   : > { %v1767_v21 = vand.u32 2147483647, %v1766_v33  ;;  %vm1928_vm1 = vcmp.lt.s32.totalorder %v1908_v61, 2  ;;  %vm1929_vm3 = vcmp.lt.s32.totalorder %v1908_v61, 3  ;;  %vm1930_vm4 = vcmp.lt.s32.totalorder %v1908_v61, 4 }
 0x1b3   : > { %v4509_v43 = vadd.s32 4294967294, %v1859_v29  ;;  %v1932_v62 = vsel %vm1930_vm4, %v1920_v2, 2102212464  ;;  %v1935_v48 = vsel %vm1927_vm2, %v1914_v20, %v1917_v56  ;;  %v1936_v46 = vsel %vm1930_vm4, %v1923_v19, 920167782 }
 0x1b4   : > { %v1770_v22 = vmul.f32 %v1769_v39, %v1767_v21  ;;  %v1880_v53 = vsel %vm6537_vm0, 0, %v1878_v24  ;;  %v1937_v30 = vsel %vm1929_vm3, %v1920_v2, %v1936_v46  ;;  %v1939_v17 = vsel %vm1927_vm2, %v1917_v56, %v1920_v2 }
 0x1b5   : > { %vm4510_vm6 = vcmp.lt.s32.totalorder %v4509_v43, 0  ;;  %v1931_v15 = vsel %vm1927_vm2, %v1911_v26, %v1914_v20  ;;  %v1933_v41 = vsel %vm1929_vm3, %v1917_v56, %v1932_v62  ;;  %v1940_v50 = vsel %vm1930_vm4, %v1926_v44, 1326507024 }
 0x1b6   : > { %v1771_v49 = vxor.u32 2147483648, %v1770_v22  ;;  %v1862_v29 = vsel %vm4510_vm6, 0, %v4509_v43  ;;  %v1938_v58 = vsel %vm1928_vm1, %v1935_v48, %v1937_v30  ;;  %v1941_v0 = vsel %vm1929_vm3, %v1923_v19, %v1940_v50 }
 0x1b7   : > { %v1863_v6 = vsub.s32 32, %v1862_v29  ;;  %v1864_v52 = vshll.u32 %v6541_v4, %v1862_v29  ;;  %v1867_v40 = vsub.s32 4294967266, %v1862_v29  ;;  %v1942_v37 = vsel %vm1928_vm1, %v1939_v17, %v1941_v0 }
 0x1b8   : > { %v1772_v2 = vsel %vm1689_vm10, %v1771_v49, %v1770_v22  ;;  %v6569_v20 = vmul.u32.u64.low %v6522_v3, %v1942_v37  ;;  %v6570_v33 = vmul.u32.u64.high %v6522_v3, %v1942_v37, %v6569_v20  ;;  %v2009_v56 = vadd.s32 1, %v4515_v55 }
 0x1b9   : > { %v1775_v39 = vsel %vm6485_vm11, %v6316_v45, %v1772_v2  ;;  %v1865_v19 = vshrl.u32 %v6520_v57, %v1863_v6  ;;  %v1868_v24 = vadd.s32 127, %v1867_v40  ;;  %v1934_v4 = vsel %vm1928_vm1, %v1931_v15, %v1933_v41 }
 0x1ba   : > { %4861 = vcosq.f32 %v1775_v39  ;;  %v6578_v26 = vmul.u32.u64.low %v6522_v3, %v1938_v58  ;;  %v6579_v44 = vmul.u32.u64.high %v6522_v3, %v1938_v58, %v6578_v26  ;;  %vm2010_vm5 = vcmp.gt.s32.totalorder %v2009_v56, 0 }
 0x1bb   : > { %4863 = vsinq.f32 %v1775_v39  ;;  %v1866_v21 = vor.u32 %v1865_v19, %v1864_v52  ;;  %v1869_v43 = vshll.u32 %v1868_v24, 23  ;;  %v2011_v55 = vsel %vm2010_vm5, %v2009_v56, 0 }
 0x1bc   : > { %vm1786_vm7 = vcmp.eq.s32.totalorder %v6524_v59, 2  ;;  %v6583_v13 = vadd.s32 3, %v1880_v53  ;;  %v2007_v57 = vor.u32 8388608, %v6529_v54  ;;  %v2013_v62 = vand.u32 31, %v2011_v55 }
 0x1bd   : > { %vm1783_vm8 = vcmp.eq.s32.totalorder %v6524_v59, 0  ;;  %v1870_v61 = vor.u32 4788187, %v1869_v43  ;;  %v1873_v48 = vcvt.s32.f32 %v1866_v21  ;;  %v1950_v46 = vmul.u32 %v6522_v3, %v1934_v4 }
 0x1be   : > { %vm1952_vm9 = vc.u32 %v6570_v33, %v6578_v26  ;;  %vm1782_vm10 = vcmp.lt.s32.totalorder %v6524_v59, 2  ;;  %v1953_v22 = vadd.s32 1, %v6579_v44  ;;  %v6592_v30 = vshrl.u32 %v2011_v55, 5 }
 0x1bf   : > { %v2014_v53 = vsub.s32 32, %v2013_v62  ;;  %v2016_v17 = vshll.u32 %v5057_v25, %v2013_v62  ;;  %vm1779_vm11 = vweird.f32 %v6316_v45  ;;  %v1871_v54 = vand.u32 2147483647, %v1870_v61 }
 0x1c0   : > { %v2019_v15 = vshll.u32 %v5058_v27, %v2013_v62  ;;  %v8584_v41 = vmov 2131351028   ;;  %v2025_v3 = vshll.u32 %v8556_v36, %v2013_v62  ;;  %v1954_v49 = vsel %vm1952_vm9, %v1953_v22, %v6579_v44 }
 0x1c1   : > { %v2022_v50 = vshll.u32 %v8584_v41, %v2013_v62  ;;  %v2017_v29 = vshrl.u32 %v5058_v27, %v2014_v53  ;;  %v2020_v58 = vshrl.u32 %v8584_v41, %v2014_v53  ;;  %v2028_v0 = vshll.u32 %v5061_v38, %v2013_v62 }
 0x1c2   : > { %v1874_v6 = vmul.f32 %v1873_v48, %v1871_v54  ;;  %v1955_v52 = vadd.s32 %v1954_v49, %v1950_v46  ;;  %v2023_v40 = vshrl.u32 %v8556_v36, %v2014_v53  ;;  %v2026_v37 = vshrl.u32 %v5061_v38, %v2014_v53 }
 0x1c3   : > { %v2015_v2 = vshrl.u32 %v5057_v25, %v2014_v53  ;;  %v2018_v20 = vor.u32 %v2017_v29, %v2016_v17  ;;  %v2029_v56 = vshrl.u32 %v5062_v51, %v2014_v53  ;;  %v6607_v39 = vshll.u32 %v2007_v57, 8 }
 0x1c4   : > { %v1875_v19 = vxor.u32 2147483648, %v1874_v6  ;;  %v1956_v24 = vadd.s32 536870912, %v1955_v52  ;;  %v2021_v4 = vor.u32 %v2020_v58, %v2019_v15  ;;  %vm2031_vm12 = vcmp.lt.s32.totalorder %v6592_v30, 1  ;;  %v4862_v44 = vpop.eup %4861 }
 0x1c5   : > { %v2024_v21 = vor.u32 %v2023_v40, %v2022_v50  ;;  %v2027_v43 = vor.u32 %v2026_v37, %v2025_v3  ;;  %v2030_v55 = vor.u32 %v2029_v56, %v2028_v0  ;;  %vm2032_vm15 = vcmp.lt.s32.totalorder %v6592_v30, 2  ;;  %v4864_v62 = vpop.eup %4863 }
 0x1c6   : > { %v1787_v61 = vxor.u32 2147483648, %v4862_v44  ;;  %v1876_v48 = vsel %vm1793_vm14, %v1875_v19, %v1874_v6  ;;  %v1957_v46 = vshrl.u32 %v1956_v24, 30  ;;  %vm2034_vm13 = vcmp.lt.s32.totalorder %v6592_v30, 4 }
 0x1c7   : > { %v1784_v57 = vxor.u32 2147483648, %v4864_v62  ;;  %v1879_v22 = vsel %vm6537_vm0, %v6324_v60, %v1876_v48  ;;  %vm2033_vm2 = vcmp.lt.s32.totalorder %v6592_v30, 3  ;;  %v2036_v53 = vsel %vm2034_vm13, %v2024_v21, 2102212464 }
 0x1c8   : > { %v1788_v17 = vsel %vm1786_vm7, %v1787_v61, %v4864_v62  ;;  %4865 = vcosq.f32 %v1879_v22  ;;  %v1958_v54 = vshll.u32 %v1957_v46, 30  ;;  %v2039_v15 = vsel %vm2031_vm12, %v2018_v20, %v2021_v4 }
 0x1c9   : > { %v1785_v50 = vsel %vm1783_vm8, %v4862_v44, %v1784_v57  ;;  %4867 = vsinq.f32 %v1879_v22  ;;  %v1981_v18 = vsub.s32 4, %v1957_v46  ;;  %v2040_v3 = vsel %vm2034_vm13, %v2027_v43, 920167782 }
 0x1ca   : > { %v1789_v49 = vsel %vm1782_vm10, %v1785_v50, %v1788_v17  ;;  %vm1897_vm14 = vcmp.lt.s32.totalorder %v6353_v35, 0  ;;  %v6631_v29 = vsub.s32 %v1955_v52, %v1958_v54  ;;  %v2035_v58 = vsel %vm2031_vm12, %v2015_v2, %v2018_v20 }
 0x1cb   : > { %v1790_v0 = vsel %vm1779_vm11, nan, %v1789_v49  ;;  %v2037_v6 = vsel %vm2033_vm2, %v2021_v4, %v2036_v53  ;;  %v2041_v40 = vsel %vm2033_vm2, %v2024_v21, %v2040_v3  ;;  %v2043_v59 = vsel %vm2031_vm12, %v2021_v4, %v2024_v21 }
 0x1cc   : > { %v1885_v37 = vand.u32 3, %v6583_v13  ;;  %v1961_v52 = vsub.s32 0, %v6631_v29  ;;  %v2042_v56 = vsel %vm2032_vm15, %v2039_v15, %v2041_v40  ;;  %v2044_v45 = vsel %vm2034_vm13, %v2030_v55, 1326507024  ;;  %2935 = vst [vmem:[%s5207_s16 + $0x60] sm:$0xff] %v1790_v0 }
 0x1cd   : > { %v1982_v2 = vsel %vm1897_vm14, %v1981_v18, %v1957_v46  ;;  %v2045_v20 = vsel %vm2033_vm2, %v2027_v43, %v2044_v45  ;;  %v6655_v19 = vmul.u32.u64.low %v6607_v39, %v2042_v56  ;;  %v6656_v24 = vmul.u32.u64.high %v6607_v39, %v2042_v56, %v6655_v19 }
 0x1ce   : > { %v4512_v13 = vmin.u32 %v1961_v52, %v6631_v29  ;;  %v2038_v4 = vsel %vm2032_vm15, %v2035_v58, %v2037_v6  ;;  %v2046_v44 = vsel %vm2032_vm15, %v2043_v59, %v2045_v20  ;;  %v2106_v21 = vand.u32 2139095040, %v6515_v47 }
 0x1cf   : > { %v6667_v55 = vmul.f32 %v6295_v14, %v5232_v31  ;;  %v6671_v43 = vadd.f32 %v6509_v42, %v5240_v34  ;;  %v6674_v62 = vmul.u32.u64.low %v6607_v39, %v2046_v44  ;;  %v6675_v61 = vmul.u32.u64.high %v6607_v39, %v2046_v44, %v6674_v62 }
 0x1d0   : > { %vm1883_vm0 = vweird.f32 %v6324_v60  ;;  %v8585_v48 = vand.u32 2147483647, %v6353_v35  ;;  %v1963_v46 = vclz %v4512_v13  ;;  %v2103_v14 = vand.u32 2147483647, %v6515_v47 }
 0x1d1   : > { %v2054_v42 = vmul.u32 %v6607_v39, %v2038_v4  ;;  %v2057_v22 = vadd.s32 1, %v6656_v24  ;;  %v2107_v53 = vshrl.u32 %v2106_v21, 23  ;;  %vm1886_vm3 = vcmp.lt.s32.totalorder %v1885_v37, 2 }
 0x1d2   : > { %vm6680_vm1 = vcmp.le.f32.partialorder %v8585_v48, 0.7853982  ;;  %v4866_v17 = vpop.eup %4865  ;;  %vm1887_vm4 = vcmp.eq.s32.totalorder %v1885_v37, 0  ;;  %vm1890_vm6 = vcmp.eq.s32.totalorder %v1885_v37, 2  ;;  %v4513_v54 = vadd.s32 4294967294, %v1963_v46 }
 0x1d3   : > { %v1984_v57 = vsel %vm6680_vm1, 0, %v1982_v2  ;;  %v4868_v15 = vpop.eup %4867  ;;  %v1891_v50 = vxor.u32 2147483648, %v4866_v17  ;;  %v1951_v18 = vadd.s32 %v6578_v26, %v6570_v33  ;;  %vm2056_vm5 = vc.u32 %v6675_v61, %v6655_v19 }
 0x1d4   : > { %v4519_v3 = vadd.s32 4294967169, %v2107_v53  ;;  %v1888_v49 = vxor.u32 2147483648, %v4868_v15  ;;  %vm4514_vm7 = vcmp.lt.s32.totalorder %v4513_v54, 0  ;;  %v1988_v39 = vadd.s32 3, %v1984_v57 }
 0x1d5   : > { %v2058_v58 = vsel %vm2056_vm5, %v2057_v22, %v6656_v24  ;;  %v1892_v0 = vsel %vm1890_vm6, %v1891_v50, %v4868_v15  ;;  %v1966_v6 = vsel %vm4514_vm7, 0, %v4513_v54  ;;  %v2110_v20 = vand.u32 8388607, %v2103_v14 }
 0x1d6   : > { %v2059_v40 = vadd.s32 %v2058_v58, %v2054_v42  ;;  %v2113_v59 = vadd.s32 1, %v4519_v3  ;;  %v1889_v52 = vsel %vm1887_vm4, %v4866_v17, %v1888_v49  ;;  %v1967_v56 = vsub.s32 32, %v1966_v6 }
 0x1d7   : > { %v1968_v45 = vshll.u32 %v6631_v29, %v1966_v6  ;;  %v1971_v33 = vsub.s32 4294967266, %v1966_v6  ;;  %v1893_v26 = vsel %vm1886_vm3, %v1889_v52, %v1892_v0  ;;  %v6703_v21 = vmul.f32 %v6500_v32, %v5232_v31 }
 0x1d8   : > { %v2060_v2 = vadd.s32 536870912, %v2059_v40  ;;  %vm2114_vm8 = vcmp.gt.s32.totalorder %v2113_v59, 0  ;;  %v1894_v24 = vsel %vm1883_vm0, nan, %v1893_v26  ;;  %v1969_v13 = vshrl.u32 %v1951_v18, %v1967_v56 }
 0x1d9   : > { %v1972_v4 = vadd.s32 127, %v1971_v33  ;;  %v2115_v44 = vsel %vm2114_vm8, %v2113_v59, 0  ;;  %v6707_v29 = vmul.f32 %v6299_v5, %v5232_v31  ;;  %2936 = vst [vmem:[%s5207_s16 + $0x68] sm:$0xff] %v1894_v24  ;;  %v6712_v48 = vmul.f32 %v6505_v16, %v5232_v31 }
 0x1da   : > { %v2061_v37 = vshrl.u32 %v2060_v2, 30  ;;  %v2117_v62 = vand.u32 31, %v2115_v44  ;;  %v1970_v60 = vor.u32 %v1969_v13, %v1968_v45  ;;  %vm2001_vm9 = vcmp.lt.s32.totalorder %v6481_v23, 0 }
 0x1db   : > { %v1973_v46 = vshll.u32 %v1972_v4, 23  ;;  %v6715_v57 = vand.u32 3, %v1988_v39  ;;  %v2111_v32 = vor.u32 8388608, %v2110_v20  ;;  %v2055_v5 = vadd.s32 %v6655_v19, %v6675_v61 }
 0x1dc   : > { %v2062_v42 = vshll.u32 %v2061_v37, 30  ;;  %v2118_v22 = vsub.s32 32, %v2117_v62  ;;  %v1977_v17 = vcvt.s32.f32 %v1970_v60  ;;  %v2210_v54 = vand.u32 2139095040, %v6671_v43 }
 0x1dd   : > { %v1974_v53 = vor.u32 4788187, %v1973_v46  ;;  %v2085_v16 = vsub.s32 4, %v2061_v37  ;;  %v2116_v50 = vshrl.u32 %v2115_v44, 5  ;;  %v2120_v18 = vshll.u32 %v5057_v25, %v2117_v62 }
 0x1de   : > { %v6720_v15 = vsub.s32 %v2059_v40, %v2062_v42  ;;  %v2121_v49 = vshrl.u32 %v5058_v27, %v2118_v22  ;;  %v2123_v39 = vshll.u32 %v5058_v27, %v2117_v62  ;;  %v2124_v58 = vshrl.u32 %v8584_v41, %v2118_v22 }
 0x1df   : > { %v1975_v3 = vand.u32 2147483647, %v1974_v53  ;;  %v2126_v6 = vshll.u32 %v8584_v41, %v2117_v62  ;;  %v2127_v19 = vshrl.u32 %v8556_v36, %v2118_v22  ;;  %v2129_v61 = vshll.u32 %v8556_v36, %v2117_v62 }
 0x1e0   : > { %v2065_v0 = vsub.s32 0, %v6720_v15  ;;  %v2130_v59 = vshrl.u32 %v5061_v38, %v2118_v22  ;;  %v6731_v52 = vshll.u32 %v2111_v32, 8  ;;  %v2211_v56 = vshrl.u32 %v2210_v54, 23 }
 0x1e1   : > { %v1978_v40 = vmul.f32 %v1977_v17, %v1975_v3  ;;  %v2119_v33 = vshrl.u32 %v5057_v25, %v2118_v22  ;;  %v2132_v26 = vshll.u32 %v5061_v38, %v2117_v62  ;;  %v2133_v2 = vshrl.u32 %v5062_v51, %v2118_v22 }
 0x1e2   : > { %v4516_v45 = vmin.u32 %v2065_v0, %v6720_v15  ;;  %v2122_v24 = vor.u32 %v2121_v49, %v2120_v18  ;;  %v2125_v13 = vor.u32 %v2124_v58, %v2123_v39  ;;  %v2131_v4 = vor.u32 %v2130_v59, %v2129_v61 }
 0x1e3   : > { %v1979_v20 = vxor.u32 2147483648, %v1978_v40  ;;  %v8588_v44 = vand.u32 2147483647, %v6481_v23  ;;  %v2086_v42 = vsel %vm2001_vm9, %v2085_v16, %v2061_v37  ;;  %v2128_v32 = vor.u32 %v2127_v19, %v2126_v6 }
 0x1e4   : > { %v2067_v46 = vclz %v4516_v45  ;;  %vm2135_vm11 = vcmp.lt.s32.totalorder %v2116_v50, 1  ;;  %v2134_v22 = vor.u32 %v2133_v2, %v2132_v26  ;;  %vm2137_vm12 = vcmp.lt.s32.totalorder %v2116_v50, 3 }
 0x1e5   : > { %vm6739_vm10 = vcmp.le.f32.partialorder %v8588_v44, 0.7853982  ;;  %v1980_v62 = vsel %vm1897_vm14, %v1979_v20, %v1978_v40  ;;  %vm2138_vm15 = vcmp.lt.s32.totalorder %v2116_v50, 4  ;;  %vm2136_vm13 = vcmp.lt.s32.totalorder %v2116_v50, 2 }
 0x1e6   : > { %v1983_v53 = vsel %vm6680_vm1, %v6353_v35, %v1980_v62  ;;  %v4517_v17 = vadd.s32 4294967294, %v2067_v46  ;;  %v2140_v54 = vsel %vm2138_vm15, %v2128_v32, 2102212464  ;;  %v2139_v18 = vsel %vm2135_vm11, %v2119_v33, %v2122_v24 }
 0x1e7   : > { %4869 = vcosq.f32 %v1983_v53  ;;  %v2143_v37 = vsel %vm2135_vm11, %v2122_v24, %v2125_v13  ;;  %v2144_v16 = vsel %vm2138_vm15, %v2131_v4, 920167782  ;;  %v2141_v3 = vsel %vm2137_vm12, %v2125_v13, %v2140_v54 }
 0x1e8   : > { %4871 = vsinq.f32 %v1983_v53  ;;  %vm4518_vm2 = vcmp.lt.s32.totalorder %v4517_v17, 0  ;;  %v2145_v49 = vsel %vm2137_vm12, %v2128_v32, %v2144_v16  ;;  %v2147_v58 = vsel %vm2135_vm11, %v2125_v13, %v2128_v32 }
 0x1e9   : > { %v2070_v39 = vsel %vm4518_vm2, 0, %v4517_v17  ;;  %v2146_v30 = vsel %vm2136_vm13, %v2143_v37, %v2145_v49  ;;  %v2148_v0 = vsel %vm2138_vm15, %v2134_v22, 1326507024  ;;  %v2142_v59 = vsel %vm2136_vm13, %v2139_v18, %v2141_v3 }
 0x1ea   : > { %v2071_v6 = vsub.s32 32, %v2070_v39  ;;  %v2072_v19 = vshll.u32 %v6720_v15, %v2070_v39  ;;  %v2075_v61 = vsub.s32 4294967266, %v2070_v39  ;;  %v2149_v40 = vsel %vm2137_vm12, %v2131_v4, %v2148_v0 }
 0x1eb   : > { %v2150_v45 = vsel %vm2136_vm13, %v2147_v58, %v2149_v40  ;;  %v6764_v33 = vmul.u32.u64.low %v6731_v52, %v2146_v30  ;;  %v6765_v26 = vmul.u32.u64.high %v6731_v52, %v2146_v30, %v6764_v33  ;;  %v6774_v15 = vadd.f32 %v6512_v63, %v5240_v34 }
 0x1ec   : > { %v2073_v2 = vshrl.u32 %v2055_v5, %v2071_v6  ;;  %v2076_v20 = vadd.s32 127, %v2075_v61  ;;  %v6769_v24 = vmul.u32.u64.low %v6731_v52, %v2150_v45  ;;  %v6770_v13 = vmul.u32.u64.high %v6731_v52, %v2150_v45, %v6769_v24 }
 0x1ed   : > { %v6778_v4 = vadd.f32 %v6667_v55, %v5240_v34  ;;  %v2088_v50 = vsel %vm6739_vm10, 0, %v2086_v42  ;;  %v4523_v44 = vadd.s32 4294967169, %v2211_v56  ;;  %vm1987_vm14 = vweird.f32 %v6353_v35 }
 0x1ee   : > { %v2074_v5 = vor.u32 %v2073_v2, %v2072_v19  ;;  %v2077_v46 = vshll.u32 %v2076_v20, 23  ;;  %v2158_v32 = vmul.u32 %v6731_v52, %v2142_v59  ;;  %vm1990_vm0 = vcmp.lt.s32.totalorder %v6715_v57, 2 }
 0x1ef   : > { %v2161_v62 = vadd.s32 1, %v6765_v26  ;;  %v2207_v63 = vand.u32 2147483647, %v6671_v43  ;;  %v2217_v22 = vadd.s32 1, %v4523_v44  ;;  %v2092_v17 = vadd.s32 3, %v2088_v50 }
 0x1f0   : > { %v2078_v53 = vor.u32 4788187, %v2077_v46  ;;  %v2081_v55 = vcvt.s32.f32 %v2074_v5  ;;  %vm2160_vm1 = vc.u32 %v6770_v13, %v6764_v33  ;;  %vm1991_vm3 = vcmp.eq.s32.totalorder %v6715_v57, 0 }
 0x1f1   : > { %v4870_v56 = vpop.eup %4869  ;;  %vm1994_vm4 = vcmp.eq.s32.totalorder %v6715_v57, 2  ;;  %v2162_v52 = vsel %vm2160_vm1, %v2161_v62, %v6765_v26  ;;  %vm2218_vm6 = vcmp.gt.s32.totalorder %v2217_v22, 0  ;;  %v2214_v49 = vand.u32 8388607, %v2207_v63 }
 0x1f2   : > { %v4872_v42 = vpop.eup %4871  ;;  %v1995_v54 = vxor.u32 2147483648, %v4870_v56  ;;  %v2079_v18 = vand.u32 2147483647, %v2078_v53  ;;  %v2163_v37 = vadd.s32 %v2162_v52, %v2158_v32  ;;  %v2219_v16 = vsel %vm2218_vm6, %v2217_v22, 0 }
 0x1f3   : > { %v1992_v3 = vxor.u32 2147483648, %v4872_v42  ;;  %v2221_v39 = vand.u32 31, %v2219_v16  ;;  %v2311_v30 = vand.u32 2147483647, %v6774_v15  ;;  %v6795_v6 = vand.u32 3, %v2092_v17 }
 0x1f4   : > { %v1996_v58 = vsel %vm1994_vm4, %v1995_v54, %v4872_v42  ;;  %v2082_v0 = vmul.f32 %v2081_v55, %v2079_v18  ;;  %v2164_v19 = vadd.s32 536870912, %v2163_v37  ;;  %v6799_v40 = vshrl.u32 %v2219_v16, 5 }
 0x1f5   : > { %v1993_v61 = vsel %vm1991_vm3, %v4870_v56, %v1992_v3  ;;  %v2222_v59 = vsub.s32 32, %v2221_v39  ;;  %v2314_v45 = vand.u32 2139095040, %v6774_v15  ;;  %v2224_v24 = vshll.u32 %v5057_v25, %v2221_v39 }
 0x1f6   : > { %v1997_v26 = vsel %vm1990_vm0, %v1993_v61, %v1996_v58  ;;  %v2083_v2 = vxor.u32 2147483648, %v2082_v0  ;;  %v6804_v20 = vshrl.u32 %v2164_v19, 30  ;;  %v2227_v5 = vshll.u32 %v5058_v27, %v2221_v39 }
 0x1f7   : > { %v1998_v50 = vsel %vm1987_vm14, nan, %v1997_v26  ;;  %v2225_v44 = vshrl.u32 %v5058_v27, %v2222_v59  ;;  %v2228_v46 = vshrl.u32 %v8584_v41, %v2222_v59  ;;  %v2230_v62 = vshll.u32 %v8584_v41, %v2221_v39 }
 0x1f8   : > { %v2084_v32 = vsel %vm2001_vm9, %v2083_v2, %v2082_v0  ;;  %v2166_v57 = vshll.u32 %v6804_v20, 30  ;;  %v2231_v22 = vshrl.u32 %v8556_v36, %v2222_v59  ;;  %2937 = vst [vmem:[%s5207_s16 + $0x70] sm:$0xff] %v1998_v50  ;;  %v2215_v53 = vor.u32 8388608, %v2214_v49 }
 0x1f9   : > { %v2087_v35 = vsel %vm6739_vm10, %v6481_v23, %v2084_v32  ;;  %v2233_v55 = vshll.u32 %v8556_v36, %v2221_v39  ;;  %v2315_v17 = vshrl.u32 %v2314_v45, 23  ;;  %v2223_v52 = vshrl.u32 %v5057_v25, %v2222_v59 }
 0x1fa   : > { %4873 = vcosq.f32 %v2087_v35  ;;  %v6822_v56 = vsub.s32 %v2163_v37, %v2166_v57  ;;  %v2226_v42 = vor.u32 %v2225_v44, %v2224_v24  ;;  %v2229_v54 = vor.u32 %v2228_v46, %v2227_v5 }
 0x1fb   : > { %4875 = vsinq.f32 %v2087_v35  ;;  %v2234_v18 = vshrl.u32 %v5061_v38, %v2222_v59  ;;  %v2236_v16 = vshll.u32 %v5061_v38, %v2221_v39  ;;  %v2232_v60 = vor.u32 %v2231_v22, %v2230_v62 }
 0x1fc   : > { %v2169_v3 = vsub.s32 0, %v6822_v56  ;;  %v2237_v49 = vshrl.u32 %v5062_v51, %v2222_v59  ;;  %vm2239_vm5 = vcmp.lt.s32.totalorder %v6799_v40, 1  ;;  %vm2095_vm7 = vcmp.eq.s32.totalorder %v6795_v6, 0 }
 0x1fd   : > { %vm2098_vm8 = vcmp.eq.s32.totalorder %v6795_v6, 2  ;;  %v2235_v37 = vor.u32 %v2234_v18, %v2233_v55  ;;  %vm2242_vm9 = vcmp.lt.s32.totalorder %v6799_v40, 4  ;;  %v4527_v58 = vadd.s32 4294967169, %v2315_v17 }
 0x1fe   : > { %vm2094_vm10 = vcmp.lt.s32.totalorder %v6795_v6, 2  ;;  %v4520_v0 = vmin.u32 %v2169_v3, %v6822_v56  ;;  %v2238_v39 = vor.u32 %v2237_v49, %v2236_v16  ;;  %vm2241_vm11 = vcmp.lt.s32.totalorder %v6799_v40, 3 }
 0x1ff   : > { %v2255_v19 = vshll.u32 %v2215_v53, 8  ;;  %vm2091_vm12 = vweird.f32 %v6481_v23  ;;  %vm2105_vm15 = vcmp.lt.s32.totalorder %v6515_v47, 0  ;;  %vm2240_vm13 = vcmp.lt.s32.totalorder %v6799_v40, 2 }
 0x200   : > { %v2244_v61 = vsel %vm2242_vm9, %v2232_v60, 2102212464  ;;  %v2247_v59 = vsel %vm2239_vm5, %v2226_v42, %v2229_v54  ;;  %v2248_v45 = vsel %vm2242_vm9, %v2235_v37, 920167782  ;;  %v2159_v26 = vadd.s32 %v6764_v33, %v6770_v13 }
 0x201   : > { %v2171_v2 = vclz %v4520_v0  ;;  %v2243_v24 = vsel %vm2239_vm5, %v2223_v52, %v2226_v42  ;;  %v2251_v50 = vsel %vm2239_vm5, %v2229_v54, %v2232_v60  ;;  %v2245_v44 = vsel %vm2241_vm11, %v2229_v54, %v2244_v61 }
 0x202   : > { %v2249_v5 = vsel %vm2241_vm11, %v2232_v60, %v2248_v45  ;;  %v2252_v46 = vsel %vm2242_vm9, %v2238_v39, 1326507024  ;;  %v2321_v32 = vadd.s32 1, %v4527_v58  ;;  %v2189_v33 = vsub.s32 4, %v6804_v20 }
 0x203   : > { %v4521_v57 = vadd.s32 4294967294, %v2171_v2  ;;  %v2250_v13 = vsel %vm2240_vm13, %v2247_v59, %v2249_v5  ;;  %v2253_v62 = vsel %vm2241_vm11, %v2235_v37, %v2252_v46  ;;  %v2246_v22 = vsel %vm2240_vm13, %v2243_v24, %v2245_v44 }
 0x204   : > { %v2254_v35 = vsel %vm2240_vm13, %v2251_v50, %v2253_v62  ;;  %v6866_v53 = vmul.u32.u64.low %v2255_v19, %v2250_v13  ;;  %v6867_v55 = vmul.u32.u64.high %v2255_v19, %v2250_v13, %v6866_v53  ;;  %v4874_v17 = vpop.eup %4873  ;;  %vm2322_vm14 = vcmp.gt.s32.totalorder %v2321_v32, 0 }
 0x205   : > { %vm4522_vm2 = vcmp.lt.s32.totalorder %v4521_v57, 0  ;;  %v6870_v52 = vmul.u32.u64.low %v2255_v19, %v2254_v35  ;;  %v6871_v42 = vmul.u32.u64.high %v2255_v19, %v2254_v35, %v6870_v52  ;;  %v4876_v54 = vpop.eup %4875  ;;  %v2099_v18 = vxor.u32 2147483648, %v4874_v17 }
 0x206   : > { %v2174_v16 = vsel %vm4522_vm2, 0, %v4521_v57  ;;  %v6875_v3 = vand.u32 8388607, %v2311_v30  ;;  %v2323_v60 = vsel %vm2322_vm14, %v2321_v32, 0  ;;  %v2096_v40 = vxor.u32 2147483648, %v4876_v54 }
 0x207   : > { %v2175_v49 = vsub.s32 32, %v2174_v16  ;;  %v2176_v37 = vshll.u32 %v6822_v56, %v2174_v16  ;;  %v2179_v58 = vsub.s32 4294967266, %v2174_v16  ;;  %v2100_v0 = vsel %vm2098_vm8, %v2099_v18, %v4876_v54 }
 0x208   : > { %vm6882_vm0 = vcmp.le.f32.partialorder %v2103_v14, 0.7853982  ;;  %v2262_v61 = vmul.u32 %v2255_v19, %v2246_v22  ;;  %v2265_v59 = vadd.s32 1, %v6867_v55  ;;  %v2325_v45 = vand.u32 31, %v2323_v60 }
 0x209   : > { %v2097_v2 = vsel %vm2095_vm7, %v4874_v17, %v2096_v40  ;;  %v2177_v24 = vshrl.u32 %v2159_v26, %v2175_v49  ;;  %v2180_v56 = vadd.s32 127, %v2179_v58  ;;  %v2190_v50 = vsel %vm2105_vm15, %v2189_v33, %v6804_v20 }
 0x20a   : > { %v2101_v14 = vsel %vm2094_vm10, %v2097_v2, %v2100_v0  ;;  %vm2264_vm1 = vc.u32 %v6871_v42, %v6866_v53  ;;  %v2326_v19 = vsub.s32 32, %v2325_v45  ;;  %v2328_v44 = vshll.u32 %v5057_v25, %v2325_v45 }
 0x20b   : > { %v2102_v5 = vsel %vm2091_vm12, nan, %v2101_v14  ;;  %v2178_v46 = vor.u32 %v2177_v24, %v2176_v37  ;;  %v2181_v32 = vshll.u32 %v2180_v56, 23  ;;  %v2266_v26 = vsel %vm2264_vm1, %v2265_v59, %v6867_v55 }
 0x20c   : > { %v2267_v57 = vadd.s32 %v2266_v26, %v2262_v61  ;;  %v2324_v13 = vshrl.u32 %v2323_v60, 5  ;;  %v2329_v20 = vshrl.u32 %v5058_v27, %v2326_v19  ;;  %v2331_v6 = vshll.u32 %v5058_v27, %v2325_v45  ;;  %2938 = vst [vmem:[%s5207_s16 + $0x78] sm:$0xff] %v2102_v5 }
 0x20d   : > { %v2182_v33 = vor.u32 4788187, %v2181_v32  ;;  %v2185_v62 = vcvt.s32.f32 %v2178_v46  ;;  %v2332_v22 = vshrl.u32 %v8584_v41, %v2326_v19  ;;  %v2334_v35 = vshll.u32 %v8584_v41, %v2325_v45 }
 0x20e   : > { %v2268_v17 = vadd.s32 536870912, %v2267_v57  ;;  %v2330_v23 = vor.u32 %v2329_v20, %v2328_v44  ;;  %v2335_v52 = vshrl.u32 %v8556_v36, %v2326_v19  ;;  %v2337_v54 = vshll.u32 %v8556_v36, %v2325_v45 }
 0x20f   : > { %v2183_v55 = vand.u32 2147483647, %v2182_v33  ;;  %v2333_v18 = vor.u32 %v2332_v22, %v2331_v6  ;;  %v2338_v16 = vshrl.u32 %v5061_v38, %v2326_v19  ;;  %v2340_v60 = vshll.u32 %v5061_v38, %v2325_v45 }
 0x210   : > { %v2269_v40 = vshrl.u32 %v2268_v17, 30  ;;  %v2319_v49 = vor.u32 8388608, %v6875_v3  ;;  %v2341_v37 = vshrl.u32 %v5062_v51, %v2326_v19  ;;  %vm2343_vm3 = vcmp.lt.s32.totalorder %v2324_v13, 1 }
 0x211   : > { %v2186_v58 = vmul.f32 %v2185_v62, %v2183_v55  ;;  %v2192_v0 = vsel %vm6882_vm0, 0, %v2190_v50  ;;  %v2336_v61 = vor.u32 %v2335_v52, %v2334_v35  ;;  %v2339_v59 = vor.u32 %v2338_v16, %v2337_v54 }
 0x212   : > { %v2270_v2 = vshll.u32 %v2269_v40, 30  ;;  %v2327_v24 = vshrl.u32 %v5057_v25, %v2326_v19  ;;  %vm2345_vm4 = vcmp.lt.s32.totalorder %v2324_v13, 3  ;;  %vm2346_vm6 = vcmp.lt.s32.totalorder %v2324_v13, 4 }
 0x213   : > { %v2187_v56 = vxor.u32 2147483648, %v2186_v58  ;;  %v2342_v14 = vor.u32 %v2341_v37, %v2340_v60  ;;  %vm2344_vm5 = vcmp.lt.s32.totalorder %v2324_v13, 2  ;;  %v2351_v45 = vsel %vm2343_vm3, %v2330_v23, %v2333_v18 }
 0x214   : > { %v2196_v3 = vadd.s32 3, %v2192_v0  ;;  %v6915_v44 = vsub.s32 %v2267_v57, %v2270_v2  ;;  %v2348_v5 = vsel %vm2346_vm6, %v2336_v61, 2102212464  ;;  %v2352_v46 = vsel %vm2346_vm6, %v2339_v59, 920167782 }
 0x215   : > { %v2188_v50 = vsel %vm2105_vm15, %v2187_v56, %v2186_v58  ;;  %v2293_v32 = vsub.s32 4, %v2269_v40  ;;  %v2353_v19 = vsel %vm2345_vm4, %v2336_v61, %v2352_v46  ;;  %v2359_v26 = vshll.u32 %v2319_v49, 8 }
 0x216   : > { %v2191_v20 = vsel %vm6882_vm0, %v6515_v47, %v2188_v50  ;;  %v2273_v6 = vsub.s32 0, %v6915_v44  ;;  %v2347_v57 = vsel %vm2343_vm3, %v2327_v24, %v2330_v23  ;;  %v2354_v33 = vsel %vm2344_vm5, %v2351_v45, %v2353_v19 }
 0x217   : > { %4877 = vcosq.f32 %v2191_v20  ;;  %v2349_v62 = vsel %vm2345_vm4, %v2333_v18, %v2348_v5  ;;  %v2355_v22 = vsel %vm2343_vm3, %v2333_v18, %v2336_v61  ;;  %v2356_v35 = vsel %vm2346_vm6, %v2342_v14, 1326507024 }
 0x218   : > { %4879 = vsinq.f32 %v2191_v20  ;;  %v2197_v17 = vand.u32 3, %v2196_v3  ;;  %v4524_v52 = vmin.u32 %v2273_v6, %v6915_v44  ;;  %v2357_v39 = vsel %vm2345_vm4, %v2339_v59, %v2356_v35 }
 0x219   : > { %v6935_v54 = vadd.f32 %v6703_v21, %v5240_v34  ;;  %v2358_v23 = vsel %vm2344_vm5, %v2355_v22, %v2357_v39  ;;  %v6938_v55 = vmul.u32.u64.low %v2359_v26, %v2354_v33  ;;  %v6939_v16 = vmul.u32.u64.high %v2359_v26, %v2354_v33, %v6938_v55 }
 0x21a   : > { %vm2209_vm7 = vcmp.lt.s32.totalorder %v6671_v43, 0  ;;  %v2275_v18 = vclz %v4524_v52  ;;  %v2350_v60 = vsel %vm2344_vm5, %v2347_v57, %v2349_v62  ;;  %v2415_v49 = vand.u32 2147483647, %v6778_v4 }
 0x21b   : > { %v2294_v37 = vsel %vm2209_vm7, %v2293_v32, %v2269_v40  ;;  %v6946_v58 = vmul.u32.u64.low %v2359_v26, %v2358_v23  ;;  %v6947_v0 = vmul.u32.u64.high %v2359_v26, %v2358_v23, %v6946_v58  ;;  %v2418_v21 = vand.u32 2139095040, %v6778_v4 }
 0x21c   : > { %vm2195_vm8 = vweird.f32 %v6515_v47  ;;  %vm2198_vm9 = vcmp.lt.s32.totalorder %v2197_v17, 2  ;;  %vm6953_vm10 = vcmp.le.f32.partialorder %v2207_v63, 0.7853982  ;;  %v4525_v13 = vadd.s32 4294967294, %v2275_v18 }
 0x21d   : > { %vm2199_vm11 = vcmp.eq.s32.totalorder %v2197_v17, 0  ;;  %v2366_v59 = vmul.u32 %v2359_v26, %v2350_v60  ;;  %v2369_v2 = vadd.s32 1, %v6939_v16  ;;  %v2419_v40 = vshrl.u32 %v2418_v21, 23 }
 0x21e   : > { %v2263_v24 = vadd.s32 %v6866_v53, %v6871_v42  ;;  %vm4526_vm12 = vcmp.lt.s32.totalorder %v4525_v13, 0  ;;  %v2296_v56 = vsel %vm6953_vm10, 0, %v2294_v37  ;;  %v2422_v14 = vand.u32 8388607, %v2415_v49 }
 0x21f   : > { %v2278_v63 = vsel %vm4526_vm12, 0, %v4525_v13  ;;  %vm2368_vm15 = vc.u32 %v6947_v0, %v6938_v55  ;;  %v4531_v45 = vadd.s32 4294967169, %v2419_v40  ;;  %v2522_v3 = vand.u32 2139095040, %v6935_v54 }
 0x220   : > { %v2279_v5 = vsub.s32 32, %v2278_v63  ;;  %v2280_v46 = vshll.u32 %v6915_v44, %v2278_v63  ;;  %v2283_v50 = vsub.s32 4294967266, %v2278_v63  ;;  %v2370_v32 = vsel %vm2368_vm15, %v2369_v2, %v6939_v16 }
 0x221   : > { %v4878_v53 = vpop.eup %4877  ;;  %vm2202_vm13 = vcmp.eq.s32.totalorder %v2197_v17, 2  ;;  %v2300_v42 = vadd.s32 3, %v2296_v56  ;;  %v2371_v19 = vadd.s32 %v2370_v32, %v2366_v59  ;;  %v2425_v26 = vadd.s32 1, %v4531_v45 }
 0x222   : > { %v4880_v20 = vpop.eup %4879  ;;  %v2203_v6 = vxor.u32 2147483648, %v4878_v53  ;;  %v2281_v57 = vshrl.u32 %v2263_v24, %v2279_v5  ;;  %v2284_v33 = vadd.s32 127, %v2283_v50  ;;  %v2423_v62 = vor.u32 8388608, %v2422_v14 }
 0x223   : > { %v2200_v22 = vxor.u32 2147483648, %v4880_v20  ;;  %v2372_v35 = vadd.s32 536870912, %v2371_v19  ;;  %vm2426_vm2 = vcmp.gt.s32.totalorder %v2425_v26, 0  ;;  %v2523_v52 = vshrl.u32 %v2522_v3, 23 }
 0x224   : > { %v2204_v39 = vsel %vm2202_vm13, %v2203_v6, %v4880_v20  ;;  %v2282_v23 = vor.u32 %v2281_v57, %v2280_v46  ;;  %v2285_v44 = vshll.u32 %v2284_v33, 23  ;;  %v2427_v18 = vsel %vm2426_vm2, %v2425_v26, 0 }
 0x225   : > { %v6970_v16 = vadd.f32 %v6707_v29, %v5240_v34  ;;  %v2201_v60 = vsel %vm2199_vm11, %v4878_v53, %v2200_v22  ;;  %v2373_v37 = vshrl.u32 %v2372_v35, 30  ;;  %v2429_v58 = vand.u32 31, %v2427_v18 }
 0x226   : > { %v2205_v21 = vsel %vm2198_vm9, %v2201_v60, %v2204_v39  ;;  %v2286_v13 = vor.u32 4788187, %v2285_v44  ;;  %v2289_v59 = vcvt.s32.f32 %v2282_v23  ;;  %v6974_v2 = vand.u32 3, %v2300_v42 }
 0x227   : > { %vm2313_vm14 = vcmp.lt.s32.totalorder %v6774_v15, 0  ;;  %v2206_v40 = vsel %vm2195_vm8, nan, %v2205_v21  ;;  %v2374_v24 = vshll.u32 %v2373_v37, 30  ;;  %v2430_v56 = vsub.s32 32, %v2429_v58 }
 0x228   : > { %v2519_v29 = vand.u32 2147483647, %v6935_v54  ;;  %v2287_v14 = vand.u32 2147483647, %v2286_v13  ;;  %v2367_v63 = vadd.s32 %v6938_v55, %v6947_v0  ;;  %v6981_v45 = vshll.u32 %v2423_v62, 8  ;;  %2939 = vst [vmem:[%s5207_s16 + $0x80] sm:$0xff] %v2206_v40 }
 0x229   : > { %v4535_v17 = vadd.s32 4294967169, %v2523_v52  ;;  %v6984_v3 = vsub.s32 %v2371_v19, %v2374_v24  ;;  %v2432_v5 = vshll.u32 %v5057_v25, %v2429_v58  ;;  %v2433_v46 = vshrl.u32 %v5058_v27, %v2430_v56 }
 0x22a   : > { %v2435_v47 = vshll.u32 %v5058_v27, %v2429_v58  ;;  %v2290_v50 = vmul.f32 %v2289_v59, %v2287_v14  ;;  %v2436_v32 = vshrl.u32 %v8584_v41, %v2430_v56  ;;  %v2438_v53 = vshll.u32 %v8584_v41, %v2429_v58 }
 0x22b   : > { %v2439_v42 = vshrl.u32 %v8556_v36, %v2430_v56  ;;  %v2377_v55 = vsub.s32 0, %v6984_v3  ;;  %v2397_v0 = vsub.s32 4, %v2373_v37  ;;  %v2428_v26 = vshrl.u32 %v2427_v18, 5 }
 0x22c   : > { %v2441_v19 = vshll.u32 %v8556_v36, %v2429_v58  ;;  %v2291_v20 = vxor.u32 2147483648, %v2290_v50  ;;  %v2431_v6 = vshrl.u32 %v5057_v25, %v2430_v56  ;;  %v2442_v57 = vshrl.u32 %v5061_v38, %v2430_v56 }
 0x22d   : > { %v2529_v33 = vadd.s32 1, %v4535_v17  ;;  %v4528_v62 = vmin.u32 %v2377_v55, %v6984_v3  ;;  %v2434_v22 = vor.u32 %v2433_v46, %v2432_v5  ;;  %v2444_v35 = vshll.u32 %v5061_v38, %v2429_v58 }
 0x22e   : > { %v2445_v52 = vshrl.u32 %v5062_v51, %v2430_v56  ;;  %v2292_v39 = vsel %vm2209_vm7, %v2291_v20, %v2290_v50  ;;  %v2437_v23 = vor.u32 %v2436_v32, %v2435_v47  ;;  %v2440_v44 = vor.u32 %v2439_v42, %v2438_v53 }
 0x22f   : > { %v2443_v18 = vor.u32 %v2442_v57, %v2441_v19  ;;  %v2295_v60 = vsel %vm6953_vm10, %v6671_v43, %v2292_v39  ;;  %v2379_v21 = vclz %v4528_v62  ;;  %v2398_v13 = vsel %vm2313_vm14, %v2397_v0, %v2373_v37 }
 0x230   : > { %vm2447_vm0 = vcmp.lt.s32.totalorder %v2428_v26, 1  ;;  %4881 = vcosq.f32 %v2295_v60  ;;  %v2446_v59 = vor.u32 %v2445_v52, %v2444_v35  ;;  %vm2448_vm1 = vcmp.lt.s32.totalorder %v2428_v26, 2 }
 0x231   : > { %vm2449_vm3 = vcmp.lt.s32.totalorder %v2428_v26, 3  ;;  %4883 = vsinq.f32 %v2295_v60  ;;  %v4529_v58 = vadd.s32 4294967294, %v2379_v21  ;;  %vm2450_vm4 = vcmp.lt.s32.totalorder %v2428_v26, 4 }
 0x232   : > { %v2451_v40 = vsel %vm2447_vm0, %v2431_v6, %v2434_v22  ;;  %v2452_v24 = vsel %vm2450_vm4, %v2440_v44, 2102212464  ;;  %v2455_v56 = vsel %vm2447_vm0, %v2434_v22, %v2437_v23  ;;  %v2456_v14 = vsel %vm2450_vm4, %v2443_v18, 920167782 }
 0x233   : > { %v2459_v17 = vsel %vm2447_vm0, %v2437_v23, %v2440_v44  ;;  %vm4530_vm6 = vcmp.lt.s32.totalorder %v4529_v58, 0  ;;  %v2453_v61 = vsel %vm2449_vm3, %v2437_v23, %v2452_v24  ;;  %v2457_v5 = vsel %vm2449_vm3, %v2440_v44, %v2456_v14 }
 0x234   : > { %v2460_v46 = vsel %vm2450_vm4, %v2446_v59, 1326507024  ;;  %v2382_v37 = vsel %vm4530_vm6, 0, %v4529_v58  ;;  %v2454_v47 = vsel %vm2448_vm1, %v2451_v40, %v2453_v61  ;;  %v2458_v50 = vsel %vm2448_vm1, %v2455_v56, %v2457_v5 }
 0x235   : > { %v2461_v32 = vsel %vm2449_vm3, %v2443_v18, %v2460_v46  ;;  %vm2299_vm5 = vweird.f32 %v6671_v43  ;;  %v2383_v53 = vsub.s32 32, %v2382_v37  ;;  %v2384_v42 = vshll.u32 %v6984_v3, %v2382_v37 }
 0x236   : > { %v2387_v55 = vsub.s32 4294967266, %v2382_v37  ;;  %v2462_v0 = vsel %vm2448_vm1, %v2459_v17, %v2461_v32  ;;  %v7019_v6 = vmul.u32.u64.low %v6981_v45, %v2458_v50  ;;  %v7020_v57 = vmul.u32.u64.high %v6981_v45, %v2458_v50, %v7019_v6 }
 0x237   : > { %v7015_v19 = vmul.u32.u64.low %v6981_v45, %v2462_v0  ;;  %v7016_v20 = vmul.u32.u64.high %v6981_v45, %v2462_v0, %v7015_v19  ;;  %vm7025_vm7 = vcmp.le.f32.partialorder %v2311_v30, 0.7853982  ;;  %v2385_v22 = vshrl.u32 %v2367_v63, %v2383_v53 }
 0x238   : > { %v2388_v3 = vadd.s32 127, %v2387_v55  ;;  %vm2530_vm8 = vcmp.gt.s32.totalorder %v2529_v33, 0  ;;  %vm2302_vm9 = vcmp.lt.s32.totalorder %v6974_v2, 2  ;;  %v2400_v26 = vsel %vm7025_vm7, 0, %v2398_v13 }
 0x239   : > { %v2526_v35 = vand.u32 8388607, %v2519_v29  ;;  %v2531_v52 = vsel %vm2530_vm8, %v2529_v33, 0  ;;  %v2386_v39 = vor.u32 %v2385_v22, %v2384_v42  ;;  %v2470_v44 = vmul.u32 %v6981_v45, %v2454_v47 }
 0x23a   : > { %v2389_v23 = vshll.u32 %v2388_v3, 23  ;;  %v2533_v30 = vand.u32 31, %v2531_v52  ;;  %v4882_v18 = vpop.eup %4881  ;;  %vm2303_vm10 = vcmp.eq.s32.totalorder %v6974_v2, 0  ;;  %vm2306_vm11 = vcmp.eq.s32.totalorder %v6974_v2, 2 }
 0x23b   : > { %vm2472_vm12 = vc.u32 %v7016_v20, %v7019_v6  ;;  %v2473_v63 = vadd.s32 1, %v7020_v57  ;;  %v4884_v60 = vpop.eup %4883  ;;  %v2307_v21 = vxor.u32 2147483648, %v4882_v18  ;;  %v2393_v59 = vcvt.s32.f32 %v2386_v39 }
 0x23c   : > { %v2390_v13 = vor.u32 4788187, %v2389_v23  ;;  %v2534_v33 = vsub.s32 32, %v2533_v30  ;;  %v2304_v58 = vxor.u32 2147483648, %v4884_v60  ;;  %v2404_v40 = vadd.s32 3, %v2400_v26 }
 0x23d   : > { %v2474_v45 = vsel %vm2472_vm12, %v2473_v63, %v7020_v57  ;;  %v2527_v24 = vor.u32 8388608, %v2526_v35  ;;  %v2308_v56 = vsel %vm2306_vm11, %v2307_v21, %v4884_v60  ;;  %v2536_v61 = vshll.u32 %v5057_v25, %v2533_v30 }
 0x23e   : > { %v2391_v14 = vand.u32 2147483647, %v2390_v13  ;;  %v2475_v17 = vadd.s32 %v2474_v45, %v2470_v44  ;;  %v2305_v5 = vsel %vm2303_vm10, %v4882_v18, %v2304_v58  ;;  %v2537_v46 = vshrl.u32 %v5058_v27, %v2534_v33 }
 0x23f   : > { %v2539_v37 = vshll.u32 %v5058_v27, %v2533_v30  ;;  %v2540_v47 = vshrl.u32 %v8584_v41, %v2534_v33  ;;  %v2309_v50 = vsel %vm2302_vm9, %v2305_v5, %v2308_v56  ;;  %v2532_v42 = vshrl.u32 %v2531_v52, 5 }
 0x240   : > { %v2394_v32 = vmul.f32 %v2393_v59, %v2391_v14  ;;  %v2476_v53 = vadd.s32 536870912, %v2475_v17  ;;  %v2310_v55 = vsel %vm2299_vm5, nan, %v2309_v50  ;;  %v2542_v0 = vshll.u32 %v8584_v41, %v2533_v30 }
 0x241   : > { %v2543_v19 = vshrl.u32 %v8556_v36, %v2534_v33  ;;  %v2545_v57 = vshll.u32 %v8556_v36, %v2533_v30  ;;  %v2535_v26 = vshrl.u32 %v5057_v25, %v2534_v33  ;;  %v2546_v35 = vshrl.u32 %v5061_v38, %v2534_v33  ;;  %2940 = vst [vmem:[%s5207_s16 + $0x88] sm:$0xff] %v2310_v55 }
 0x242   : > { %v2395_v22 = vxor.u32 2147483648, %v2394_v32  ;;  %v2477_v3 = vshrl.u32 %v2476_v53, 30  ;;  %v2538_v2 = vor.u32 %v2537_v46, %v2536_v61  ;;  %v2541_v39 = vor.u32 %v2540_v47, %v2539_v37 }
 0x243   : > { %v2548_v52 = vshll.u32 %v5061_v38, %v2533_v30  ;;  %v2549_v43 = vshrl.u32 %v5062_v51, %v2534_v33  ;;  %v2547_v18 = vor.u32 %v2546_v35, %v2545_v57  ;;  %vm2551_vm15 = vcmp.lt.s32.totalorder %v2532_v42, 1 }
 0x244   : > { %v2396_v23 = vsel %vm2313_vm14, %v2395_v22, %v2394_v32  ;;  %v2478_v44 = vshll.u32 %v2477_v3, 30  ;;  %v2544_v60 = vor.u32 %v2543_v19, %v2542_v0  ;;  %vm2554_vm13 = vcmp.lt.s32.totalorder %v2532_v42, 4 }
 0x245   : > { %v2399_v63 = vsel %vm7025_vm7, %v6774_v15, %v2396_v23  ;;  %v2550_v21 = vor.u32 %v2549_v43, %v2548_v52  ;;  %vm2553_vm2 = vcmp.lt.s32.totalorder %v2532_v42, 3  ;;  %v2567_v30 = vshll.u32 %v2527_v24, 8 }
 0x246   : > { %4885 = vcosq.f32 %v2399_v63  ;;  %v7064_v13 = vsub.s32 %v2475_v17, %v2478_v44  ;;  %vm2552_vm0 = vcmp.lt.s32.totalorder %v2532_v42, 2  ;;  %v2556_v59 = vsel %vm2554_vm13, %v2544_v60, 2102212464 }
 0x247   : > { %4887 = vsinq.f32 %v2399_v63  ;;  %v2559_v33 = vsel %vm2551_vm15, %v2538_v2, %v2541_v39  ;;  %v2405_v58 = vand.u32 3, %v2404_v40  ;;  %v2501_v56 = vsub.s32 4, %v2477_v3 }
 0x248   : > { %v2481_v45 = vsub.s32 0, %v7064_v13  ;;  %v2560_v62 = vsel %vm2554_vm13, %v2547_v18, 920167782  ;;  %v2555_v14 = vsel %vm2551_vm15, %v2535_v26, %v2538_v2  ;;  %v2563_v17 = vsel %vm2551_vm15, %v2541_v39, %v2544_v60 }
 0x249   : > { %v2561_v61 = vsel %vm2553_vm2, %v2544_v60, %v2560_v62  ;;  %v2564_v24 = vsel %vm2554_vm13, %v2550_v21, 1326507024  ;;  %v2557_v46 = vsel %vm2553_vm2, %v2541_v39, %v2556_v59  ;;  %v1674_v47 = vmul.f32 %v6302_v28, %v5232_v31 }
 0x24a   : > { %v4532_v5 = vmin.u32 %v2481_v45, %v7064_v13  ;;  %v2562_v37 = vsel %vm2552_vm0, %v2559_v33, %v2561_v61  ;;  %v2565_v40 = vsel %vm2553_vm2, %v2547_v18, %v2564_v24  ;;  %v7086_v55 = vadd.f32 %v6712_v48, %v5240_v34 }
 0x24b   : > { %v2566_v50 = vsel %vm2552_vm0, %v2563_v17, %v2565_v40  ;;  %v7081_v32 = vmul.u32.u64.low %v2567_v30, %v2562_v37  ;;  %v7082_v53 = vmul.u32.u64.high %v2567_v30, %v2562_v37, %v7081_v32  ;;  %vm2403_vm14 = vweird.f32 %v6774_v15 }
 0x24c   : > { %vm2417_vm1 = vcmp.lt.s32.totalorder %v6778_v4, 0  ;;  %v2483_v0 = vclz %v4532_v5  ;;  %v2558_v19 = vsel %vm2552_vm0, %v2555_v14, %v2557_v46  ;;  %v2626_v28 = vand.u32 2139095040, %v6970_v16 }
 0x24d   : > { %v7091_v57 = vmul.u32.u64.low %v2567_v30, %v2566_v50  ;;  %v7092_v22 = vmul.u32.u64.high %v2567_v30, %v2566_v50, %v7091_v57  ;;  %vm2406_vm3 = vcmp.lt.s32.totalorder %v2405_v58, 2  ;;  %vm7097_vm4 = vcmp.le.f32.partialorder %v2415_v49, 0.7853982 }
 0x24e   : > { %v4533_v48 = vadd.s32 4294967294, %v2483_v0  ;;  %v2502_v35 = vsel %vm2417_vm1, %v2501_v56, %v2477_v3  ;;  %vm2407_vm6 = vcmp.eq.s32.totalorder %v2405_v58, 0  ;;  %vm2410_vm5 = vcmp.eq.s32.totalorder %v2405_v58, 2 }
 0x24f   : > { %v2577_v42 = vadd.s32 1, %v7082_v53  ;;  %v2627_v2 = vshrl.u32 %v2626_v28, 23  ;;  %v2471_v52 = vadd.s32 %v7019_v6, %v7016_v20  ;;  %v2574_v43 = vmul.u32 %v2567_v30, %v2558_v19 }
 0x250   : > { %v4886_v39 = vpop.eup %4885  ;;  %vm4534_vm7 = vcmp.lt.s32.totalorder %v4533_v48, 0  ;;  %v2623_v49 = vand.u32 2147483647, %v6970_v16  ;;  %v2504_v63 = vsel %vm7097_vm4, 0, %v2502_v35  ;;  %vm2576_vm8 = vc.u32 %v7092_v22, %v7081_v32 }
 0x251   : > { %v4888_v23 = vpop.eup %4887  ;;  %v2411_v44 = vxor.u32 2147483648, %v4886_v39  ;;  %v2486_v18 = vsel %vm4534_vm7, 0, %v4533_v48  ;;  %v2578_v20 = vsel %vm2576_vm8, %v2577_v42, %v7082_v53  ;;  %v4539_v6 = vadd.s32 4294967169, %v2627_v2 }
 0x252   : > { %v2408_v3 = vxor.u32 2147483648, %v4888_v23  ;;  %v2487_v60 = vsub.s32 32, %v2486_v18  ;;  %v2488_v21 = vshll.u32 %v7064_v13, %v2486_v18  ;;  %v2491_v59 = vsub.s32 4294967266, %v2486_v18 }
 0x253   : > { %v2412_v33 = vsel %vm2410_vm5, %v2411_v44, %v4888_v23  ;;  %v2730_v30 = vand.u32 2139095040, %v7086_v55  ;;  %v2579_v14 = vadd.s32 %v2578_v20, %v2574_v43  ;;  %v2508_v17 = vadd.s32 3, %v2504_v63 }
 0x254   : > { %v2409_v45 = vsel %vm2407_vm6, %v4886_v39, %v2408_v3  ;;  %v2489_v56 = vshrl.u32 %v2471_v52, %v2487_v60  ;;  %v2492_v62 = vadd.s32 127, %v2491_v59  ;;  %v2630_v13 = vand.u32 8388607, %v2623_v49 }
 0x255   : > { %v2413_v61 = vsel %vm2406_vm3, %v2409_v45, %v2412_v33  ;;  %v2633_v24 = vadd.s32 1, %v4539_v6  ;;  %v2580_v40 = vadd.s32 536870912, %v2579_v14  ;;  %v2727_v50 = vand.u32 2147483647, %v7086_v55 }
 0x256   : > { %v2414_v5 = vsel %vm2403_vm14, nan, %v2413_v61  ;;  %v2490_v46 = vor.u32 %v2489_v56, %v2488_v21  ;;  %v2493_v37 = vshll.u32 %v2492_v62, 23  ;;  %v2731_v53 = vshrl.u32 %v2730_v30, 23 }
 0x257   : > { %vm2634_vm9 = vcmp.gt.s32.totalorder %v2633_v24, 0  ;;  %2941 = vst [vmem:[%s5207_s16 + $0x90] sm:$0xff] %v2414_v5  ;;  %v7122_v58 = vshrl.u32 %v2580_v40, 30  ;;  %v7125_v28 = vadd.f32 %v1674_v47, %v5240_v34  ;;  %v7127_v15 = vand.u32 3, %v2508_v17 }
 0x258   : > { %v2494_v0 = vor.u32 4788187, %v2493_v37  ;;  %v2497_v19 = vcvt.s32.f32 %v2490_v46  ;;  %v2635_v57 = vsel %vm2634_vm9, %v2633_v24, 0  ;;  %v2631_v2 = vor.u32 8388608, %v2630_v13 }
 0x259   : > { %v2637_v48 = vand.u32 31, %v2635_v57  ;;  %v2582_v42 = vshll.u32 %v7122_v58, 30  ;;  %v2575_v39 = vadd.s32 %v7081_v32, %v7092_v22  ;;  %v4543_v43 = vadd.s32 4294967169, %v2731_v53 }
 0x25a   : > { %v2495_v35 = vand.u32 2147483647, %v2494_v0  ;;  %v7133_v23 = vand.u32 8388607, %v2727_v50  ;;  %v2636_v33 = vshrl.u32 %v2635_v57, 5  ;;  %v7148_v56 = vshll.u32 %v2631_v2, 8 }
 0x25b   : > { %v2638_v52 = vsub.s32 32, %v2637_v48  ;;  %v7135_v18 = vsub.s32 %v2579_v14, %v2582_v42  ;;  %v2640_v47 = vshll.u32 %v5057_v25, %v2637_v48  ;;  %v2643_v63 = vshll.u32 %v5058_v27, %v2637_v48 }
 0x25c   : > { %v2498_v44 = vmul.f32 %v2497_v19, %v2495_v35  ;;  %v2646_v21 = vshll.u32 %v8584_v41, %v2637_v48  ;;  %v2649_v32 = vshll.u32 %v8556_v36, %v2637_v48  ;;  %v2652_v45 = vshll.u32 %v5061_v38, %v2637_v48 }
 0x25d   : > { %v2641_v3 = vshrl.u32 %v5058_v27, %v2638_v52  ;;  %v2644_v60 = vshrl.u32 %v8584_v41, %v2638_v52  ;;  %v2585_v59 = vsub.s32 0, %v7135_v18  ;;  %v2647_v20 = vshrl.u32 %v8556_v36, %v2638_v52 }
 0x25e   : > { %v2499_v22 = vxor.u32 2147483648, %v2498_v44  ;;  %v2639_v6 = vshrl.u32 %v5057_v25, %v2638_v52  ;;  %v2650_v30 = vshrl.u32 %v5061_v38, %v2638_v52  ;;  %v2653_v46 = vshrl.u32 %v5062_v51, %v2638_v52 }
 0x25f   : > { %v4536_v14 = vmin.u32 %v2585_v59, %v7135_v18  ;;  %v2642_v61 = vor.u32 %v2641_v3, %v2640_v47  ;;  %v2645_v17 = vor.u32 %v2644_v60, %v2643_v63  ;;  %v2648_v24 = vor.u32 %v2647_v20, %v2646_v21 }
 0x260   : > { %v2500_v62 = vsel %vm2417_vm1, %v2499_v22, %v2498_v44  ;;  %v2651_v5 = vor.u32 %v2650_v30, %v2649_v32  ;;  %vm2521_vm10 = vcmp.lt.s32.totalorder %v6935_v54, 0  ;;  %vm2655_vm11 = vcmp.lt.s32.totalorder %v2636_v33, 1 }
 0x261   : > { %v2503_v13 = vsel %vm7097_vm4, %v6778_v4, %v2500_v62  ;;  %v2587_v37 = vclz %v4536_v14  ;;  %v2737_v40 = vadd.s32 1, %v4543_v43  ;;  %v2605_v53 = vsub.s32 4, %v7122_v58 }
 0x262   : > { %4889 = vcosq.f32 %v2503_v13  ;;  %v2654_v0 = vor.u32 %v2653_v46, %v2652_v45  ;;  %vm2656_vm12 = vcmp.lt.s32.totalorder %v2636_v33, 2  ;;  %vm2657_vm15 = vcmp.lt.s32.totalorder %v2636_v33, 3 }
 0x263   : > { %4891 = vsinq.f32 %v2503_v13  ;;  %v4537_v19 = vadd.s32 4294967294, %v2587_v37  ;;  %vm2658_vm13 = vcmp.lt.s32.totalorder %v2636_v33, 4  ;;  %v2659_v26 = vsel %vm2655_vm11, %v2639_v6, %v2642_v61 }
 0x264   : > { %v2660_v57 = vsel %vm2658_vm13, %v2648_v24, 2102212464  ;;  %v2663_v48 = vsel %vm2655_vm11, %v2642_v61, %v2645_v17  ;;  %v2664_v35 = vsel %vm2658_vm13, %v2651_v5, 920167782  ;;  %v2667_v42 = vsel %vm2655_vm11, %v2645_v17, %v2648_v24 }
 0x265   : > { %vm7161_vm2 = vcmp.le.f32.partialorder %v2519_v29, 0.7853982  ;;  %vm4538_vm0 = vcmp.lt.s32.totalorder %v4537_v19, 0  ;;  %v2661_v52 = vsel %vm2657_vm15, %v2645_v17, %v2660_v57  ;;  %v2665_v43 = vsel %vm2657_vm15, %v2648_v24, %v2664_v35 }
 0x266   : > { %v2668_v44 = vsel %vm2658_vm13, %v2654_v0, 1326507024  ;;  %vm2507_vm14 = vweird.f32 %v6778_v4  ;;  %v2590_v47 = vsel %vm4538_vm0, 0, %v4537_v19  ;;  %v2662_v63 = vsel %vm2656_vm12, %v2659_v26, %v2661_v52 }
 0x267   : > { %v2666_v3 = vsel %vm2656_vm12, %v2663_v48, %v2665_v43  ;;  %v2669_v60 = vsel %vm2657_vm15, %v2651_v5, %v2668_v44  ;;  %v2591_v21 = vsub.s32 32, %v2590_v47  ;;  %v2592_v29 = vshll.u32 %v7135_v18, %v2590_v47 }
 0x268   : > { %v2595_v32 = vsub.s32 4294967266, %v2590_v47  ;;  %v2670_v22 = vsel %vm2656_vm12, %v2667_v42, %v2669_v60  ;;  %v7178_v6 = vmul.u32.u64.low %v7148_v56, %v2666_v3  ;;  %v7179_v30 = vmul.u32.u64.high %v7148_v56, %v2666_v3, %v7178_v6 }
 0x269   : > { %v7174_v59 = vmul.u32.u64.low %v7148_v56, %v2670_v22  ;;  %v7175_v20 = vmul.u32.u64.high %v7148_v56, %v2670_v22, %v7174_v59  ;;  %vm2510_vm1 = vcmp.lt.s32.totalorder %v7127_v15, 2  ;;  %v2593_v45 = vshrl.u32 %v2575_v39, %v2591_v21 }
 0x26a   : > { %v2596_v62 = vadd.s32 127, %v2595_v32  ;;  %vm2738_vm3 = vcmp.gt.s32.totalorder %v2737_v40, 0  ;;  %vm2514_vm4 = vcmp.eq.s32.totalorder %v7127_v15, 2  ;;  %v2606_v18 = vsel %vm2521_vm10, %v2605_v53, %v7122_v58 }
 0x26b   : > { %v2735_v33 = vor.u32 8388608, %v7133_v23  ;;  %v2739_v14 = vsel %vm2738_vm3, %v2737_v40, 0  ;;  %v2594_v17 = vor.u32 %v2593_v45, %v2592_v29  ;;  %v2678_v24 = vmul.u32 %v7148_v56, %v2662_v63 }
 0x26c   : > { %v4890_v61 = vpop.eup %4889  ;;  %v2597_v13 = vshll.u32 %v2596_v62, 23  ;;  %v2741_v5 = vand.u32 31, %v2739_v14  ;;  %vm2511_vm6 = vcmp.eq.s32.totalorder %v7127_v15, 0  ;;  %vm2680_vm5 = vc.u32 %v7175_v20, %v7178_v6 }
 0x26d   : > { %v4892_v46 = vpop.eup %4891  ;;  %v2515_v39 = vxor.u32 2147483648, %v4890_v61  ;;  %v2681_v37 = vadd.s32 1, %v7179_v30  ;;  %v2601_v53 = vcvt.s32.f32 %v2594_v17  ;;  %v2608_v56 = vsel %vm7161_vm2, 0, %v2606_v18 }
 0x26e   : > { %v2512_v0 = vxor.u32 2147483648, %v4892_v46  ;;  %v2598_v58 = vor.u32 4788187, %v2597_v13  ;;  %v2742_v23 = vsub.s32 32, %v2741_v5  ;;  %v7198_v26 = vshll.u32 %v2735_v33, 8 }
 0x26f   : > { %v2516_v40 = vsel %vm2514_vm4, %v2515_v39, %v4892_v46  ;;  %v2682_v19 = vsel %vm2680_vm5, %v2681_v37, %v7179_v30  ;;  %v2744_v42 = vshll.u32 %v5057_v25, %v2741_v5  ;;  %v2747_v44 = vshll.u32 %v5058_v27, %v2741_v5 }
 0x270   : > { %v2513_v57 = vsel %vm2511_vm6, %v4890_v61, %v2512_v0  ;;  %v2599_v48 = vand.u32 2147483647, %v2598_v58  ;;  %v2683_v35 = vadd.s32 %v2682_v19, %v2678_v24  ;;  %v2745_v43 = vshrl.u32 %v5058_v27, %v2742_v23 }
 0x271   : > { %v2517_v52 = vsel %vm2510_vm1, %v2513_v57, %v2516_v40  ;;  %v2748_v47 = vshrl.u32 %v8584_v41, %v2742_v23  ;;  %v2740_v21 = vshrl.u32 %v2739_v14, 5  ;;  %v2750_v29 = vshll.u32 %v8584_v41, %v2741_v5 }
 0x272   : > { %v2518_v63 = vsel %vm2507_vm14, nan, %v2517_v52  ;;  %v2602_v3 = vmul.f32 %v2601_v53, %v2599_v48  ;;  %v2684_v60 = vadd.s32 536870912, %v2683_v35  ;;  %v2751_v32 = vshrl.u32 %v8556_v36, %v2742_v23 }
 0x273   : > { %v2753_v22 = vshll.u32 %v8556_v36, %v2741_v5  ;;  %v2754_v15 = vshrl.u32 %v5061_v38, %v2742_v23  ;;  %2942 = vst [vmem:[%s5207_s16 + $0x98] sm:$0xff] %v2518_v63  ;;  %v2612_v30 = vadd.s32 3, %v2608_v56  ;;  %v2756_v62 = vshll.u32 %v5061_v38, %v2741_v5 }
 0x274   : > { %v2603_v59 = vxor.u32 2147483648, %v2602_v3  ;;  %v2685_v45 = vshrl.u32 %v2684_v60, 30  ;;  %v2743_v4 = vshrl.u32 %v5057_v25, %v2742_v23  ;;  %v2746_v18 = vor.u32 %v2745_v43, %v2744_v42 }
 0x275   : > { %v2749_v33 = vor.u32 %v2748_v47, %v2747_v44  ;;  %v2757_v14 = vshrl.u32 %v5062_v51, %v2742_v23  ;;  %v2755_v13 = vor.u32 %v2754_v15, %v2753_v22  ;;  %vm2759_vm7 = vcmp.lt.s32.totalorder %v2740_v21, 1 }
 0x276   : > { %v2604_v61 = vsel %vm2521_vm10, %v2603_v59, %v2602_v3  ;;  %v2686_v17 = vshll.u32 %v2685_v45, 30  ;;  %v2752_v46 = vor.u32 %v2751_v32, %v2750_v29  ;;  %vm2762_vm8 = vcmp.lt.s32.totalorder %v2740_v21, 4 }
 0x277   : > { %v2607_v24 = vsel %vm7161_vm2, %v6935_v54, %v2604_v61  ;;  %v2758_v39 = vor.u32 %v2757_v14, %v2756_v62  ;;  %vm2761_vm9 = vcmp.lt.s32.totalorder %v2740_v21, 3  ;;  %v2834_v37 = vand.u32 2139095040, %v7125_v28 }
 0x278   : > { %4893 = vcosq.f32 %v2607_v24  ;;  %v7221_v5 = vsub.s32 %v2683_v35, %v2686_v17  ;;  %vm2760_vm11 = vcmp.lt.s32.totalorder %v2740_v21, 2  ;;  %v2764_v0 = vsel %vm2762_vm8, %v2752_v46, 2102212464 }
 0x279   : > { %4895 = vsinq.f32 %v2607_v24  ;;  %v2767_v58 = vsel %vm2759_vm7, %v2746_v18, %v2749_v33  ;;  %v2613_v53 = vand.u32 3, %v2612_v30  ;;  %v2768_v40 = vsel %vm2762_vm8, %v2755_v13, 920167782 }
 0x27a   : > { %v2689_v23 = vsub.s32 0, %v7221_v5  ;;  %v2763_v2 = vsel %vm2759_vm7, %v2743_v4, %v2746_v18  ;;  %v2769_v56 = vsel %vm2761_vm9, %v2752_v46, %v2768_v40  ;;  %v2771_v19 = vsel %vm2759_vm7, %v2749_v33, %v2752_v46 }
 0x27b   : > { %v2772_v57 = vsel %vm2762_vm8, %v2758_v39, 1326507024  ;;  %v2765_v35 = vsel %vm2761_vm9, %v2749_v33, %v2764_v0  ;;  %v2770_v42 = vsel %vm2760_vm11, %v2767_v58, %v2769_v56  ;;  %v2835_v63 = vshrl.u32 %v2834_v37, 23 }
 0x27c   : > { %v4540_v48 = vmin.u32 %v2689_v23, %v7221_v5  ;;  %v2773_v52 = vsel %vm2761_vm9, %v2755_v13, %v2772_v57  ;;  %v7235_v44 = vmul.u32.u64.low %v7198_v26, %v2770_v42  ;;  %v7236_v47 = vmul.u32.u64.high %v7198_v26, %v2770_v42, %v7235_v44 }
 0x27d   : > { %v2774_v43 = vsel %vm2760_vm11, %v2771_v19, %v2773_v52  ;;  %v2709_v60 = vsub.s32 4, %v2685_v45  ;;  %v2766_v29 = vsel %vm2760_vm11, %v2763_v2, %v2765_v35  ;;  %v4547_v15 = vadd.s32 4294967169, %v2835_v63 }
 0x27e   : > { %v2691_v3 = vclz %v4540_v48  ;;  %v7241_v32 = vmul.u32.u64.low %v7198_v26, %v2774_v43  ;;  %v7242_v22 = vmul.u32.u64.high %v7198_v26, %v2774_v43, %v7241_v32  ;;  %vm2611_vm10 = vweird.f32 %v6935_v54 }
 0x27f   : > { %vm2625_vm12 = vcmp.lt.s32.totalorder %v6970_v16, 0  ;;  %v2831_v30 = vand.u32 2147483647, %v7125_v28  ;;  %vm2614_vm15 = vcmp.lt.s32.totalorder %v2613_v53, 2  ;;  %vm2615_vm13 = vcmp.eq.s32.totalorder %v2613_v53, 0 }
 0x280   : > { %v4541_v59 = vadd.s32 4294967294, %v2691_v3  ;;  %v2785_v62 = vadd.s32 1, %v7236_v47  ;;  %v2841_v4 = vadd.s32 1, %v4547_v15  ;;  %vm2618_vm2 = vcmp.eq.s32.totalorder %v2613_v53, 2 }
 0x281   : > { %v2679_v21 = vadd.s32 %v7178_v6, %v7175_v20  ;;  %v2782_v33 = vmul.u32 %v7198_v26, %v2766_v29  ;;  %v2710_v13 = vsel %vm2625_vm12, %v2709_v60, %v2685_v45  ;;  %vm2784_vm14 = vc.u32 %v7242_v22, %v7235_v44 }
 0x282   : > { %v4894_v18 = vpop.eup %4893  ;;  %vm4542_vm0 = vcmp.lt.s32.totalorder %v4541_v59, 0  ;;  %vm7258_vm1 = vcmp.le.f32.partialorder %v2623_v49, 0.7853982  ;;  %v2786_v6 = vsel %vm2784_vm14, %v2785_v62, %v7236_v47  ;;  %vm2842_vm3 = vcmp.gt.s32.totalorder %v2841_v4, 0 }
 0x283   : > { %v4896_v14 = vpop.eup %4895  ;;  %v2619_v61 = vxor.u32 2147483648, %v4894_v18  ;;  %v2694_v17 = vsel %vm4542_vm0, 0, %v4541_v59  ;;  %v2787_v23 = vadd.s32 %v2786_v6, %v2782_v33  ;;  %v2838_v49 = vand.u32 8388607, %v2831_v30 }
 0x284   : > { %v2616_v24 = vxor.u32 2147483648, %v4896_v14  ;;  %v2695_v46 = vsub.s32 32, %v2694_v17  ;;  %v2696_v39 = vshll.u32 %v7221_v5, %v2694_v17  ;;  %v2699_v37 = vsub.s32 4294967266, %v2694_v17 }
 0x285   : > { %v2620_v0 = vsel %vm2618_vm2, %v2619_v61, %v4896_v14  ;;  %v2712_v5 = vsel %vm7258_vm1, 0, %v2710_v13  ;;  %v2843_v2 = vsel %vm2842_vm3, %v2841_v4, 0  ;;  %v2788_v48 = vadd.s32 536870912, %v2787_v23 }
 0x286   : > { %v2617_v26 = vsel %vm2615_vm13, %v4894_v18, %v2616_v24  ;;  %v2697_v45 = vshrl.u32 %v2679_v21, %v2695_v46  ;;  %v2700_v58 = vadd.s32 127, %v2699_v37  ;;  %v2845_v35 = vand.u32 31, %v2843_v2 }
 0x287   : > { %v2621_v40 = vsel %vm2614_vm15, %v2617_v26, %v2620_v0  ;;  %v7272_v43 = vshrl.u32 %v2788_v48, 30  ;;  %v2716_v53 = vadd.s32 3, %v2712_v5  ;;  %v2839_v47 = vor.u32 8388608, %v2838_v49 }
 0x288   : > { %v2622_v56 = vsel %vm2611_vm10, nan, %v2621_v40  ;;  %v2698_v19 = vor.u32 %v2697_v45, %v2696_v39  ;;  %v2701_v57 = vshll.u32 %v2700_v58, 23  ;;  %v7274_v63 = vshrl.u32 %v2843_v2, 5 }
 0x289   : > { %2943 = vst [vmem:[%s5207_s16 + $0xa0] sm:$0xff] %v2622_v56  ;;  %v2846_v3 = vsub.s32 32, %v2845_v35  ;;  %v2790_v29 = vshll.u32 %v7272_v43, 30  ;;  %v2848_v54 = vshll.u32 %v5057_v25, %v2845_v35  ;;  %v2851_v32 = vshll.u32 %v5058_v27, %v2845_v35 }
 0x28a   : > { %v2702_v42 = vor.u32 4788187, %v2701_v57  ;;  %v2705_v52 = vcvt.s32.f32 %v2698_v19  ;;  %v2854_v62 = vshll.u32 %v8584_v41, %v2845_v35  ;;  %v2857_v33 = vshll.u32 %v8556_v36, %v2845_v35 }
 0x28b   : > { %v2849_v15 = vshrl.u32 %v5058_v27, %v2846_v3  ;;  %v2852_v59 = vshrl.u32 %v8584_v41, %v2846_v3  ;;  %v2855_v4 = vshrl.u32 %v8556_v36, %v2846_v3  ;;  %v7283_v21 = vsub.s32 %v2787_v23, %v2790_v29 }
 0x28c   : > { %v2703_v60 = vand.u32 2147483647, %v2702_v42  ;;  %v2858_v14 = vshrl.u32 %v5061_v38, %v2846_v3  ;;  %v7287_v61 = vand.u32 3, %v2716_v53  ;;  %v7290_v17 = vsub.s32 2, %v5185_v1 }
 0x28d   : > { %v7293_v13 = vsub.s32 6, %v5185_v1  ;;  %v2793_v46 = vsub.s32 0, %v7283_v21  ;;  %v2850_v39 = vor.u32 %v2849_v15, %v2848_v54  ;;  %v7296_v37 = vshll.u32 %v2839_v47, 8 }
 0x28e   : > { %v2706_v18 = vmul.f32 %v2705_v52, %v2703_v60  ;;  %v2853_v0 = vor.u32 %v2852_v59, %v2851_v32  ;;  %v2856_v6 = vor.u32 %v2855_v4, %v2854_v62  ;;  %v2860_v26 = vshll.u32 %v5061_v38, %v2845_v35 }
 0x28f   : > { %v2861_v45 = vshrl.u32 %v5062_v51, %v2846_v3  ;;  %v4544_v23 = vmin.u32 %v2793_v46, %v7283_v21  ;;  %v2859_v40 = vor.u32 %v2858_v14, %v2857_v33  ;;  %vm2863_vm4 = vcmp.lt.s32.totalorder %v7274_v63, 1 }
 0x290   : > { %v2707_v24 = vxor.u32 2147483648, %v2706_v18  ;;  %v2847_v5 = vshrl.u32 %v5057_v25, %v2846_v3  ;;  %vm2866_vm6 = vcmp.lt.s32.totalorder %v7274_v63, 4  ;;  %v2783_v2 = vadd.s32 %v7235_v44, %v7242_v22 }
 0x291   : > { %v2862_v49 = vor.u32 %v2861_v45, %v2860_v26  ;;  %v2795_v56 = vclz %v4544_v23  ;;  %vm2865_vm5 = vcmp.lt.s32.totalorder %v7274_v63, 3  ;;  %vm2864_vm7 = vcmp.lt.s32.totalorder %v7274_v63, 2 }
 0x292   : > { %v2708_v58 = vsel %vm2625_vm12, %v2707_v24, %v2706_v18  ;;  %v2868_v19 = vsel %vm2866_vm6, %v2856_v6, 2102212464  ;;  %v2871_v20 = vsel %vm2863_vm4, %v2850_v39, %v2853_v0  ;;  %vm2729_vm8 = vcmp.lt.s32.totalorder %v7086_v55, 0 }
 0x293   : > { %v2711_v1 = vsel %vm7258_vm1, %v6970_v16, %v2708_v58  ;;  %v4545_v57 = vadd.s32 4294967294, %v2795_v56  ;;  %v2872_v48 = vsel %vm2866_vm6, %v2859_v40, 920167782  ;;  %v2875_v44 = vsel %vm2863_vm4, %v2853_v0, %v2856_v6 }
 0x294   : > { %4897 = vcosq.f32 %v2711_v1  ;;  %v2970_v22 = vrot.slane %v5197_v9, %v7293_v13  ;;  %v2867_v35 = vsel %vm2863_vm4, %v2847_v5, %v2850_v39  ;;  %v2869_v42 = vsel %vm2865_vm5, %v2853_v0, %v2868_v19 }
 0x295   : > { %4899 = vsinq.f32 %v2711_v1  ;;  %v2873_v52 = vsel %vm2865_vm5, %v2856_v6, %v2872_v48  ;;  %v2876_v53 = vsel %vm2866_vm6, %v2862_v49, 1326507024  ;;  %vm2718_vm9 = vcmp.lt.s32.totalorder %v7287_v61, 2 }
 0x296   : > { %vm4546_vm11 = vcmp.lt.s32.totalorder %v4545_v57, 0  ;;  %v2874_v47 = vsel %vm2864_vm7, %v2871_v20, %v2873_v52  ;;  %v2877_v3 = vsel %vm2865_vm5, %v2859_v40, %v2876_v53  ;;  %v2978_v60 = vrot.slane %v5199_v10, %v7293_v13 }
 0x297   : > { %vm2715_vm10 = vweird.f32 %v6970_v16  ;;  %v2798_v29 = vsel %vm4546_vm11, 0, %v4545_v57  ;;  %v2878_v54 = vsel %vm2864_vm7, %v2875_v44, %v2877_v3  ;;  %v2870_v18 = vsel %vm2864_vm7, %v2867_v35, %v2869_v42 }
 0x298   : > { %v7343_v32 = vmul.u32.u64.low %v7296_v37, %v2874_v47  ;;  %v7344_v15 = vmul.u32.u64.high %v7296_v37, %v2874_v47, %v7343_v32  ;;  %v2799_v59 = vsub.s32 32, %v2798_v29  ;;  %v2800_v62 = vshll.u32 %v7283_v21, %v2798_v29 }
 0x299   : > { %v2803_v4 = vsub.s32 4294967266, %v2798_v29  ;;  %vm2719_vm12 = vcmp.eq.s32.totalorder %v7287_v61, 0  ;;  %v2813_v33 = vsub.s32 4, %v7272_v43  ;;  %vm2722_vm15 = vcmp.eq.s32.totalorder %v7287_v61, 2 }
 0x29a   : > { %v7353_v14 = vmul.u32.u64.low %v7296_v37, %v2878_v54  ;;  %v7354_v24 = vmul.u32.u64.high %v7296_v37, %v2878_v54, %v7353_v14  ;;  %v2801_v46 = vshrl.u32 %v2783_v2, %v2799_v59  ;;  %v2950_v0 = vrot.slane %v5193_v7, %v7290_v17 }
 0x29b   : > { %v2804_v39 = vadd.s32 127, %v2803_v4  ;;  %v2886_v21 = vmul.u32 %v7296_v37, %v2870_v18  ;;  %v2889_v63 = vadd.s32 1, %v7344_v15  ;;  %v2986_v6 = vrot.slane %v5201_v11, %v7293_v13 }
 0x29c   : > { %v7364_v26 = vrot.slane %v2970_v22, %v7290_v17  ;;  %v2802_v58 = vor.u32 %v2801_v46, %v2800_v62  ;;  %v2994_v40 = vrot.slane %v5203_v12, %v7293_v13  ;;  %v7369_v1 = vrot.slane %v2978_v60, %v7290_v17 }
 0x29d   : > { %v2805_v23 = vshll.u32 %v2804_v39, 23  ;;  %v2814_v37 = vsel %vm2729_vm8, %v2813_v33, %v7272_v43  ;;  %vm2888_vm13 = vc.u32 %v7354_v24, %v7343_v32  ;;  %v2954_v2 = vrot.slane %v5193_v7, %v7293_v13 }
 0x29e   : > { %v4898_v45 = vpop.eup %4897  ;;  %v2809_v20 = vcvt.s32.f32 %v2802_v58  ;;  %v2890_v57 = vsel %vm2888_vm13, %v2889_v63, %v7344_v15  ;;  %vm7383_vm2 = vcmp.le.f32.partialorder %v2727_v50, 0.7853982  ;;  %v7388_v22 = vrot.slane %v2986_v6, %v7290_v17 }
 0x29f   : > { %v4900_v5 = vpop.eup %4899  ;;  %v2723_v49 = vxor.u32 2147483648, %v4898_v45  ;;  %v2806_v19 = vor.u32 4788187, %v2805_v23  ;;  %v2891_v43 = vadd.s32 %v2890_v57, %v2886_v21  ;;  %v3010_v52 = vrot.slane %v2950_v0, %v7290_v17 }
 0x2a0   : > { %v2720_v56 = vxor.u32 2147483648, %v4900_v5  ;;  %v7394_v53 = vrot.slane %v2994_v40, %v7290_v17  ;;  %v2816_v50 = vsel %vm7383_vm2, 0, %v2814_v37  ;;  %v3014_v54 = vrot.slane %v2954_v2, %v7290_v17 }
 0x2a1   : > { %v2724_v48 = vsel %vm2722_vm15, %v2723_v49, %v4900_v5  ;;  %v2807_v42 = vand.u32 2147483647, %v2806_v19  ;;  %v2892_v3 = vadd.s32 536870912, %v2891_v43  ;;  %v2820_v62 = vadd.s32 3, %v2816_v50 }
 0x2a2   : > { %v2721_v35 = vsel %vm2719_vm12, %v4898_v45, %v2720_v56  ;;  %v3055_v4 = vmul.f32 %v3010_v52, %v5232_v31  ;;  %v2958_v61 = vrot.slane %v5195_v8, %v7290_v17  ;;  %vm2833_vm0 = vcmp.lt.s32.totalorder %v7125_v28, 0 }
 0x2a3   : > { %v2725_v47 = vsel %vm2718_vm9, %v2721_v35, %v2724_v48  ;;  %v2810_v29 = vmul.f32 %v2809_v20, %v2807_v42  ;;  %v2893_v15 = vshrl.u32 %v2892_v3, 30  ;;  %v3056_v16 = vmul.f32 %v3014_v54, %v5232_v31 }
 0x2a4   : > { %v2726_v60 = vsel %vm2715_vm10, nan, %v2725_v47  ;;  %v2821_v21 = vand.u32 3, %v2820_v62  ;;  %v7419_v63 = vadd.f32 %v3055_v4, %v5240_v34  ;;  %vm7423_vm14 = vcmp.le.f32.partialorder %v2831_v30, 0.7853982 }
 0x2a5   : > { %2944 = vst [vmem:[%s5207_s16 + $0xa8] sm:$0xff] %v2726_v60  ;;  %v2811_v59 = vxor.u32 2147483648, %v2810_v29  ;;  %v2894_v18 = vshll.u32 %v2893_v15, 30  ;;  %v2917_v33 = vsub.s32 4, %v2893_v15  ;;  %v3018_v58 = vrot.slane %v2958_v61, %v7290_v17 }
 0x2a6   : > { %v2962_v40 = vrot.slane %v5195_v8, %v7293_v13  ;;  %v7434_v5 = vadd.f32 %v3056_v16, %v5240_v34  ;;  %v2966_v30 = vrot.slane %v5197_v9, %v7290_v17  ;;  %v2974_v37 = vrot.slane %v5199_v10, %v7290_v17 }
 0x2a7   : > { %v2812_v14 = vsel %vm2729_vm8, %v2811_v59, %v2810_v29  ;;  %v7414_v39 = vsub.s32 %v2891_v43, %v2894_v18  ;;  %v2918_v0 = vsel %vm2833_vm0, %v2917_v33, %v2893_v15  ;;  %v3079_v2 = vand.u32 2147483647, %v7419_v63 }
 0x2a8   : > { %v2815_v46 = vsel %vm7383_vm2, %v7086_v55, %v2812_v14  ;;  %v2920_v23 = vsel %vm7423_vm14, 0, %v2918_v0  ;;  %vm2822_vm1 = vcmp.lt.s32.totalorder %v2821_v21, 2  ;;  %vm2823_vm3 = vcmp.eq.s32.totalorder %v2821_v21, 0 }
 0x2a9   : > { %4901 = vcosq.f32 %v2815_v46  ;;  %v2897_v45 = vsub.s32 0, %v7414_v39  ;;  %v2982_v56 = vrot.slane %v5201_v11, %v7290_v17  ;;  %v3082_v13 = vand.u32 2139095040, %v7419_v63 }
 0x2aa   : > { %4903 = vsinq.f32 %v2815_v46  ;;  %vm2819_vm4 = vweird.f32 %v7086_v55  ;;  %vm2826_vm6 = vcmp.eq.s32.totalorder %v2821_v21, 2  ;;  %v2924_v20 = vadd.s32 3, %v2920_v23 }
 0x2ab   : > { %v4548_v49 = vmin.u32 %v2897_v45, %v7414_v39  ;;  %v3057_v57 = vmul.f32 %v3018_v58, %v5232_v31  ;;  %v3083_v48 = vshrl.u32 %v3082_v13, 23  ;;  %v3086_v44 = vand.u32 8388607, %v3079_v2 }
 0x2ac   : > { %v8545_v43 = vand.u32 2147483647, %v7434_v5  ;;  %v3186_v35 = vand.u32 2139095040, %v7434_v5  ;;  %v2990_v52 = vrot.slane %v5203_v12, %v7290_v17  ;;  %v7454_v47 = vrot.slane %v2962_v40, %v7290_v17 }
 0x2ad   : > { %v2899_v19 = vclz %v4548_v49  ;;  %v7457_v50 = vrot.slane %v2966_v30, %v7290_v17  ;;  %v7460_v3 = vrot.slane %v2974_v37, %v7290_v17  ;;  %v4551_v60 = vadd.s32 4294967169, %v3083_v48 }
 0x2ae   : > { %v3087_v29 = vor.u32 8388608, %v3086_v44  ;;  %v3187_v54 = vshrl.u32 %v3186_v35, 23  ;;  %v2887_v15 = vadd.s32 %v7343_v32, %v7354_v24  ;;  %v7464_v59 = vand.u32 3, %v2924_v20 }
 0x2af   : > { %v4549_v42 = vadd.s32 4294967294, %v2899_v19  ;;  %v7467_v62 = vadd.f32 %v3057_v57, %v5240_v34  ;;  %v3089_v33 = vadd.s32 1, %v4551_v60  ;;  %v7471_v14 = vand.u32 8388607, %v8545_v43 }
 0x2b0   : > { %v4555_v61 = vadd.s32 4294967169, %v3187_v54  ;;  %v7474_v58 = vshll.u32 %v3087_v29, 8  ;;  %v7522_v6 = vrot.slane %v2990_v52, %v7290_v17  ;;  %vm2930_vm15 = vcmp.eq.s32.totalorder %v7464_v59, 2 }
 0x2b1   : > { %vm4550_vm5 = vcmp.lt.s32.totalorder %v4549_v42, 0  ;;  %vm3090_vm7 = vcmp.gt.s32.totalorder %v3089_v33, 0  ;;  %vm2927_vm2 = vcmp.eq.s32.totalorder %v7464_v59, 0 }
 0x2b2   : > { %v2902_v18 = vsel %vm4550_vm5, 0, %v4549_v42  ;;  %v3193_v23 = vadd.s32 1, %v4555_v61  ;;  %v3091_v37 = vsel %vm3090_vm7, %v3089_v33, 0  ;;  %vm3081_vm7 = vcmp.lt.s32.totalorder %v7419_v63, 0 }
 0x2b3   : > { %v4902_v4 = vpop.eup %4901  ;;  %v2903_v0 = vsub.s32 32, %v2902_v18  ;;  %v2904_v45 = vshll.u32 %v7414_v39, %v2902_v18  ;;  %v2907_v32 = vsub.s32 4294967266, %v2902_v18  ;;  %v3092_v19 = vshrl.u32 %v3091_v37, 5 }
 0x2b4   : > { %v4904_v16 = vpop.eup %4903  ;;  %v2827_v46 = vxor.u32 2147483648, %v4902_v4  ;;  %v3093_v20 = vand.u32 31, %v3091_v37  ;;  %vm3194_vm8 = vcmp.gt.s32.totalorder %v3193_v23, 0 }
 0x2b5   : > { %v2824_v24 = vxor.u32 2147483648, %v4904_v16  ;;  %v2905_v49 = vshrl.u32 %v2887_v15, %v2903_v0  ;;  %v2908_v30 = vadd.s32 127, %v2907_v32  ;;  %v3195_v44 = vsel %vm3194_vm8, %v3193_v23, 0 }
 0x2b6   : > { %v2828_v40 = vsel %vm2826_vm6, %v2827_v46, %v4904_v16  ;;  %v3094_v42 = vsub.s32 32, %v3093_v20  ;;  %v3096_v60 = vshll.u32 %v5057_v25, %v3093_v20  ;;  %v3099_v29 = vshll.u32 %v5058_v27, %v3093_v20 }
 0x2b7   : > { %v2825_v13 = vsel %vm2823_vm3, %v4902_v4, %v2824_v24  ;;  %v2906_v39 = vor.u32 %v2905_v49, %v2904_v45  ;;  %v2909_v48 = vshll.u32 %v2908_v30, 23  ;;  %v3102_v4 = vshll.u32 %v8584_v41, %v3093_v20 }
 0x2b8   : > { %v2829_v57 = vsel %vm2822_vm1, %v2825_v13, %v2828_v40  ;;  %v3105_v18 = vshll.u32 %v8556_v36, %v3093_v20  ;;  %v3095_v21 = vshrl.u32 %v5057_v25, %v3094_v42  ;;  %v3097_v33 = vshrl.u32 %v5058_v27, %v3094_v42 }
 0x2b9   : > { %v2830_v35 = vsel %vm2819_vm4, nan, %v2829_v57  ;;  %v2910_v54 = vor.u32 4788187, %v2909_v48  ;;  %v2913_v15 = vcvt.s32.f32 %v2906_v39  ;;  %v3100_v61 = vshrl.u32 %v8584_v41, %v3094_v42 }
 0x2ba   : > { %2945 = vst [vmem:[%s5207_s16 + $0xb0] sm:$0xff] %v2830_v35  ;;  %v3103_v55 = vshrl.u32 %v8556_v36, %v3094_v42  ;;  %v3106_v46 = vshrl.u32 %v5061_v38, %v3094_v42  ;;  %v3108_v0 = vshll.u32 %v5061_v38, %v3093_v20  ;;  %v3109_v45 = vshrl.u32 %v5062_v51, %v3094_v42 }
 0x2bb   : > { %v2911_v16 = vand.u32 2147483647, %v2910_v54  ;;  %v3098_v32 = vor.u32 %v3097_v33, %v3096_v60  ;;  %v3101_v24 = vor.u32 %v3100_v61, %v3099_v29  ;;  %vm3111_vm9 = vcmp.lt.s32.totalorder %v3092_v19, 1 }
 0x2bc   : > { %v3104_v23 = vor.u32 %v3103_v55, %v3102_v4  ;;  %v3107_v49 = vor.u32 %v3106_v46, %v3105_v18  ;;  %v3110_v30 = vor.u32 %v3109_v45, %v3108_v0  ;;  %vm3112_vm11 = vcmp.lt.s32.totalorder %v3092_v19, 2 }
 0x2bd   : > { %v2914_v40 = vmul.f32 %v2913_v15, %v2911_v16  ;;  %vm3113_vm10 = vcmp.lt.s32.totalorder %v3092_v19, 3  ;;  %vm3114_vm12 = vcmp.lt.s32.totalorder %v3092_v19, 4  ;;  %v3115_v37 = vsel %vm3111_vm9, %v3095_v21, %v3098_v32 }
 0x2be   : > { %v3119_v13 = vsel %vm3111_vm9, %v3098_v32, %v3101_v24  ;;  %v3116_v39 = vsel %vm3114_vm12, %v3104_v23, 2102212464  ;;  %v3120_v48 = vsel %vm3114_vm12, %v3107_v49, 920167782  ;;  %v3123_v35 = vsel %vm3111_vm9, %v3101_v24, %v3104_v23 }
 0x2bf   : > { %v2915_v57 = vxor.u32 2147483648, %v2914_v40  ;;  %v3117_v54 = vsel %vm3113_vm10, %v3101_v24, %v3116_v39  ;;  %v3121_v20 = vsel %vm3113_vm10, %v3104_v23, %v3120_v48  ;;  %v3124_v43 = vsel %vm3114_vm12, %v3110_v30, 1326507024 }
 0x2c0   : > { %v7493_v42 = vshrl.u32 %v3195_v44, 5  ;;  %v3118_v29 = vsel %vm3112_vm11, %v3115_v37, %v3117_v54  ;;  %v3122_v15 = vsel %vm3112_vm11, %v3119_v13, %v3121_v20  ;;  %v3125_v4 = vsel %vm3113_vm10, %v3107_v49, %v3124_v43 }
 0x2c1   : > { %v2916_v60 = vsel %vm2833_vm0, %v2915_v57, %v2914_v40  ;;  %v3126_v21 = vsel %vm3112_vm11, %v3123_v35, %v3125_v4  ;;  %v7504_v33 = vmul.u32.u64.low %v7474_v58, %v3122_v15  ;;  %v7505_v61 = vmul.u32.u64.high %v7474_v58, %v3122_v15, %v7504_v33 }
 0x2c2   : > { %v2919_v18 = vsel %vm7423_vm14, %v7125_v28, %v2916_v60  ;;  %v7512_v55 = vrot.slane %v2982_v56, %v7290_v17  ;;  %v7515_v43 = vmul.u32.u64.low %v7474_v58, %v3126_v21  ;;  %v7516_v16 = vmul.u32.u64.high %v7474_v58, %v3126_v21, %v7515_v43 }
 0x2c3   : > { %4905 = vcosq.f32 %v2919_v18  ;;  %v3197_v19 = vand.u32 31, %v3195_v44  ;;  %v3290_v46 = vand.u32 2139095040, %v7467_v62  ;;  %v3134_v0 = vmul.u32 %v7474_v58, %v3118_v29 }
 0x2c4   : > { %4907 = vsinq.f32 %v2919_v18  ;;  %v3191_v56 = vor.u32 8388608, %v7471_v14  ;;  %vm3215_vm13 = vcmp.lt.s32.totalorder %v7493_v42, 1  ;;  %v3137_v45 = vadd.s32 1, %v7505_v61 }
 0x2c5   : > { %v3198_v32 = vsub.s32 32, %v3197_v19  ;;  %v3200_v24 = vshll.u32 %v5057_v25, %v3197_v19  ;;  %v3203_v17 = vshll.u32 %v5058_v27, %v3197_v19  ;;  %vm3136_vm0 = vc.u32 %v7516_v16, %v7504_v33 }
 0x2c6   : > { %v3206_v52 = vshll.u32 %v8584_v41, %v3197_v19  ;;  %v3209_v58 = vshll.u32 %v8556_v36, %v3197_v19  ;;  %vm3217_vm14 = vcmp.lt.s32.totalorder %v7493_v42, 3  ;;  %vm2923_vm1 = vweird.f32 %v7125_v28 }
 0x2c7   : > { %v3138_v14 = vsel %vm3136_vm0, %v3137_v45, %v7505_v61  ;;  %v3201_v44 = vshrl.u32 %v5058_v27, %v3198_v32  ;;  %v3204_v23 = vshrl.u32 %v8584_v41, %v3198_v32  ;;  %v3291_v40 = vshrl.u32 %v3290_v46, 23 }
 0x2c8   : > { %v3139_v49 = vadd.s32 %v3138_v14, %v3134_v0  ;;  %v3207_v30 = vshrl.u32 %v8556_v36, %v3198_v32  ;;  %v3210_v37 = vshrl.u32 %v5061_v38, %v3198_v32  ;;  %v3212_v13 = vshll.u32 %v5061_v38, %v3197_v19 }
 0x2c9   : > { %v3202_v57 = vor.u32 %v3201_v44, %v3200_v24  ;;  %v3205_v39 = vor.u32 %v3204_v23, %v3203_v17  ;;  %v3213_v48 = vshrl.u32 %v5062_v51, %v3198_v32  ;;  %vm3218_vm3 = vcmp.lt.s32.totalorder %v7493_v42, 4 }
 0x2ca   : > { %v3140_v35 = vadd.s32 536870912, %v3139_v49  ;;  %v3199_v54 = vshrl.u32 %v5057_v25, %v3198_v32  ;;  %v3208_v20 = vor.u32 %v3207_v30, %v3206_v52  ;;  %v3211_v60 = vor.u32 %v3210_v37, %v3209_v58 }
 0x2cb   : > { %v3214_v29 = vor.u32 %v3213_v48, %v3212_v13  ;;  %vm3216_vm4 = vcmp.lt.s32.totalorder %v7493_v42, 2  ;;  %v7549_v15 = vshll.u32 %v3191_v56, 8  ;;  %v4559_v4 = vadd.s32 4294967169, %v3291_v40 }
 0x2cc   : > { %v3141_v21 = vshrl.u32 %v3140_v35, 30  ;;  %v3220_v61 = vsel %vm3218_vm3, %v3208_v20, 2102212464  ;;  %v3223_v43 = vsel %vm3215_vm13, %v3202_v57, %v3205_v39  ;;  %v3224_v19 = vsel %vm3218_vm3, %v3211_v60, 920167782 }
 0x2cd   : > { %v4906_v18 = vpop.eup %4905  ;;  %v3225_v45 = vsel %vm3217_vm14, %v3208_v20, %v3224_v19  ;;  %v3227_v56 = vsel %vm3215_vm13, %v3205_v39, %v3208_v20  ;;  %v3228_v32 = vsel %vm3218_vm3, %v3214_v29, 1326507024  ;;  %vm2926_vm6 = vcmp.lt.s32.totalorder %v7464_v59, 2 }
 0x2ce   : > { %v4908_v46 = vpop.eup %4907  ;;  %v2931_v0 = vxor.u32 2147483648, %v4906_v18  ;;  %v3142_v17 = vshll.u32 %v3141_v21, 30  ;;  %v3219_v52 = vsel %vm3215_vm13, %v3199_v54, %v3202_v57  ;;  %v3221_v14 = vsel %vm3217_vm14, %v3205_v39, %v3220_v61 }
 0x2cf   : > { %v2928_v24 = vxor.u32 2147483648, %v4908_v46  ;;  %v3229_v44 = vsel %vm3217_vm14, %v3211_v60, %v3228_v32  ;;  %v3297_v23 = vadd.s32 1, %v4559_v4  ;;  %v3226_v37 = vsel %vm3216_vm4, %v3223_v43, %v3225_v45 }
 0x2d0   : > { %v2932_v58 = vsel %vm2930_vm15, %v2931_v0, %v4908_v46  ;;  %v7574_v30 = vsub.s32 %v3139_v49, %v3142_v17  ;;  %v3230_v13 = vsel %vm3216_vm4, %v3227_v56, %v3229_v44  ;;  %v3287_v39 = vand.u32 2147483647, %v7467_v62 }
 0x2d1   : > { %v2929_v40 = vsel %vm2927_vm2, %v4906_v18, %v2928_v24  ;;  %v7581_v48 = vmul.u32.u64.low %v7549_v15, %v3230_v13  ;;  %v7582_v35 = vmul.u32.u64.high %v7549_v15, %v3230_v13, %v7581_v48  ;;  %v7589_v59 = vmul.f32 %v7454_v47, %v5232_v31 }
 0x2d2   : > { %v2933_v57 = vsel %vm2926_vm6, %v2929_v40, %v2932_v58  ;;  %v3145_v49 = vsub.s32 0, %v7574_v30  ;;  %v3165_v20 = vsub.s32 4, %v3141_v21  ;;  %v3222_v60 = vsel %vm3216_vm4, %v3219_v52, %v3221_v14 }
 0x2d3   : > { %v2934_v54 = vsel %vm2923_vm1, nan, %v2933_v57  ;;  %v7596_v29 = vmul.u32.u64.low %v7549_v15, %v3226_v37  ;;  %v7597_v4 = vmul.u32.u64.high %v7549_v15, %v3226_v37, %v7596_v29  ;;  %vm3298_vm5 = vcmp.gt.s32.totalorder %v3297_v23, 0 }
 0x2d4   : > { %2946 = vst [vmem:[%s5207_s16 + $0xb8] sm:$0xff] %v2934_v54  ;;  %v7602_v28 = vmul.f32 %v7457_v50, %v5232_v31  ;;  %v7606_v47 = vmul.f32 %v7364_v26, %v5232_v31  ;;  %v4552_v18 = vmin.u32 %v3145_v49, %v7574_v30  ;;  %v3299_v61 = vsel %vm3298_vm5, %v3297_v23, 0 }
 0x2d5   : > { %v3135_v42 = vadd.s32 %v7504_v33, %v7516_v16  ;;  %v3294_v43 = vand.u32 8388607, %v3287_v39  ;;  %v3301_v19 = vand.u32 31, %v3299_v61  ;;  %v7616_v50 = vsel %vm3081_vm7, %v3165_v20, %v3141_v21 }
 0x2d6   : > { %v3147_v46 = vclz %v4552_v18  ;;  %v3238_v26 = vmul.u32 %v7549_v15, %v3222_v60  ;;  %vm3240_vm8 = vc.u32 %v7582_v35, %v7596_v29  ;;  %v3241_v0 = vadd.s32 1, %v7597_v4 }
 0x2d7   : > { %v7622_v45 = vshrl.u32 %v3299_v61, 5  ;;  %v3302_v56 = vsub.s32 32, %v3301_v19  ;;  %v3304_v33 = vshll.u32 %v5057_v25, %v3301_v19  ;;  %v3307_v32 = vshll.u32 %v5058_v27, %v3301_v19 }
 0x2d8   : > { %v4553_v16 = vadd.s32 4294967294, %v3147_v46  ;;  %v3310_v24 = vshll.u32 %v8584_v41, %v3301_v19  ;;  %v3313_v21 = vshll.u32 %v8556_v36, %v3301_v19  ;;  %v3242_v17 = vsel %vm3240_vm8, %v3241_v0, %v7597_v4 }
 0x2d9   : > { %v3305_v15 = vshrl.u32 %v5058_v27, %v3302_v56  ;;  %v3308_v52 = vshrl.u32 %v8584_v41, %v3302_v56  ;;  %v3316_v58 = vshll.u32 %v5061_v38, %v3301_v19  ;;  %v3243_v14 = vadd.s32 %v3242_v17, %v3238_v26 }
 0x2da   : > { %vm4554_vm9 = vcmp.lt.s32.totalorder %v4553_v16, 0  ;;  %v3311_v44 = vshrl.u32 %v8556_v36, %v3302_v56  ;;  %v3314_v23 = vshrl.u32 %v5061_v38, %v3302_v56  ;;  %v3295_v37 = vor.u32 8388608, %v3294_v43 }
 0x2db   : > { %v3150_v40 = vsel %vm4554_vm9, 0, %v4553_v16  ;;  %v3306_v13 = vor.u32 %v3305_v15, %v3304_v33  ;;  %v3317_v57 = vshrl.u32 %v5062_v51, %v3302_v56  ;;  %v3244_v20 = vadd.s32 536870912, %v3243_v14 }
 0x2dc   : > { %v3151_v48 = vsub.s32 32, %v3150_v40  ;;  %v3152_v54 = vshll.u32 %v7574_v30, %v3150_v40  ;;  %v3155_v49 = vsub.s32 4294967266, %v3150_v40  ;;  %v3309_v60 = vor.u32 %v3308_v52, %v3307_v32 }
 0x2dd   : > { %v3312_v4 = vor.u32 %v3311_v44, %v3310_v24  ;;  %v3315_v18 = vor.u32 %v3314_v23, %v3313_v21  ;;  %v3318_v61 = vor.u32 %v3317_v57, %v3316_v58  ;;  %v3245_v26 = vshrl.u32 %v3244_v20, 30 }
 0x2de   : > { %v3153_v19 = vshrl.u32 %v3135_v42, %v3151_v48  ;;  %v3156_v46 = vadd.s32 127, %v3155_v49  ;;  %vm3319_vm11 = vcmp.lt.s32.totalorder %v7622_v45, 1  ;;  %v3303_v0 = vshrl.u32 %v5057_v25, %v3302_v56 }
 0x2df   : > { %vm3320_vm10 = vcmp.lt.s32.totalorder %v7622_v45, 2  ;;  %vm3322_vm12 = vcmp.lt.s32.totalorder %v7622_v45, 4  ;;  %v3335_v43 = vshll.u32 %v3295_v37, 8  ;;  %v3246_v16 = vshll.u32 %v3245_v26, 30 }
 0x2e0   : > { %v3154_v33 = vor.u32 %v3153_v19, %v3152_v54  ;;  %v3157_v30 = vshll.u32 %v3156_v46, 23  ;;  %vm3321_vm15 = vcmp.lt.s32.totalorder %v7622_v45, 3  ;;  %v3324_v32 = vsel %vm3322_vm12, %v3312_v4, 2102212464 }
 0x2e1   : > { %v3327_v42 = vsel %vm3319_vm11, %v3306_v13, %v3309_v60  ;;  %v3328_v24 = vsel %vm3322_vm12, %v3315_v18, 920167782  ;;  %v3332_v21 = vsel %vm3322_vm12, %v3318_v61, 1326507024  ;;  %v7643_v52 = vsub.s32 %v3243_v14, %v3246_v16 }
 0x2e2   : > { %v3158_v17 = vor.u32 4788187, %v3157_v30  ;;  %v3161_v15 = vcvt.s32.f32 %v3154_v33  ;;  %v3331_v56 = vsel %vm3319_vm11, %v3309_v60, %v3312_v4  ;;  %v3323_v58 = vsel %vm3319_vm11, %v3303_v0, %v3306_v13 }
 0x2e3   : > { %v3325_v44 = vsel %vm3321_vm15, %v3309_v60, %v3324_v32  ;;  %v3329_v23 = vsel %vm3321_vm15, %v3312_v4, %v3328_v24  ;;  %v3333_v40 = vsel %vm3321_vm15, %v3315_v18, %v3332_v21  ;;  %v7651_v37 = vmul.f32 %v7460_v3, %v5232_v31 }
 0x2e4   : > { %vm7655_vm13 = vcmp.le.f32.partialorder %v3079_v2, 0.7853982  ;;  %v3159_v14 = vand.u32 2147483647, %v3158_v17  ;;  %v3249_v48 = vsub.s32 0, %v7643_v52  ;;  %v7662_v54 = vadd.f32 %v7589_v59, %v5240_v34 }
 0x2e5   : > { %v3168_v13 = vsel %vm7655_vm13, 0, %v7616_v50  ;;  %v3330_v3 = vsel %vm3320_vm10, %v3327_v42, %v3329_v23  ;;  %v3334_v2 = vsel %vm3320_vm10, %v3331_v56, %v3333_v40  ;;  %v3269_v60 = vsub.s32 4, %v3245_v26 }
 0x2e6   : > { %v3162_v49 = vmul.f32 %v3161_v15, %v3159_v14  ;;  %v4556_v20 = vmin.u32 %v3249_v48, %v7643_v52  ;;  %v3326_v4 = vsel %vm3320_vm10, %v3323_v58, %v3325_v44  ;;  %v7682_v50 = vmul.f32 %v7369_v1, %v5232_v31 }
 0x2e7   : > { %v7674_v18 = vmul.u32.u64.low %v3335_v43, %v3334_v2  ;;  %v7675_v59 = vmul.u32.u64.high %v3335_v43, %v3334_v2, %v7674_v18  ;;  %v7677_v61 = vmul.u32.u64.low %v3335_v43, %v3330_v3  ;;  %v7678_v19 = vmul.u32.u64.high %v3335_v43, %v3330_v3, %v7677_v61 }
 0x2e8   : > { %v7686_v46 = vadd.f32 %v7602_v28, %v5240_v34  ;;  %v3163_v0 = vxor.u32 2147483648, %v3162_v49  ;;  %v3251_v33 = vclz %v4556_v20  ;;  %v3172_v30 = vadd.s32 3, %v3168_v13 }
 0x2e9   : > { %v8609_v45 = vand.u32 2147483647, %v7434_v5  ;;  %vm3185_vm0 = vcmp.lt.s32.totalorder %v7434_v5, 0  ;;  %v3394_v32 = vand.u32 2139095040, %v7662_v54  ;;  %v3342_v24 = vmul.u32 %v3335_v43, %v3326_v4 }
 0x2ea   : > { %v3164_v1 = vsel %vm3081_vm7, %v3163_v0, %v3162_v49  ;;  %v4557_v42 = vadd.s32 4294967294, %v3251_v33  ;;  %v3270_v28 = vsel %vm3185_vm0, %v3269_v60, %v3245_v26  ;;  %vm3344_vm14 = vc.u32 %v7675_v59, %v7677_v61 }
 0x2eb   : > { %vm7690_vm2 = vcmp.le.f32.partialorder %v8609_v45, 0.7853982  ;;  %v3167_v21 = vsel %vm7655_vm13, %v7419_v63, %v3164_v1  ;;  %v3345_v17 = vadd.s32 1, %v7678_v19  ;;  %v3391_v15 = vand.u32 2147483647, %v7662_v54 }
 0x2ec   : > { %4909 = vcosq.f32 %v3167_v21  ;;  %v3239_v56 = vadd.s32 %v7596_v29, %v7582_v35  ;;  %vm4558_vm1 = vcmp.lt.s32.totalorder %v4557_v42, 0  ;;  %v3395_v58 = vshrl.u32 %v3394_v32, 23 }
 0x2ed   : > { %4911 = vsinq.f32 %v3167_v21  ;;  %v3254_v44 = vsel %vm4558_vm1, 0, %v4557_v42  ;;  %v3272_v26 = vsel %vm7690_vm2, 0, %v3270_v28  ;;  %v3346_v43 = vsel %vm3344_vm14, %v3345_v17, %v7678_v19 }
 0x2ee   : > { %v3255_v23 = vsub.s32 32, %v3254_v44  ;;  %v3256_v40 = vshll.u32 %v7643_v52, %v3254_v44  ;;  %v3259_v57 = vsub.s32 4294967266, %v3254_v44  ;;  %v3347_v14 = vadd.s32 %v3346_v43, %v3342_v24 }
 0x2ef   : > { %v4563_v48 = vadd.s32 4294967169, %v3395_v58  ;;  %v3398_v13 = vand.u32 8388607, %v3391_v15  ;;  %v3495_v35 = vand.u32 2147483647, %v7686_v46  ;;  %v3498_v29 = vand.u32 2139095040, %v7686_v46 }
 0x2f0   : > { %v3173_v3 = vand.u32 3, %v3172_v30  ;;  %v3257_v2 = vshrl.u32 %v3239_v56, %v3255_v23  ;;  %v3260_v49 = vadd.s32 127, %v3259_v57  ;;  %v3348_v20 = vadd.s32 536870912, %v3347_v14 }
 0x2f1   : > { %v7718_v60 = vmul.f32 %v7512_v55, %v5232_v31  ;;  %v7722_v52 = vadd.f32 %v7606_v47, %v5240_v34  ;;  %v3401_v4 = vadd.s32 1, %v4563_v48  ;;  %v3499_v18 = vshrl.u32 %v3498_v29, 23 }
 0x2f2   : > { %v3258_v19 = vor.u32 %v3257_v2, %v3256_v40  ;;  %v3261_v0 = vshll.u32 %v3260_v49, 23  ;;  %v3276_v33 = vadd.s32 3, %v3272_v26  ;;  %v7724_v45 = vshrl.u32 %v3348_v20, 30 }
 0x2f3   : > { %vm3171_vm3 = vweird.f32 %v7419_v63  ;;  %v3399_v30 = vor.u32 8388608, %v3398_v13  ;;  %vm3402_vm4 = vcmp.gt.s32.totalorder %v3401_v4, 0  ;;  %v7729_v32 = vand.u32 8388607, %v3495_v35 }
 0x2f4   : > { %vm3174_vm6 = vcmp.lt.s32.totalorder %v3173_v3, 2  ;;  %v3262_v55 = vor.u32 4788187, %v3261_v0  ;;  %v3265_v1 = vcvt.s32.f32 %v3258_v19  ;;  %v3350_v47 = vshll.u32 %v7724_v45, 30 }
 0x2f5   : > { %vm3175_vm5 = vcmp.eq.s32.totalorder %v3173_v3, 0  ;;  %vm3178_vm7 = vcmp.eq.s32.totalorder %v3173_v3, 2  ;;  %v3403_v42 = vsel %vm3402_vm4, %v3401_v4, 0  ;;  %v4567_v28 = vadd.s32 4294967169, %v3499_v18 }
 0x2f6   : > { %v4910_v24 = vpop.eup %4909  ;;  %v3263_v21 = vand.u32 2147483647, %v3262_v55  ;;  %v7732_v17 = vand.u32 3, %v3276_v33  ;;  %v7735_v56 = vadd.s32 %v7677_v61, %v7675_v59  ;;  %v7737_v58 = vsub.s32 %v3347_v14, %v3350_v47 }
 0x2f7   : > { %v4912_v44 = vpop.eup %4911  ;;  %v3179_v26 = vxor.u32 2147483648, %v4910_v24  ;;  %v3405_v43 = vand.u32 31, %v3403_v42  ;;  %v7739_v23 = vshll.u32 %v3399_v30, 8  ;;  %v3503_v40 = vor.u32 8388608, %v7729_v32 }
 0x2f8   : > { %v3176_v57 = vxor.u32 2147483648, %v4912_v44  ;;  %v3266_v48 = vmul.f32 %v3265_v1, %v3263_v21  ;;  %v3353_v13 = vsub.s32 0, %v7737_v58  ;;  %v3373_v29 = vsub.s32 4, %v7724_v45 }
 0x2f9   : > { %v3180_v2 = vsel %vm3178_vm7, %v3179_v26, %v4912_v44  ;;  %v3406_v49 = vsub.s32 32, %v3405_v43  ;;  %v3408_v59 = vshll.u32 %v5057_v25, %v3405_v43  ;;  %v7746_v61 = vadd.s32 1, %v4567_v28 }
 0x2fa   : > { %v3177_v14 = vsel %vm3175_vm5, %v4910_v24, %v3176_v57  ;;  %v3267_v20 = vxor.u32 2147483648, %v3266_v48  ;;  %v4560_v4 = vmin.u32 %v3353_v13, %v7737_v58  ;;  %v3411_v18 = vshll.u32 %v5058_v27, %v3405_v43 }
 0x2fb   : > { %v3181_v19 = vsel %vm3174_vm6, %v3177_v14, %v3180_v2  ;;  %v3409_v0 = vshrl.u32 %v5058_v27, %v3406_v49  ;;  %v3412_v33 = vshrl.u32 %v8584_v41, %v3406_v49  ;;  %v3602_v30 = vand.u32 2139095040, %v7722_v52 }
 0x2fc   : > { %v3182_v55 = vsel %vm3171_vm3, nan, %v3181_v19  ;;  %v3268_v1 = vsel %vm3185_vm0, %v3267_v20, %v3266_v48  ;;  %v3355_v47 = vclz %v4560_v4  ;;  %v3404_v28 = vshrl.u32 %v3403_v42, 5 }
 0x2fd   : > { %v3271_v24 = vsel %vm7690_vm2, %v7434_v5, %v3268_v1  ;;  %vm3289_vm8 = vcmp.lt.s32.totalorder %v7467_v62, 0  ;;  %v3407_v3 = vshrl.u32 %v5057_v25, %v3406_v49  ;;  %v3410_v21 = vor.u32 %v3409_v0, %v3408_v59  ;;  %4327 = vst [vmem:[%s5207_s16 + $0xc0] sm:$0xff] %v3182_v55 }
 0x2fe   : > { %vm3506_vm9 = vcmp.gt.s32.totalorder %v7746_v61, 0  ;;  %4913 = vcosq.f32 %v3271_v24  ;;  %v4561_v63 = vadd.s32 4294967294, %v3355_v47  ;;  %v3413_v44 = vor.u32 %v3412_v33, %v3411_v18 }
 0x2ff   : > { %v3414_v26 = vshll.u32 %v8584_v41, %v3405_v43  ;;  %4915 = vsinq.f32 %v3271_v24  ;;  %v3415_v42 = vshrl.u32 %v8556_v36, %v3406_v49  ;;  %v3417_v57 = vshll.u32 %v8556_v36, %v3405_v43 }
 0x300   : > { %v3418_v16 = vshrl.u32 %v5061_v38, %v3406_v49  ;;  %vm3282_vm11 = vcmp.eq.s32.totalorder %v7732_v17, 2  ;;  %vm4562_vm10 = vcmp.lt.s32.totalorder %v4561_v63, 0  ;;  %v3420_v48 = vshll.u32 %v5061_v38, %v3405_v43 }
 0x301   : > { %v3421_v13 = vshrl.u32 %v5062_v51, %v3406_v49  ;;  %vm3423_vm12 = vcmp.lt.s32.totalorder %v3404_v28, 1  ;;  %vm3279_vm15 = vcmp.eq.s32.totalorder %v7732_v17, 0  ;;  %v3358_v2 = vsel %vm4562_vm10, 0, %v4561_v63 }
 0x302   : > { %v3416_v59 = vor.u32 %v3415_v42, %v3414_v26  ;;  %v3419_v14 = vor.u32 %v3418_v16, %v3417_v57  ;;  %vm3424_vm13 = vcmp.lt.s32.totalorder %v3404_v28, 2  ;;  %vm3278_vm2 = vcmp.lt.s32.totalorder %v7732_v17, 2 }
 0x303   : > { %vm7777_vm0 = vcmp.le.f32.partialorder %v3287_v39, 0.7853982  ;;  %v3359_v4 = vsub.s32 32, %v3358_v2  ;;  %v3360_v43 = vshll.u32 %v7737_v58, %v3358_v2  ;;  %v3363_v18 = vsub.s32 4294967266, %v3358_v2 }
 0x304   : > { %v3422_v49 = vor.u32 %v3421_v13, %v3420_v48  ;;  %vm3275_vm14 = vweird.f32 %v7434_v5  ;;  %vm3425_vm1 = vcmp.lt.s32.totalorder %v3404_v28, 3  ;;  %vm3426_vm3 = vcmp.lt.s32.totalorder %v3404_v28, 4 }
 0x305   : > { %v3427_v19 = vsel %vm3423_vm12, %v3407_v3, %v3410_v21  ;;  %v3431_v0 = vsel %vm3423_vm12, %v3410_v21, %v3413_v44  ;;  %v3361_v33 = vshrl.u32 %v7735_v56, %v3359_v4  ;;  %v3364_v55 = vadd.s32 127, %v3363_v18 }
 0x306   : > { %v3428_v39 = vsel %vm3426_vm3, %v3416_v59, 2102212464  ;;  %v3432_v1 = vsel %vm3426_vm3, %v3419_v14, 920167782  ;;  %v3435_v58 = vsel %vm3423_vm12, %v3413_v44, %v3416_v59  ;;  %v3436_v63 = vsel %vm3426_vm3, %v3422_v49, 1326507024 }
 0x307   : > { %v3429_v47 = vsel %vm3425_vm1, %v3413_v44, %v3428_v39  ;;  %v3433_v24 = vsel %vm3425_vm1, %v3416_v59, %v3432_v1  ;;  %v3362_v26 = vor.u32 %v3361_v33, %v3360_v43  ;;  %v3365_v42 = vshll.u32 %v3364_v55, 23 }
 0x308   : > { %v3374_v3 = vsel %vm3289_vm8, %v3373_v29, %v7724_v45  ;;  %v3434_v56 = vsel %vm3424_vm13, %v3431_v0, %v3433_v24  ;;  %v3430_v21 = vsel %vm3424_vm13, %v3427_v19, %v3429_v47  ;;  %v3437_v57 = vsel %vm3425_vm1, %v3419_v14, %v3436_v63  ;;  %v4914_v44 = vpop.eup %4913 }
 0x309   : > { %v7798_v16 = vmul.u32.u64.low %v7739_v23, %v3434_v56  ;;  %v7799_v48 = vmul.u32.u64.high %v7739_v23, %v3434_v56, %v7798_v16  ;;  %v3366_v13 = vor.u32 4788187, %v3365_v42  ;;  %v3369_v2 = vcvt.s32.f32 %v3362_v26  ;;  %v4916_v29 = vpop.eup %4915 }
 0x30a   : > { %v3438_v59 = vsel %vm3424_vm13, %v3435_v58, %v3437_v57  ;;  %v3507_v45 = vsel %vm3506_vm9, %v7746_v61, 0  ;;  %v3283_v4 = vxor.u32 2147483648, %v4914_v44  ;;  %v7812_v14 = vshll.u32 %v3503_v40, 8 }
 0x30b   : > { %v7807_v43 = vmul.u32.u64.low %v7739_v23, %v3438_v59  ;;  %v7808_v18 = vmul.u32.u64.high %v7739_v23, %v3438_v59, %v7807_v43  ;;  %v3280_v49 = vxor.u32 2147483648, %v4916_v29  ;;  %v3367_v19 = vand.u32 2147483647, %v3366_v13 }
 0x30c   : > { %v7814_v0 = vshrl.u32 %v3507_v45, 5  ;;  %v3509_v28 = vand.u32 31, %v3507_v45  ;;  %v3284_v33 = vsel %vm3282_vm11, %v3283_v4, %v4916_v29  ;;  %v3376_v61 = vsel %vm7777_vm0, 0, %v3374_v3 }
 0x30d   : > { %v3446_v55 = vmul.u32 %v7739_v23, %v3430_v21  ;;  %v3449_v39 = vadd.s32 1, %v7799_v48  ;;  %v3281_v32 = vsel %vm3279_vm15, %v4914_v44, %v3280_v49  ;;  %v3370_v40 = vmul.f32 %v3369_v2, %v3367_v19 }
 0x30e   : > { %v3510_v1 = vsub.s32 32, %v3509_v28  ;;  %v3603_v47 = vshrl.u32 %v3602_v30, 23  ;;  %v3285_v24 = vsel %vm3278_vm2, %v3281_v32, %v3284_v33  ;;  %vm3448_vm4 = vc.u32 %v7808_v18, %v7798_v16 }
 0x30f   : > { %v3512_v58 = vshll.u32 %v5057_v25, %v3509_v28  ;;  %v3515_v23 = vshll.u32 %v5058_v27, %v3509_v28  ;;  %v3286_v63 = vsel %vm3275_vm14, nan, %v3285_v24  ;;  %v3371_v26 = vxor.u32 2147483648, %v3370_v40 }
 0x310   : > { %v3450_v42 = vsel %vm3448_vm4, %v3449_v39, %v7799_v48  ;;  %vm3527_vm6 = vcmp.lt.s32.totalorder %v7814_v0, 1  ;;  %v3513_v30 = vshrl.u32 %v5058_v27, %v3510_v1  ;;  %v3516_v17 = vshrl.u32 %v8584_v41, %v3510_v1  ;;  %4328 = vst [vmem:[%s5207_s16 + $0xc8] sm:$0xff] %v3286_v63 }
 0x311   : > { %v3451_v3 = vadd.s32 %v3450_v42, %v3446_v55  ;;  %v3518_v56 = vshll.u32 %v8584_v41, %v3509_v28  ;;  %v3372_v21 = vsel %vm3289_vm8, %v3371_v26, %v3370_v40  ;;  %v3519_v57 = vshrl.u32 %v8556_v36, %v3510_v1 }
 0x312   : > { %v3521_v5 = vshll.u32 %v8556_v36, %v3509_v28  ;;  %v3522_v44 = vshrl.u32 %v5061_v38, %v3510_v1  ;;  %v3375_v48 = vsel %vm7777_vm0, %v7467_v62, %v3372_v21  ;;  %v3514_v2 = vor.u32 %v3513_v30, %v3512_v58 }
 0x313   : > { %v3452_v13 = vadd.s32 536870912, %v3451_v3  ;;  %v3517_v59 = vor.u32 %v3516_v17, %v3515_v23  ;;  %4917 = vcosq.f32 %v3375_v48  ;;  %v3511_v45 = vshrl.u32 %v5057_v25, %v3510_v1 }
 0x314   : > { %v3523_v29 = vor.u32 %v3522_v44, %v3521_v5  ;;  %v3524_v4 = vshll.u32 %v5061_v38, %v3509_v28  ;;  %4919 = vsinq.f32 %v3375_v48  ;;  %v3520_v49 = vor.u32 %v3519_v57, %v3518_v56 }
 0x315   : > { %v3453_v43 = vshrl.u32 %v3452_v13, 30  ;;  %v3525_v19 = vshrl.u32 %v5062_v51, %v3510_v1  ;;  %v3380_v33 = vadd.s32 3, %v3376_v61  ;;  %vm3528_vm5 = vcmp.lt.s32.totalorder %v7814_v0, 2 }
 0x316   : > { %vm3529_vm7 = vcmp.lt.s32.totalorder %v7814_v0, 3  ;;  %vm3530_vm8 = vcmp.lt.s32.totalorder %v7814_v0, 4  ;;  %v3535_v28 = vsel %vm3527_vm6, %v3514_v2, %v3517_v59  ;;  %v3531_v32 = vsel %vm3527_vm6, %v3511_v45, %v3514_v2 }
 0x317   : > { %v3454_v20 = vshll.u32 %v3453_v43, 30  ;;  %v3526_v55 = vor.u32 %v3525_v19, %v3524_v4  ;;  %v3532_v39 = vsel %vm3530_vm8, %v3520_v49, 2102212464  ;;  %v3536_v40 = vsel %vm3530_vm8, %v3523_v29, 920167782 }
 0x318   : > { %v3533_v61 = vsel %vm3529_vm7, %v3517_v59, %v3532_v39  ;;  %v4571_v1 = vadd.s32 4294967169, %v3603_v47  ;;  %v7866_v24 = vmul.f32 %v7388_v22, %v5232_v31  ;;  %v3537_v23 = vsel %vm3529_vm7, %v3520_v49, %v3536_v40 }
 0x319   : > { %v7868_v58 = vsub.s32 %v3451_v3, %v3454_v20  ;;  %v3539_v63 = vsel %vm3527_vm6, %v3517_v59, %v3520_v49  ;;  %v7876_v26 = vmul.f32 %v7522_v6, %v5232_v31  ;;  %v3381_v42 = vand.u32 3, %v3380_v33 }
 0x31a   : > { %v3538_v47 = vsel %vm3528_vm5, %v3535_v28, %v3537_v23  ;;  %v3540_v22 = vsel %vm3530_vm8, %v3526_v55, 1326507024  ;;  %v7884_v3 = vadd.f32 %v7651_v37, %v5240_v34  ;;  %v3534_v17 = vsel %vm3528_vm5, %v3531_v32, %v3533_v61 }
 0x31b   : > { %v3457_v30 = vsub.s32 0, %v7868_v58  ;;  %v3541_v6 = vsel %vm3529_vm7, %v3523_v29, %v3540_v22  ;;  %v7894_v21 = vmul.u32.u64.low %v7812_v14, %v3538_v47  ;;  %v7895_v57 = vmul.u32.u64.high %v7812_v14, %v3538_v47, %v7894_v21 }
 0x31c   : > { %v3542_v56 = vsel %vm3528_vm5, %v3539_v63, %v3541_v6  ;;  %v3609_v5 = vadd.s32 1, %v4571_v1  ;;  %vm3379_vm9 = vweird.f32 %v7467_v62  ;;  %vm3383_vm11 = vcmp.eq.s32.totalorder %v3381_v42, 0 }
 0x31d   : > { %v4564_v37 = vmin.u32 %v3457_v30, %v7868_v58  ;;  %v7901_v44 = vmul.u32.u64.low %v7812_v14, %v3542_v56  ;;  %v7902_v48 = vmul.u32.u64.high %v7812_v14, %v3542_v56, %v7901_v44  ;;  %v4918_v13 = vpop.eup %4917  ;;  %vm3386_vm10 = vcmp.eq.s32.totalorder %v3381_v42, 2 }
 0x31e   : > { %vm3393_vm12 = vcmp.lt.s32.totalorder %v7662_v54, 0  ;;  %vm3610_vm15 = vcmp.gt.s32.totalorder %v3609_v5, 0  ;;  %v4920_v0 = vpop.eup %4919  ;;  %v3387_v2 = vxor.u32 2147483648, %v4918_v13  ;;  %v3477_v45 = vsub.s32 4, %v3453_v43 }
 0x31f   : > { %v3459_v59 = vclz %v4564_v37  ;;  %v3550_v29 = vmul.u32 %v7812_v14, %v3534_v17  ;;  %vm3382_vm13 = vcmp.lt.s32.totalorder %v3381_v42, 2  ;;  %v3384_v4 = vxor.u32 2147483648, %v4920_v0 }
 0x320   : > { %v3553_v49 = vadd.s32 1, %v7895_v57  ;;  %v3611_v19 = vsel %vm3610_vm15, %v3609_v5, 0  ;;  %v3388_v33 = vsel %vm3386_vm10, %v3387_v2, %v4920_v0  ;;  %vm3552_vm2 = vc.u32 %v7902_v48, %v7894_v21 }
 0x321   : > { %v4565_v20 = vadd.s32 4294967294, %v3459_v59  ;;  %v3599_v55 = vand.u32 2147483647, %v7722_v52  ;;  %v3385_v39 = vsel %vm3383_vm11, %v4918_v13, %v3384_v4  ;;  %v3447_v28 = vadd.s32 %v7798_v16, %v7808_v18 }
 0x322   : > { %v3554_v14 = vsel %vm3552_vm2, %v3553_v49, %v7895_v57  ;;  %v3613_v32 = vand.u32 31, %v3611_v19  ;;  %v3389_v61 = vsel %vm3382_vm13, %v3385_v39, %v3388_v33  ;;  %v3478_v40 = vsel %vm3393_vm12, %v3477_v45, %v3453_v43 }
 0x323   : > { %vm4566_vm0 = vcmp.lt.s32.totalorder %v4565_v20, 0  ;;  %v3555_v1 = vadd.s32 %v3554_v14, %v3550_v29  ;;  %v3390_v23 = vsel %vm3379_vm9, nan, %v3389_v61  ;;  %vm7920_vm14 = vcmp.le.f32.partialorder %v3391_v15, 0.7853982 }
 0x324   : > { %v3462_v42 = vsel %vm4566_vm0, 0, %v4565_v20  ;;  %v3614_v16 = vsub.s32 32, %v3613_v32  ;;  %4329 = vst [vmem:[%s5207_s16 + $0xd0] sm:$0xff] %v3390_v23  ;;  %v3480_v43 = vsel %vm7920_vm14, 0, %v3478_v40  ;;  %v3606_v62 = vand.u32 8388607, %v3599_v55 }
 0x325   : > { %v3463_v18 = vsub.s32 32, %v3462_v42  ;;  %v3464_v47 = vshll.u32 %v7868_v58, %v3462_v42  ;;  %v3467_v22 = vsub.s32 4294967266, %v3462_v42  ;;  %v3556_v30 = vadd.s32 536870912, %v3555_v1 }
 0x326   : > { %v3616_v17 = vshll.u32 %v5057_v25, %v3613_v32  ;;  %v3617_v15 = vshrl.u32 %v5058_v27, %v3614_v16  ;;  %v3619_v5 = vshll.u32 %v5058_v27, %v3613_v32  ;;  %v3620_v58 = vshrl.u32 %v8584_v41, %v3614_v16 }
 0x327   : > { %v3465_v6 = vshrl.u32 %v3447_v28, %v3463_v18  ;;  %v3468_v56 = vadd.s32 127, %v3467_v22  ;;  %v7932_v57 = vshrl.u32 %v3556_v30, 30  ;;  %v3622_v37 = vshll.u32 %v8584_v41, %v3613_v32 }
 0x328   : > { %v3623_v44 = vshrl.u32 %v8556_v36, %v3614_v16  ;;  %v3625_v13 = vshll.u32 %v8556_v36, %v3613_v32  ;;  %v3612_v45 = vshrl.u32 %v3611_v19, 5  ;;  %v3607_v29 = vor.u32 8388608, %v3606_v62 }
 0x329   : > { %v3466_v0 = vor.u32 %v3465_v6, %v3464_v47  ;;  %v3469_v2 = vshll.u32 %v3468_v56, 23  ;;  %v3558_v59 = vshll.u32 %v7932_v57, 30  ;;  %v3626_v4 = vshrl.u32 %v5061_v38, %v3614_v16 }
 0x32a   : > { %v3628_v49 = vshll.u32 %v5061_v38, %v3613_v32  ;;  %v3629_v33 = vshrl.u32 %v5062_v51, %v3614_v16  ;;  %v3618_v14 = vor.u32 %v3617_v15, %v3616_v17  ;;  %v3621_v61 = vor.u32 %v3620_v58, %v3619_v5 }
 0x32b   : > { %v3470_v20 = vor.u32 4788187, %v3469_v2  ;;  %v3473_v39 = vcvt.s32.f32 %v3466_v0  ;;  %v7943_v28 = vsub.s32 %v3555_v1, %v3558_v59  ;;  %v3624_v40 = vor.u32 %v3623_v44, %v3622_v37 }
 0x32c   : > { %v3627_v23 = vor.u32 %v3626_v4, %v3625_v13  ;;  %v3630_v42 = vor.u32 %v3629_v33, %v3628_v49  ;;  %v3615_v19 = vshrl.u32 %v5057_v25, %v3614_v16  ;;  %vm3631_vm1 = vcmp.lt.s32.totalorder %v3612_v45, 1 }
 0x32d   : > { %v3471_v18 = vand.u32 2147483647, %v3470_v20  ;;  %v3561_v47 = vsub.s32 0, %v7943_v28  ;;  %v3484_v22 = vadd.s32 3, %v3480_v43  ;;  %vm3497_vm3 = vcmp.lt.s32.totalorder %v7686_v46, 0 }
 0x32e   : > { %vm3632_vm4 = vcmp.lt.s32.totalorder %v3612_v45, 2  ;;  %vm3634_vm6 = vcmp.lt.s32.totalorder %v3612_v45, 4  ;;  %v3647_v32 = vshll.u32 %v3607_v29, 8  ;;  %vm3633_vm5 = vcmp.lt.s32.totalorder %v3612_v45, 3 }
 0x32f   : > { %v3474_v30 = vmul.f32 %v3473_v39, %v3471_v18  ;;  %v4568_v1 = vmin.u32 %v3561_v47, %v7943_v28  ;;  %v3636_v62 = vsel %vm3634_vm6, %v3624_v40, 2102212464  ;;  %v3639_v17 = vsel %vm3631_vm1, %v3618_v14, %v3621_v61 }
 0x330   : > { %v3640_v15 = vsel %vm3634_vm6, %v3627_v23, 920167782  ;;  %v3643_v6 = vsel %vm3631_vm1, %v3621_v61, %v3624_v40  ;;  %v3644_v56 = vsel %vm3634_vm6, %v3630_v42, 1326507024  ;;  %v3635_v43 = vsel %vm3631_vm1, %v3615_v19, %v3618_v14 }
 0x331   : > { %v3475_v5 = vxor.u32 2147483648, %v3474_v30  ;;  %v3563_v16 = vclz %v4568_v1  ;;  %v3637_v58 = vsel %vm3633_vm5, %v3621_v61, %v3636_v62  ;;  %v3551_v37 = vadd.s32 %v7894_v21, %v7902_v48 }
 0x332   : > { %v3581_v44 = vsub.s32 4, %v7932_v57  ;;  %v3641_v13 = vsel %vm3633_vm5, %v3624_v40, %v3640_v15  ;;  %v3645_v0 = vsel %vm3633_vm5, %v3627_v23, %v3644_v56  ;;  %v3638_v33 = vsel %vm3632_vm4, %v3635_v43, %v3637_v58 }
 0x333   : > { %v3476_v2 = vsel %vm3393_vm12, %v3475_v5, %v3474_v30  ;;  %v4569_v59 = vadd.s32 4294967294, %v3563_v16  ;;  %v3642_v29 = vsel %vm3632_vm4, %v3639_v17, %v3641_v13  ;;  %v3646_v4 = vsel %vm3632_vm4, %v3643_v6, %v3645_v0 }
 0x334   : > { %v3479_v49 = vsel %vm7920_vm14, %v7662_v54, %v3476_v2  ;;  %v7963_v20 = vmul.u32.u64.low %v3647_v32, %v3646_v4  ;;  %v7964_v21 = vmul.u32.u64.high %v3647_v32, %v3646_v4, %v7963_v20  ;;  %v3703_v61 = vand.u32 2147483647, %v7884_v3 }
 0x335   : > { %4921 = vcosq.f32 %v3479_v49  ;;  %vm4570_vm7 = vcmp.lt.s32.totalorder %v4569_v59, 0  ;;  %v7966_v48 = vmul.u32.u64.low %v3647_v32, %v3642_v29  ;;  %v7967_v39 = vmul.u32.u64.high %v3647_v32, %v3642_v29, %v7966_v48 }
 0x336   : > { %4923 = vsinq.f32 %v3479_v49  ;;  %v3566_v14 = vsel %vm4570_vm7, 0, %v4569_v59  ;;  %v3706_v40 = vand.u32 2139095040, %v7884_v3  ;;  %v3582_v45 = vsel %vm3497_vm3, %v3581_v44, %v7932_v57 }
 0x337   : > { %v3567_v23 = vsub.s32 32, %v3566_v14  ;;  %v3568_v63 = vshll.u32 %v7943_v28, %v3566_v14  ;;  %v3571_v42 = vsub.s32 4294967266, %v3566_v14  ;;  %v7977_v18 = vadd.f32 %v7682_v50, %v5240_v34 }
 0x338   : > { %v3654_v47 = vmul.u32 %v3647_v32, %v3638_v33  ;;  %vm3656_vm8 = vc.u32 %v7964_v21, %v7966_v48  ;;  %v3707_v19 = vshrl.u32 %v3706_v40, 23  ;;  %vm7982_vm9 = vcmp.le.f32.partialorder %v3495_v35, 0.7853982 }
 0x339   : > { %v3569_v28 = vshrl.u32 %v3551_v37, %v3567_v23  ;;  %v3572_v1 = vadd.s32 127, %v3571_v42  ;;  %v3657_v62 = vadd.s32 1, %v7967_v39  ;;  %v7989_v57 = vmul.f32 %v7394_v53, %v5232_v31 }
 0x33a   : > { %v3485_v50 = vand.u32 3, %v3484_v22  ;;  %v3584_v32 = vsel %vm7982_vm9, 0, %v3582_v45  ;;  %v4575_v17 = vadd.s32 4294967169, %v3707_v19  ;;  %v3710_v56 = vand.u32 8388607, %v3703_v61 }
 0x33b   : > { %v3570_v15 = vor.u32 %v3569_v28, %v3568_v63  ;;  %v3573_v6 = vshll.u32 %v3572_v1, 23  ;;  %v3658_v35 = vsel %vm3656_vm8, %v3657_v62, %v7967_v39  ;;  %v7998_v5 = vadd.f32 %v7718_v60, %v5240_v34 }
 0x33c   : > { %v3659_v16 = vadd.s32 %v3658_v35, %v3654_v47  ;;  %v3713_v43 = vadd.s32 1, %v4575_v17  ;;  %v3810_v31 = vand.u32 2139095040, %v7977_v18  ;;  %vm3483_vm11 = vweird.f32 %v7662_v54 }
 0x33d   : > { %v3574_v53 = vor.u32 4788187, %v3573_v6  ;;  %v3577_v22 = vcvt.s32.f32 %v3570_v15  ;;  %v3588_v58 = vadd.s32 3, %v3584_v32  ;;  %vm3487_vm10 = vcmp.eq.s32.totalorder %v3485_v50, 0 }
 0x33e   : > { %v3660_v37 = vadd.s32 536870912, %v3659_v16  ;;  %vm3714_vm12 = vcmp.gt.s32.totalorder %v3713_v43, 0  ;;  %v3807_v44 = vand.u32 2147483647, %v7977_v18  ;;  %vm3490_vm15 = vcmp.eq.s32.totalorder %v3485_v50, 2 }
 0x33f   : > { %v4922_v13 = vpop.eup %4921  ;;  %v3575_v0 = vand.u32 2147483647, %v3574_v53  ;;  %v3711_v2 = vor.u32 8388608, %v3710_v56  ;;  %v3715_v60 = vsel %vm3714_vm12, %v3713_v43, 0  ;;  %v3811_v33 = vshrl.u32 %v3810_v31, 23 }
 0x340   : > { %v4924_v59 = vpop.eup %4923  ;;  %v3491_v29 = vxor.u32 2147483648, %v4922_v13  ;;  %v8003_v4 = vshrl.u32 %v3660_v37, 30  ;;  %v3717_v49 = vand.u32 31, %v3715_v60  ;;  %vm3486_vm13 = vcmp.lt.s32.totalorder %v3485_v50, 2 }
 0x341   : > { %v3488_v20 = vxor.u32 2147483648, %v4924_v59  ;;  %v3578_v39 = vmul.f32 %v3577_v22, %v3575_v0  ;;  %v8005_v14 = vand.u32 3, %v3588_v58  ;;  %v8010_v42 = vand.u32 8388607, %v3807_v44 }
 0x342   : > { %v3492_v40 = vsel %vm3490_vm15, %v3491_v29, %v4924_v59  ;;  %v3662_v23 = vshll.u32 %v8003_v4, 30  ;;  %v3718_v63 = vsub.s32 32, %v3717_v49  ;;  %v8014_v19 = vadd.s32 %v7966_v48, %v7964_v21 }
 0x343   : > { %v3489_v45 = vsel %vm3487_vm10, %v4922_v13, %v3488_v20  ;;  %v3579_v47 = vxor.u32 2147483648, %v3578_v39  ;;  %v8016_v28 = vshll.u32 %v3711_v2, 8  ;;  %v3720_v32 = vshll.u32 %v5057_v25, %v3717_v49 }
 0x344   : > { %v3493_v1 = vsel %vm3486_vm13, %v3489_v45, %v3492_v40  ;;  %v8018_v62 = vsub.s32 %v3659_v16, %v3662_v23  ;;  %v4579_v17 = vadd.s32 4294967169, %v3811_v33  ;;  %v3721_v6 = vshrl.u32 %v5058_v27, %v3718_v63 }
 0x345   : > { %v3494_v15 = vsel %vm3483_vm11, nan, %v3493_v1  ;;  %v3580_v50 = vsel %vm3497_vm3, %v3579_v47, %v3578_v39  ;;  %v3723_v35 = vshll.u32 %v5058_v27, %v3717_v49  ;;  %vm3601_vm2 = vcmp.lt.s32.totalorder %v7722_v52, 0 }
 0x346   : > { %v3583_v21 = vsel %vm7982_vm9, %v7686_v46, %v3580_v50  ;;  %v3665_v48 = vsub.s32 0, %v8018_v62  ;;  %v3724_v56 = vshrl.u32 %v8584_v41, %v3718_v63  ;;  %v3815_v54 = vor.u32 8388608, %v8010_v42  ;;  %4330 = vst [vmem:[%s5207_s16 + $0xd8] sm:$0xff] %v3494_v15 }
 0x347   : > { %4925 = vcosq.f32 %v3583_v21  ;;  %v3716_v16 = vshrl.u32 %v3715_v60, 5  ;;  %v3726_v43 = vshll.u32 %v8584_v41, %v3717_v49  ;;  %v3727_v31 = vshrl.u32 %v8556_v36, %v3718_v63 }
 0x348   : > { %4927 = vsinq.f32 %v3583_v21  ;;  %v4572_v53 = vmin.u32 %v3665_v48, %v8018_v62  ;;  %v3719_v30 = vshrl.u32 %v5057_v25, %v3718_v63  ;;  %v3722_v22 = vor.u32 %v3721_v6, %v3720_v32 }
 0x349   : > { %vm3594_vm0 = vcmp.eq.s32.totalorder %v8005_v14, 2  ;;  %v3725_v58 = vor.u32 %v3724_v56, %v3723_v35  ;;  %v3729_v37 = vshll.u32 %v8556_v36, %v3717_v49  ;;  %v3730_v13 = vshrl.u32 %v5061_v38, %v3718_v63 }
 0x34a   : > { %v3732_v0 = vshll.u32 %v5061_v38, %v3717_v49  ;;  %vm3591_vm14 = vcmp.eq.s32.totalorder %v8005_v14, 0  ;;  %v3667_v2 = vclz %v4572_v53  ;;  %v3685_v60 = vsub.s32 4, %v8003_v4 }
 0x34b   : > { %v3728_v59 = vor.u32 %v3727_v31, %v3726_v43  ;;  %v3817_v29 = vadd.s32 1, %v4579_v17  ;;  %vm3590_vm1 = vcmp.lt.s32.totalorder %v8005_v14, 2  ;;  %vm8048_vm3 = vcmp.le.f32.partialorder %v3599_v55, 0.7853982 }
 0x34c   : > { %v3731_v20 = vor.u32 %v3730_v13, %v3729_v37  ;;  %v3733_v39 = vshrl.u32 %v5062_v51, %v3718_v63  ;;  %vm3735_vm4 = vcmp.lt.s32.totalorder %v3716_v16, 1  ;;  %vm3736_vm6 = vcmp.lt.s32.totalorder %v3716_v16, 2 }
 0x34d   : > { %vm3587_vm5 = vweird.f32 %v7686_v46  ;;  %v4573_v49 = vadd.s32 4294967294, %v3667_v2  ;;  %vm3737_vm7 = vcmp.lt.s32.totalorder %v3716_v16, 3  ;;  %vm3738_vm8 = vcmp.lt.s32.totalorder %v3716_v16, 4 }
 0x34e   : > { %v3739_v40 = vsel %vm3735_vm4, %v3719_v30, %v3722_v22  ;;  %v3734_v23 = vor.u32 %v3733_v39, %v3732_v0  ;;  %v3740_v45 = vsel %vm3738_vm8, %v3728_v59, 2102212464  ;;  %v3743_v47 = vsel %vm3735_vm4, %v3722_v22, %v3725_v58 }
 0x34f   : > { %v3744_v1 = vsel %vm3738_vm8, %v3731_v20, 920167782  ;;  %vm4574_vm9 = vcmp.lt.s32.totalorder %v4573_v49, 0  ;;  %v3741_v55 = vsel %vm3737_vm7, %v3725_v58, %v3740_v45  ;;  %v3747_v17 = vsel %vm3735_vm4, %v3725_v58, %v3728_v59 }
 0x350   : > { %v3745_v32 = vsel %vm3737_vm7, %v3728_v59, %v3744_v1  ;;  %v3670_v15 = vsel %vm4574_vm9, 0, %v4573_v49  ;;  %v3686_v63 = vsel %vm3601_vm2, %v3685_v60, %v8003_v4  ;;  %v3748_v6 = vsel %vm3738_vm8, %v3734_v23, 1326507024 }
 0x351   : > { %v3746_v50 = vsel %vm3736_vm6, %v3743_v47, %v3745_v32  ;;  %v3671_v35 = vsub.s32 32, %v3670_v15  ;;  %v3672_v21 = vshll.u32 %v8018_v62, %v3670_v15  ;;  %v3675_v48 = vsub.s32 4294967266, %v3670_v15  ;;  %v4926_v43 = vpop.eup %4925 }
 0x352   : > { %v3749_v56 = vsel %vm3737_vm7, %v3731_v20, %v3748_v6  ;;  %v3742_v31 = vsel %vm3736_vm6, %v3739_v40, %v3741_v55  ;;  %v8065_v30 = vmul.u32.u64.low %v8016_v28, %v3746_v50  ;;  %v8066_v22 = vmul.u32.u64.high %v8016_v28, %v3746_v50, %v8065_v30  ;;  %v4928_v4 = vpop.eup %4927 }
 0x353   : > { %v3750_v53 = vsel %vm3736_vm6, %v3747_v17, %v3749_v56  ;;  %v3595_v58 = vxor.u32 2147483648, %v4926_v43  ;;  %v3673_v37 = vshrl.u32 %v8014_v19, %v3671_v35  ;;  %v3676_v13 = vadd.s32 127, %v3675_v48 }
 0x354   : > { %vm3818_vm11 = vcmp.gt.s32.totalorder %v3817_v29, 0  ;;  %v3592_v62 = vxor.u32 2147483648, %v4928_v4  ;;  %v8071_v0 = vmul.u32.u64.low %v8016_v28, %v3750_v53  ;;  %v8072_v2 = vmul.u32.u64.high %v8016_v28, %v3750_v53, %v8071_v0 }
 0x355   : > { %v3819_v60 = vsel %vm3818_vm11, %v3817_v29, 0  ;;  %v3596_v16 = vsel %vm3594_vm0, %v3595_v58, %v4928_v4  ;;  %v3674_v59 = vor.u32 %v3673_v37, %v3672_v21  ;;  %v3677_v20 = vshll.u32 %v3676_v13, 23 }
 0x356   : > { %v3688_v39 = vsel %vm8048_vm3, 0, %v3686_v63  ;;  %v3593_v49 = vsel %vm3591_vm14, %v4926_v43, %v3592_v62  ;;  %v3758_v19 = vmul.u32 %v8016_v28, %v3742_v31  ;;  %v3761_v40 = vadd.s32 1, %v8066_v22 }
 0x357   : > { %v3821_v23 = vand.u32 31, %v3819_v60  ;;  %v3597_v29 = vsel %vm3590_vm1, %v3593_v49, %v3596_v16  ;;  %v3678_v45 = vor.u32 4788187, %v3677_v20  ;;  %v3681_v47 = vcvt.s32.f32 %v3674_v59 }
 0x358   : > { %v8086_v1 = vshll.u32 %v3815_v54, 8  ;;  %v3598_v55 = vsel %vm3587_vm5, nan, %v3597_v29  ;;  %v3692_v32 = vadd.s32 3, %v3688_v39  ;;  %vm3760_vm10 = vc.u32 %v8072_v2, %v8065_v30 }
 0x359   : > { %v3822_v28 = vsub.s32 32, %v3821_v23  ;;  %v3679_v17 = vand.u32 2147483647, %v3678_v45  ;;  %v3762_v15 = vsel %vm3760_vm10, %v3761_v40, %v8066_v22  ;;  %v3824_v14 = vshll.u32 %v5057_v25, %v3821_v23  ;;  %4331 = vst [vmem:[%s5207_s16 + $0xe0] sm:$0xff] %v3598_v55 }
 0x35a   : > { %v3827_v63 = vshll.u32 %v5058_v27, %v3821_v23  ;;  %v3763_v50 = vadd.s32 %v3762_v15, %v3758_v19  ;;  %v3820_v42 = vshrl.u32 %v3819_v60, 5  ;;  %v3830_v35 = vshll.u32 %v8584_v41, %v3821_v23 }
 0x35b   : > { %v3825_v54 = vshrl.u32 %v5058_v27, %v3822_v28  ;;  %v3828_v46 = vshrl.u32 %v8584_v41, %v3822_v28  ;;  %v3682_v6 = vmul.f32 %v3681_v47, %v3679_v17  ;;  %v3831_v21 = vshrl.u32 %v8556_v36, %v3822_v28 }
 0x35c   : > { %v3833_v48 = vshll.u32 %v8556_v36, %v3821_v23  ;;  %v3764_v56 = vadd.s32 536870912, %v3763_v50  ;;  %v3823_v43 = vshrl.u32 %v5057_v25, %v3822_v28  ;;  %v3834_v53 = vshrl.u32 %v5061_v38, %v3822_v28 }
 0x35d   : > { %v3826_v31 = vor.u32 %v3825_v54, %v3824_v14  ;;  %v3683_v22 = vxor.u32 2147483648, %v3682_v6  ;;  %v3829_v4 = vor.u32 %v3828_v46, %v3827_v63  ;;  %v3836_v58 = vshll.u32 %v5061_v38, %v3821_v23 }
 0x35e   : > { %v3837_v37 = vshrl.u32 %v5062_v51, %v3822_v28  ;;  %v3765_v13 = vshrl.u32 %v3764_v56, 30  ;;  %v3832_v62 = vor.u32 %v3831_v21, %v3830_v35  ;;  %v3835_v0 = vor.u32 %v3834_v53, %v3833_v48 }
 0x35f   : > { %vm3839_vm12 = vcmp.lt.s32.totalorder %v3820_v42, 1  ;;  %v3684_v60 = vsel %vm3601_vm2, %v3683_v22, %v3682_v6  ;;  %vm3840_vm15 = vcmp.lt.s32.totalorder %v3820_v42, 2  ;;  %vm3842_vm13 = vcmp.lt.s32.totalorder %v3820_v42, 4 }
 0x360   : > { %v3838_v16 = vor.u32 %v3837_v37, %v3836_v58  ;;  %v3687_v59 = vsel %vm8048_vm3, %v7722_v52, %v3684_v60  ;;  %v3766_v20 = vshll.u32 %v3765_v13, 30  ;;  %vm3841_vm0 = vcmp.lt.s32.totalorder %v3820_v42, 3 }
 0x361   : > { %v3844_v39 = vsel %vm3842_vm13, %v3832_v62, 2102212464  ;;  %4929 = vcosq.f32 %v3687_v59  ;;  %v3843_v49 = vsel %vm3839_vm12, %v3823_v43, %v3826_v31  ;;  %v3847_v19 = vsel %vm3839_vm12, %v3826_v31, %v3829_v4 }
 0x362   : > { %v3848_v40 = vsel %vm3842_vm13, %v3835_v0, 920167782  ;;  %4931 = vsinq.f32 %v3687_v59  ;;  %v8114_v23 = vsub.s32 %v3763_v50, %v3766_v20  ;;  %v3789_v29 = vsub.s32 4, %v3765_v13 }
 0x363   : > { %v3845_v45 = vsel %vm3841_vm0, %v3829_v4, %v3844_v39  ;;  %vm3705_vm2 = vcmp.lt.s32.totalorder %v7884_v3, 0  ;;  %v3849_v33 = vsel %vm3841_vm0, %v3832_v62, %v3848_v40  ;;  %v3851_v47 = vsel %vm3839_vm12, %v3829_v4, %v3832_v62 }
 0x364   : > { %v3852_v55 = vsel %vm3842_vm13, %v3838_v16, 1326507024  ;;  %v3693_v28 = vand.u32 3, %v3692_v32  ;;  %v3769_v17 = vsub.s32 0, %v8114_v23  ;;  %v3850_v15 = vsel %vm3840_vm15, %v3847_v19, %v3849_v33 }
 0x365   : > { %v3853_v14 = vsel %vm3841_vm0, %v3835_v0, %v3852_v55  ;;  %v3846_v63 = vsel %vm3840_vm15, %v3843_v49, %v3845_v45  ;;  %v8127_v54 = vmul.u32.u64.low %v8086_v1, %v3850_v15  ;;  %v8128_v46 = vmul.u32.u64.high %v8086_v1, %v3850_v15, %v8127_v54 }
 0x366   : > { %v3854_v50 = vsel %vm3840_vm15, %v3851_v47, %v3853_v14  ;;  %v4576_v6 = vmin.u32 %v3769_v17, %v8114_v23  ;;  %v3790_v32 = vsel %vm3705_vm2, %v3789_v29, %v3765_v13  ;;  %v8140_v48 = vadd.f32 %v7866_v24, %v5240_v34 }
 0x367   : > { %v8135_v35 = vmul.u32.u64.low %v8086_v1, %v3854_v50  ;;  %v8136_v21 = vmul.u32.u64.high %v8086_v1, %v3854_v50, %v8135_v35  ;;  %v8144_v42 = vadd.f32 %v7876_v26, %v5240_v34  ;;  %vm3691_vm14 = vweird.f32 %v7722_v52 }
 0x368   : > { %v3914_v56 = vand.u32 2139095040, %v7998_v5  ;;  %vm8150_vm1 = vcmp.le.f32.partialorder %v3703_v61, 0.7853982  ;;  %v3771_v31 = vclz %v4576_v6  ;;  %v3862_v53 = vmul.u32 %v8086_v1, %v3846_v63 }
 0x369   : > { %v3911_v24 = vand.u32 2147483647, %v7998_v5  ;;  %vm3694_vm3 = vcmp.lt.s32.totalorder %v3693_v28, 2  ;;  %v3792_v26 = vsel %vm8150_vm1, 0, %v3790_v32  ;;  %v3865_v22 = vadd.s32 1, %v8128_v46 }
 0x36a   : > { %v3915_v4 = vshrl.u32 %v3914_v56, 23  ;;  %vm3695_vm4 = vcmp.eq.s32.totalorder %v3693_v28, 0  ;;  %vm3698_vm6 = vcmp.eq.s32.totalorder %v3693_v28, 2  ;;  %v4577_v58 = vadd.s32 4294967294, %v3771_v31 }
 0x36b   : > { %vm3864_vm5 = vc.u32 %v8136_v21, %v8127_v54  ;;  %v4930_v61 = vpop.eup %4929  ;;  %v3759_v37 = vadd.s32 %v8065_v30, %v8072_v2  ;;  %v4018_v62 = vand.u32 2139095040, %v8140_v48  ;;  %v3796_v16 = vadd.s32 3, %v3792_v26 }
 0x36c   : > { %v3866_v1 = vsel %vm3864_vm5, %v3865_v22, %v8128_v46  ;;  %v4583_v13 = vadd.s32 4294967169, %v3915_v4  ;;  %v4932_v0 = vpop.eup %4931  ;;  %v3699_v60 = vxor.u32 2147483648, %v4930_v61  ;;  %vm4578_vm7 = vcmp.lt.s32.totalorder %v4577_v58, 0 }
 0x36d   : > { %v3867_v59 = vadd.s32 %v3866_v1, %v3862_v53  ;;  %v3696_v20 = vxor.u32 2147483648, %v4932_v0  ;;  %v3774_v39 = vsel %vm4578_vm7, 0, %v4577_v58  ;;  %v3918_v49 = vand.u32 8388607, %v3911_v24 }
 0x36e   : > { %v3921_v19 = vadd.s32 1, %v4583_v13  ;;  %v3700_v40 = vsel %vm3698_vm6, %v3699_v60, %v4932_v0  ;;  %v3775_v29 = vsub.s32 32, %v3774_v39  ;;  %v3776_v30 = vshll.u32 %v8114_v23, %v3774_v39 }
 0x36f   : > { %v3779_v2 = vsub.s32 4294967266, %v3774_v39  ;;  %v3697_v45 = vsel %vm3695_vm4, %v4930_v61, %v3696_v20  ;;  %v3868_v33 = vadd.s32 536870912, %v3867_v59  ;;  %v4019_v47 = vshrl.u32 %v4018_v62, 23 }
 0x370   : > { %vm3922_vm8 = vcmp.gt.s32.totalorder %v3921_v19, 0  ;;  %v3701_v55 = vsel %vm3694_vm3, %v3697_v45, %v3700_v40  ;;  %v3777_v17 = vshrl.u32 %v3759_v37, %v3775_v29  ;;  %v8173_v63 = vadd.f32 %v7989_v57, %v5240_v34 }
 0x371   : > { %v3780_v15 = vadd.s32 127, %v3779_v2  ;;  %v3923_v14 = vsel %vm3922_vm8, %v3921_v19, 0  ;;  %v3702_v50 = vsel %vm3691_vm14, nan, %v3701_v55  ;;  %v3869_v23 = vshrl.u32 %v3868_v33, 30 }
 0x372   : > { %v3925_v46 = vand.u32 31, %v3923_v14  ;;  %v3778_v6 = vor.u32 %v3777_v17, %v3776_v30  ;;  %v8177_v35 = vand.u32 3, %v3796_v16  ;;  %vm3809_vm9 = vcmp.lt.s32.totalorder %v7977_v18, 0  ;;  %4332 = vst [vmem:[%s5207_s16 + $0xe8] sm:$0xff] %v3702_v50 }
 0x373   : > { %v3781_v32 = vshll.u32 %v3780_v15, 23  ;;  %v3870_v28 = vshll.u32 %v3869_v23, 30  ;;  %v3919_v56 = vor.u32 8388608, %v3918_v49  ;;  %v4015_v53 = vand.u32 2147483647, %v8140_v48 }
 0x374   : > { %v3926_v31 = vsub.s32 32, %v3925_v46  ;;  %v3785_v34 = vcvt.s32.f32 %v3778_v6  ;;  %v3863_v52 = vadd.s32 %v8127_v54, %v8136_v21  ;;  %v4587_v57 = vadd.s32 4294967169, %v4019_v47 }
 0x375   : > { %v3782_v26 = vor.u32 4788187, %v3781_v32  ;;  %v8184_v22 = vsub.s32 %v3867_v59, %v3870_v28  ;;  %v3893_v4 = vsub.s32 4, %v3869_v23  ;;  %v3924_v58 = vshrl.u32 %v3923_v14, 5 }
 0x376   : > { %v3928_v61 = vshll.u32 %v5057_v25, %v3925_v46  ;;  %v3929_v1 = vshrl.u32 %v5058_v27, %v3926_v31  ;;  %v3931_v13 = vshll.u32 %v5058_v27, %v3925_v46  ;;  %v3932_v62 = vshrl.u32 %v8584_v41, %v3926_v31 }
 0x377   : > { %v3783_v37 = vand.u32 2147483647, %v3782_v26  ;;  %v3873_v0 = vsub.s32 0, %v8184_v22  ;;  %v3934_v60 = vshll.u32 %v8584_v41, %v3925_v46  ;;  %v3935_v54 = vshrl.u32 %v8556_v36, %v3926_v31 }
 0x378   : > { %v3937_v21 = vshll.u32 %v8556_v36, %v3925_v46  ;;  %v3938_v59 = vshrl.u32 %v5061_v38, %v3926_v31  ;;  %v8195_v20 = vshll.u32 %v3919_v56, 8  ;;  %v4025_v39 = vadd.s32 1, %v4587_v57 }
 0x379   : > { %v3786_v16 = vmul.f32 %v3785_v34, %v3783_v37  ;;  %v4580_v49 = vmin.u32 %v3873_v0, %v8184_v22  ;;  %v3927_v19 = vshrl.u32 %v5057_v25, %v3926_v31  ;;  %v3940_v40 = vshll.u32 %v5061_v38, %v3925_v46 }
 0x37a   : > { %v3941_v29 = vshrl.u32 %v5062_v51, %v3926_v31  ;;  %v3930_v2 = vor.u32 %v3929_v1, %v3928_v61  ;;  %v3933_v45 = vor.u32 %v3932_v62, %v3931_v13  ;;  %v3939_v33 = vor.u32 %v3938_v59, %v3937_v21 }
 0x37b   : > { %v3787_v30 = vxor.u32 2147483648, %v3786_v16  ;;  %vm8203_vm11 = vcmp.le.f32.partialorder %v3807_v44, 0.7853982  ;;  %v3875_v55 = vclz %v4580_v49  ;;  %v3894_v17 = vsel %vm3809_vm9, %v3893_v4, %v3869_v23 }
 0x37c   : > { %v3936_v15 = vor.u32 %v3935_v54, %v3934_v60  ;;  %vm3943_vm10 = vcmp.lt.s32.totalorder %v3924_v58, 1  ;;  %v3942_v50 = vor.u32 %v3941_v29, %v3940_v40  ;;  %vm3945_vm12 = vcmp.lt.s32.totalorder %v3924_v58, 3 }
 0x37d   : > { %v3788_v14 = vsel %vm3705_vm2, %v3787_v30, %v3786_v16  ;;  %vm3946_vm15 = vcmp.lt.s32.totalorder %v3924_v58, 4  ;;  %v4581_v44 = vadd.s32 4294967294, %v3875_v55  ;;  %vm3944_vm13 = vcmp.lt.s32.totalorder %v3924_v58, 2 }
 0x37e   : > { %v3791_v46 = vsel %vm8150_vm1, %v7884_v3, %v3788_v14  ;;  %v3948_v6 = vsel %vm3946_vm15, %v3936_v15, 2102212464  ;;  %v3947_v32 = vsel %vm3943_vm10, %v3927_v19, %v3930_v2  ;;  %v3951_v23 = vsel %vm3943_vm10, %v3930_v2, %v3933_v45 }
 0x37f   : > { %4933 = vcosq.f32 %v3791_v46  ;;  %v3952_v28 = vsel %vm3946_vm15, %v3939_v33, 920167782  ;;  %vm4582_vm0 = vcmp.lt.s32.totalorder %v4581_v44, 0  ;;  %v3949_v56 = vsel %vm3945_vm12, %v3933_v45, %v3948_v6 }
 0x380   : > { %4935 = vsinq.f32 %v3791_v46  ;;  %v3953_v31 = vsel %vm3945_vm12, %v3936_v15, %v3952_v28  ;;  %v3878_v26 = vsel %vm4582_vm0, 0, %v4581_v44  ;;  %v3955_v34 = vsel %vm3943_vm10, %v3933_v45, %v3936_v15 }
 0x381   : > { %v3954_v43 = vsel %vm3944_vm13, %v3951_v23, %v3953_v31  ;;  %v3956_v57 = vsel %vm3946_vm15, %v3942_v50, 1326507024  ;;  %v3879_v4 = vsub.s32 32, %v3878_v26  ;;  %v3880_v61 = vshll.u32 %v8184_v22, %v3878_v26 }
 0x382   : > { %v3883_v37 = vsub.s32 4294967266, %v3878_v26  ;;  %v3957_v1 = vsel %vm3945_vm12, %v3939_v33, %v3956_v57  ;;  %v3950_v13 = vsel %vm3944_vm13, %v3947_v32, %v3949_v56  ;;  %vm3795_vm2 = vweird.f32 %v7884_v3 }
 0x383   : > { %v3958_v62 = vsel %vm3944_vm13, %v3955_v34, %v3957_v1  ;;  %v8228_v0 = vmul.u32.u64.low %v8195_v20, %v3954_v43  ;;  %v8229_v60 = vmul.u32.u64.high %v8195_v20, %v3954_v43, %v8228_v0  ;;  %v3881_v54 = vshrl.u32 %v3863_v52, %v3879_v4 }
 0x384   : > { %v3884_v21 = vadd.s32 127, %v3883_v37  ;;  %v8233_v16 = vmul.u32.u64.low %v8195_v20, %v3958_v62  ;;  %v8234_v59 = vmul.u32.u64.high %v8195_v20, %v3958_v62, %v8233_v16  ;;  %v3896_v22 = vsel %vm8203_vm11, 0, %v3894_v17 }
 0x385   : > { %v4022_v58 = vand.u32 8388607, %v4015_v53  ;;  %vm4026_vm14 = vcmp.gt.s32.totalorder %v4025_v39, 0  ;;  %v3882_v49 = vor.u32 %v3881_v54, %v3880_v61  ;;  %v3966_v40 = vmul.u32 %v8195_v20, %v3950_v13 }
 0x386   : > { %v3885_v19 = vshll.u32 %v3884_v21, 23  ;;  %v4027_v29 = vsel %vm4026_vm14, %v4025_v39, 0  ;;  %vm3798_vm1 = vcmp.lt.s32.totalorder %v8177_v35, 2  ;;  %vm3799_vm3 = vcmp.eq.s32.totalorder %v8177_v35, 0 }
 0x387   : > { %v3969_v52 = vadd.s32 1, %v8229_v60  ;;  %v4029_v30 = vand.u32 31, %v4027_v29  ;;  %vm3802_vm4 = vcmp.eq.s32.totalorder %v8177_v35, 2  ;;  %v3889_v45 = vcvt.s32.f32 %v3882_v49 }
 0x388   : > { %v3886_v2 = vor.u32 4788187, %v3885_v19  ;;  %vm3968_vm6 = vc.u32 %v8234_v59, %v8228_v0  ;;  %v3900_v55 = vadd.s32 3, %v3896_v22  ;;  %v4023_v20 = vor.u32 8388608, %v4022_v58 }
 0x389   : > { %v4934_v33 = vpop.eup %4933  ;;  %v3970_v17 = vsel %vm3968_vm6, %v3969_v52, %v8229_v60  ;;  %v4030_v39 = vsub.s32 32, %v4029_v30  ;;  %v4028_v44 = vshrl.u32 %v4027_v29, 5  ;;  %v4032_v32 = vshll.u32 %v5057_v25, %v4029_v30 }
 0x38a   : > { %v4936_v15 = vpop.eup %4935  ;;  %v3803_v14 = vxor.u32 2147483648, %v4934_v33  ;;  %v3887_v50 = vand.u32 2147483647, %v3886_v2  ;;  %v3971_v46 = vadd.s32 %v3970_v17, %v3966_v40  ;;  %v4035_v28 = vshll.u32 %v5058_v27, %v4029_v30 }
 0x38b   : > { %v3800_v6 = vxor.u32 2147483648, %v4936_v15  ;;  %v4033_v23 = vshrl.u32 %v5058_v27, %v4030_v39  ;;  %v4036_v43 = vshrl.u32 %v8584_v41, %v4030_v39  ;;  %v4031_v57 = vshrl.u32 %v5057_v25, %v4030_v39 }
 0x38c   : > { %v3804_v56 = vsel %vm3802_vm4, %v3803_v14, %v4936_v15  ;;  %v3890_v31 = vmul.f32 %v3889_v45, %v3887_v50  ;;  %v3972_v26 = vadd.s32 536870912, %v3971_v46  ;;  %v4038_v4 = vshll.u32 %v8584_v41, %v4029_v30 }
 0x38d   : > { %v3801_v34 = vsel %vm3799_vm3, %v4934_v33, %v3800_v6  ;;  %v4041_v61 = vshll.u32 %v8556_v36, %v4029_v30  ;;  %v4039_v62 = vshrl.u32 %v8556_v36, %v4030_v39  ;;  %vm3913_vm5 = vcmp.lt.s32.totalorder %v7998_v5, 0 }
 0x38e   : > { %v3805_v37 = vsel %vm3798_vm1, %v3801_v34, %v3804_v56  ;;  %v3891_v1 = vxor.u32 2147483648, %v3890_v31  ;;  %v3973_v13 = vshrl.u32 %v3972_v26, 30  ;;  %v4042_v54 = vshrl.u32 %v5061_v38, %v4030_v39 }
 0x38f   : > { %v3806_v60 = vsel %vm3795_vm2, nan, %v3805_v37  ;;  %v4044_v21 = vshll.u32 %v5061_v38, %v4029_v30  ;;  %v4045_v16 = vshrl.u32 %v5062_v51, %v4030_v39  ;;  %v4034_v58 = vor.u32 %v4033_v23, %v4032_v32 }
 0x390   : > { %v3892_v22 = vsel %vm3809_vm9, %v3891_v1, %v3890_v31  ;;  %v3974_v35 = vshll.u32 %v3973_v13, 30  ;;  %v4037_v49 = vor.u32 %v4036_v43, %v4035_v28  ;;  %4333 = vst [vmem:[%s5207_s16 + $0xf0] sm:$0xff] %v3806_v60  ;;  %v4043_v19 = vor.u32 %v4042_v54, %v4041_v61 }
 0x391   : > { %v3895_v3 = vsel %vm8203_vm11, %v7977_v18, %v3892_v22  ;;  %v4046_v40 = vor.u32 %v4045_v16, %v4044_v21  ;;  %vm4047_vm7 = vcmp.lt.s32.totalorder %v4028_v44, 1  ;;  %v4040_v52 = vor.u32 %v4039_v62, %v4038_v4 }
 0x392   : > { %4937 = vcosq.f32 %v3895_v3  ;;  %v8275_v29 = vsub.s32 %v3971_v46, %v3974_v35  ;;  %v4063_v30 = vshll.u32 %v4023_v20, 8  ;;  %v3997_v2 = vsub.s32 4, %v3973_v13 }
 0x393   : > { %4939 = vsinq.f32 %v3895_v3  ;;  %vm4049_vm8 = vcmp.lt.s32.totalorder %v4028_v44, 3  ;;  %vm4050_vm9 = vcmp.lt.s32.totalorder %v4028_v44, 4  ;;  %vm4048_vm10 = vcmp.lt.s32.totalorder %v4028_v44, 2 }
 0x394   : > { %v3977_v45 = vsub.s32 0, %v8275_v29  ;;  %v4052_v33 = vsel %vm4050_vm9, %v4040_v52, 2102212464  ;;  %v4055_v17 = vsel %vm4047_vm7, %v4034_v58, %v4037_v49  ;;  %v4051_v47 = vsel %vm4047_vm7, %v4031_v57, %v4034_v58 }
 0x395   : > { %v4053_v39 = vsel %vm4049_vm8, %v4037_v49, %v4052_v33  ;;  %v4056_v15 = vsel %vm4050_vm9, %v4043_v19, 920167782  ;;  %v4060_v14 = vsel %vm4050_vm9, %v4046_v40, 1326507024  ;;  %v3901_v50 = vand.u32 3, %v3900_v55 }
 0x396   : > { %v4584_v46 = vmin.u32 %v3977_v45, %v8275_v29  ;;  %v4057_v20 = vsel %vm4049_vm8, %v4040_v52, %v4056_v15  ;;  %v4059_v6 = vsel %vm4047_vm7, %v4037_v49, %v4040_v52  ;;  %vm3899_vm11 = vweird.f32 %v7977_v18 }
 0x397   : > { %vm8287_vm12 = vcmp.le.f32.partialorder %v3911_v24, 0.7853982  ;;  %v4058_v23 = vsel %vm4048_vm10, %v4055_v17, %v4057_v20  ;;  %v4061_v28 = vsel %vm4049_vm8, %v4043_v19, %v4060_v14  ;;  %v4122_v55 = vand.u32 2139095040, %v8144_v42 }
 0x398   : > { %v3979_v56 = vclz %v4584_v46  ;;  %v3998_v31 = vsel %vm3913_vm5, %v3997_v2, %v3973_v13  ;;  %v4054_v26 = vsel %vm4048_vm10, %v4051_v47, %v4053_v39  ;;  %v4119_v43 = vand.u32 2147483647, %v8144_v42 }
 0x399   : > { %v4062_v34 = vsel %vm4048_vm10, %v4059_v6, %v4061_v28  ;;  %v8299_v24 = vmul.u32.u64.low %v4063_v30, %v4058_v23  ;;  %v8300_v57 = vmul.u32.u64.high %v4063_v30, %v4058_v23, %v8299_v24  ;;  %v4123_v4 = vshrl.u32 %v4122_v55, 23 }
 0x39a   : > { %vm3902_vm15 = vcmp.lt.s32.totalorder %v3901_v50, 2  ;;  %v4585_v61 = vadd.s32 4294967294, %v3979_v56  ;;  %v8303_v37 = vmul.u32.u64.low %v4063_v30, %v4062_v34  ;;  %v8304_v1 = vmul.u32.u64.high %v4063_v30, %v4062_v34, %v8303_v37 }
 0x39b   : > { %vm3903_vm13 = vcmp.eq.s32.totalorder %v3901_v50, 0  ;;  %vm3906_vm0 = vcmp.eq.s32.totalorder %v3901_v50, 2  ;;  %v3967_v13 = vadd.s32 %v8228_v0, %v8234_v59  ;;  %v4591_v62 = vadd.s32 4294967169, %v4123_v4 }
 0x39c   : > { %v4938_v60 = vpop.eup %4937  ;;  %vm4586_vm2 = vcmp.lt.s32.totalorder %v4585_v61, 0  ;;  %v4000_v44 = vsel %vm8287_vm12, 0, %v3998_v31  ;;  %v4070_v54 = vmul.u32 %v4063_v30, %v4054_v26  ;;  %v4126_v21 = vand.u32 8388607, %v4119_v43 }
 0x39d   : > { %v4940_v16 = vpop.eup %4939  ;;  %v3907_v22 = vxor.u32 2147483648, %v4938_v60  ;;  %v3982_v35 = vsel %vm4586_vm2, 0, %v4585_v61  ;;  %v4073_v58 = vadd.s32 1, %v8300_v57  ;;  %v4129_v49 = vadd.s32 1, %v4591_v62 }
 0x39e   : > { %v3904_v3 = vxor.u32 2147483648, %v4940_v16  ;;  %v3983_v19 = vsub.s32 32, %v3982_v35  ;;  %v3984_v0 = vshll.u32 %v8275_v29, %v3982_v35  ;;  %v3987_v59 = vsub.s32 4294967266, %v3982_v35 }
 0x39f   : > { %v3908_v40 = vsel %vm3906_vm0, %v3907_v22, %v4940_v16  ;;  %v4004_v52 = vadd.s32 3, %v4000_v44  ;;  %vm4072_vm14 = vc.u32 %v8304_v1, %v8299_v24  ;;  %vm4130_vm1 = vcmp.gt.s32.totalorder %v4129_v49, 0 }
 0x3a0   : > { %v3905_v30 = vsel %vm3903_vm13, %v4938_v60, %v3904_v3  ;;  %v3985_v2 = vshrl.u32 %v3967_v13, %v3983_v19  ;;  %v3988_v45 = vadd.s32 127, %v3987_v59  ;;  %v4074_v33 = vsel %vm4072_vm14, %v4073_v58, %v8300_v57 }
 0x3a1   : > { %v3909_v17 = vsel %vm3902_vm15, %v3905_v30, %v3908_v40  ;;  %v4075_v47 = vadd.s32 %v4074_v33, %v4070_v54  ;;  %v4127_v39 = vor.u32 8388608, %v4126_v21  ;;  %v4131_v29 = vsel %vm4130_vm1, %v4129_v49, 0 }
 0x3a2   : > { %v3910_v15 = vsel %vm3899_vm11, nan, %v3909_v17  ;;  %v3986_v14 = vor.u32 %v3985_v2, %v3984_v0  ;;  %v3989_v46 = vshll.u32 %v3988_v45, 23  ;;  %v4133_v6 = vand.u32 31, %v4131_v29 }
 0x3a3   : > { %v4076_v20 = vadd.s32 536870912, %v4075_v47  ;;  %4334 = vst [vmem:[%s5207_s16 + $0xf8] sm:$0xff] %v3910_v15  ;;  %v8323_v55 = vand.u32 3, %v4004_v52  ;;  %v4226_v56 = vand.u32 2139095040, %v8173_v63  ;;  %v4132_v50 = vshrl.u32 %v4131_v29, 5 }
 0x3a4   : > { %v3990_v23 = vor.u32 4788187, %v3989_v46  ;;  %v3993_v28 = vcvt.s32.f32 %v3986_v14  ;;  %v4134_v26 = vsub.s32 32, %v4133_v6  ;;  %v8326_v34 = vshll.u32 %v4127_v39, 8 }
 0x3a5   : > { %v4077_v31 = vshrl.u32 %v4076_v20, 30  ;;  %v4136_v18 = vshll.u32 %v5057_v25, %v4133_v6  ;;  %v4139_v4 = vshll.u32 %v5058_v27, %v4133_v6  ;;  %v4142_v61 = vshll.u32 %v8584_v41, %v4133_v6 }
 0x3a6   : > { %v3991_v57 = vand.u32 2147483647, %v3990_v23  ;;  %v4137_v13 = vshrl.u32 %v5058_v27, %v4134_v26  ;;  %v4145_v62 = vshll.u32 %v8556_v36, %v4133_v6  ;;  %v4148_v60 = vshll.u32 %v5061_v38, %v4133_v6 }
 0x3a7   : > { %v4078_v37 = vshll.u32 %v4077_v31, 30  ;;  %v4140_v54 = vshrl.u32 %v8584_v41, %v4134_v26  ;;  %v4143_v21 = vshrl.u32 %v8556_v36, %v4134_v26  ;;  %v4146_v16 = vshrl.u32 %v5061_v38, %v4134_v26 }
 0x3a8   : > { %v3994_v44 = vmul.f32 %v3993_v28, %v3991_v57  ;;  %v4135_v35 = vshrl.u32 %v5057_v25, %v4134_v26  ;;  %v4149_v58 = vshrl.u32 %v5062_v51, %v4134_v26  ;;  %v4227_v49 = vshrl.u32 %v4226_v56, 23 }
 0x3a9   : > { %v8337_v22 = vsub.s32 %v4075_v47, %v4078_v37  ;;  %v4138_v19 = vor.u32 %v4137_v13, %v4136_v18  ;;  %v4141_v0 = vor.u32 %v4140_v54, %v4139_v4  ;;  %vm4151_vm3 = vcmp.lt.s32.totalorder %v4132_v50, 1 }
 0x3aa   : > { %v3995_v3 = vxor.u32 2147483648, %v3994_v44  ;;  %v4144_v40 = vor.u32 %v4143_v21, %v4142_v61  ;;  %v4147_v52 = vor.u32 %v4146_v16, %v4145_v62  ;;  %vm4152_vm4 = vcmp.lt.s32.totalorder %v4132_v50, 2 }
 0x3ab   : > { %v4081_v59 = vsub.s32 0, %v8337_v22  ;;  %v4150_v2 = vor.u32 %v4149_v58, %v4148_v60  ;;  %vm4153_vm6 = vcmp.lt.s32.totalorder %v4132_v50, 3  ;;  %vm4154_vm7 = vcmp.lt.s32.totalorder %v4132_v50, 4 }
 0x3ac   : > { %v3996_v30 = vsel %vm3913_vm5, %v3995_v3, %v3994_v44  ;;  %v4155_v17 = vsel %vm4151_vm3, %v4135_v35, %v4138_v19  ;;  %v4156_v47 = vsel %vm4154_vm7, %v4144_v40, 2102212464  ;;  %v4159_v29 = vsel %vm4151_vm3, %v4138_v19, %v4141_v0 }
 0x3ad   : > { %v3999_v45 = vsel %vm8287_vm12, %v7998_v5, %v3996_v30  ;;  %v4588_v33 = vmin.u32 %v4081_v59, %v8337_v22  ;;  %v4157_v39 = vsel %vm4153_vm6, %v4141_v0, %v4156_v47  ;;  %v4160_v15 = vsel %vm4154_vm7, %v4147_v52, 920167782 }
 0x3ae   : > { %4941 = vcosq.f32 %v3999_v45  ;;  %vm4017_vm5 = vcmp.lt.s32.totalorder %v8140_v48, 0  ;;  %v4101_v46 = vsub.s32 4, %v4077_v31  ;;  %v4071_v32 = vadd.s32 %v8299_v24, %v8304_v1 }
 0x3af   : > { %4943 = vsinq.f32 %v3999_v45  ;;  %v4083_v14 = vclz %v4588_v33  ;;  %v4161_v20 = vsel %vm4153_vm6, %v4144_v40, %v4160_v15  ;;  %v4163_v6 = vsel %vm4151_vm3, %v4141_v0, %v4144_v40 }
 0x3b0   : > { %v4223_v23 = vand.u32 2147483647, %v8173_v63  ;;  %vm8361_vm8 = vcmp.le.f32.partialorder %v4015_v53, 0.7853982  ;;  %v4158_v26 = vsel %vm4152_vm4, %v4155_v17, %v4157_v39  ;;  %v4162_v57 = vsel %vm4152_vm4, %v4159_v29, %v4161_v20 }
 0x3b1   : > { %v4589_v56 = vadd.s32 4294967294, %v4083_v14  ;;  %v4164_v18 = vsel %vm4154_vm7, %v4150_v2, 1326507024  ;;  %vm4006_vm9 = vcmp.lt.s32.totalorder %v8323_v55, 2  ;;  %v4595_v53 = vadd.s32 4294967169, %v4227_v49 }
 0x3b2   : > { %v4165_v24 = vsel %vm4153_vm6, %v4147_v52, %v4164_v18  ;;  %v8371_v1 = vmul.u32.u64.low %v8326_v34, %v4162_v57  ;;  %v8372_v4 = vmul.u32.u64.high %v8326_v34, %v4162_v57, %v8371_v1  ;;  %vm4003_vm10 = vweird.f32 %v7998_v5 }
 0x3b3   : > { %vm4590_vm11 = vcmp.lt.s32.totalorder %v4589_v56, 0  ;;  %v4102_v61 = vsel %vm4017_vm5, %v4101_v46, %v4077_v31  ;;  %v4166_v37 = vsel %vm4152_vm4, %v4163_v6, %v4165_v24  ;;  %v4339_v13 = vcombine.high %v5193_v7, %v5193_v7 }
 0x3b4   : > { %v4086_v62 = vsel %vm4590_vm11, 0, %v4589_v56  ;;  %v8382_v60 = vmul.u32.u64.low %v8326_v34, %v4166_v37  ;;  %v8383_v44 = vmul.u32.u64.high %v8326_v34, %v4166_v37, %v8382_v60  ;;  %v4233_v54 = vadd.s32 1, %v4595_v53 }
 0x3b5   : > { %v4087_v21 = vsub.s32 32, %v4086_v62  ;;  %v4088_v16 = vshll.u32 %v8337_v22, %v4086_v62  ;;  %v4091_v35 = vsub.s32 4294967266, %v4086_v62  ;;  %v4174_v58 = vmul.u32 %v8326_v34, %v4158_v26  ;;  %4352 = vst [vmem:[%s5207_s16 + $0x128] sm:$0x7] %v4339_v13 }
 0x3b6   : > { %v4177_v31 = vadd.s32 1, %v8372_v4  ;;  %vm4234_vm12 = vcmp.gt.s32.totalorder %v4233_v54, 0  ;;  %v4340_v7 = vcombine.high %v5195_v8, %v5195_v8  ;;  %v4341_v50 = vcombine.high %v5197_v9, %v5197_v9 }
 0x3b7   : > { %v4089_v49 = vshrl.u32 %v4071_v32, %v4087_v21  ;;  %v4092_v3 = vadd.s32 127, %v4091_v35  ;;  %v4230_v22 = vand.u32 8388607, %v4223_v23  ;;  %v4235_v19 = vsel %vm4234_vm12, %v4233_v54, 0 }
 0x3b8   : > { %v4942_v0 = vpop.eup %4941  ;;  %vm4007_vm15 = vcmp.eq.s32.totalorder %v8323_v55, 0  ;;  %vm4010_vm13 = vcmp.eq.s32.totalorder %v8323_v55, 2  ;;  %vm4176_vm0 = vc.u32 %v8383_v44, %v8371_v1  ;;  %v4237_v34 = vand.u32 31, %v4235_v19  ;;  %4354 = vst [vmem:[%s5207_s16 + $0x138] sm:$0x7] %v4340_v7 }
 0x3b9   : > { %4356 = vst [vmem:[%s5207_s16 + $0x148] sm:$0x7] %v4341_v50  ;;  %v4944_v8 = vpop.eup %4943  ;;  %v4011_v59 = vxor.u32 2147483648, %v4942_v0  ;;  %v4090_v9 = vor.u32 %v4089_v49, %v4088_v16  ;;  %v4093_v40 = vshll.u32 %v4092_v3, 23  ;;  %v4178_v52 = vsel %vm4176_vm0, %v4177_v31, %v8372_v4 }
 0x3ba   : > { %v4008_v30 = vxor.u32 2147483648, %v4944_v8  ;;  %v4104_v2 = vsel %vm8361_vm8, 0, %v4102_v61  ;;  %v4179_v45 = vadd.s32 %v4178_v52, %v4174_v58  ;;  %v4238_v33 = vsub.s32 32, %v4237_v34 }
 0x3bb   : > { %v4012_v17 = vsel %vm4010_vm13, %v4011_v59, %v4944_v8  ;;  %v4094_v47 = vor.u32 4788187, %v4093_v40  ;;  %v4097_v39 = vcvt.s32.f32 %v4090_v9  ;;  %v4231_v29 = vor.u32 8388608, %v4230_v22 }
 0x3bc   : > { %v4009_v15 = vsel %vm4007_vm15, %v4942_v0, %v4008_v30  ;;  %v4180_v14 = vadd.s32 536870912, %v4179_v45  ;;  %v4240_v46 = vshll.u32 %v5057_v25, %v4237_v34  ;;  %v4243_v32 = vshll.u32 %v5058_v27, %v4237_v34 }
 0x3bd   : > { %v4013_v20 = vsel %vm4006_vm9, %v4009_v15, %v4012_v17  ;;  %v4095_v6 = vand.u32 2147483647, %v4094_v47  ;;  %v4241_v56 = vshrl.u32 %v5058_v27, %v4238_v33  ;;  %v4244_v26 = vshrl.u32 %v8584_v41, %v4238_v33 }
 0x3be   : > { %v4014_v57 = vsel %vm4003_vm10, nan, %v4013_v20  ;;  %v8414_v18 = vshrl.u32 %v4180_v14, 30  ;;  %v4246_v24 = vshll.u32 %v8584_v41, %v4237_v34  ;;  %v4247_v4 = vshrl.u32 %v8556_v36, %v4238_v33 }
 0x3bf   : > { %v4098_v53 = vmul.f32 %v4097_v39, %v4095_v6  ;;  %v4236_v61 = vshrl.u32 %v4235_v19, 5  ;;  %v4249_v37 = vshll.u32 %v8556_v36, %v4237_v34  ;;  %v4250_v55 = vshrl.u32 %v5061_v38, %v4238_v33  ;;  %4335 = vst [vmem:[%s5207_s16 + $0x100] sm:$0xff] %v4014_v57 }
 0x3c0   : > { %v4108_v13 = vadd.s32 3, %v4104_v2  ;;  %v4182_v27 = vshll.u32 %v8414_v18, 30  ;;  %v4252_v62 = vshll.u32 %v5061_v38, %v4237_v34  ;;  %v8423_v5 = vshll.u32 %v4231_v29, 8 }
 0x3c1   : > { %v4099_v60 = vxor.u32 2147483648, %v4098_v53  ;;  %v4239_v54 = vshrl.u32 %v5057_v25, %v4238_v33  ;;  %v4251_v41 = vor.u32 %v4250_v55, %v4249_v37  ;;  %v4253_v21 = vshrl.u32 %v5062_v51, %v4238_v33 }
 0x3c2   : > { %v8427_v16 = vsub.s32 %v4179_v45, %v4182_v27  ;;  %v4242_v35 = vor.u32 %v4241_v56, %v4240_v46  ;;  %v4245_v36 = vor.u32 %v4244_v26, %v4243_v32  ;;  %v4248_v58 = vor.u32 %v4247_v4, %v4246_v24 }
 0x3c3   : > { %v4100_v31 = vsel %vm4017_vm5, %v4099_v60, %v4098_v53  ;;  %v4254_v7 = vor.u32 %v4253_v21, %v4252_v62  ;;  %vm4255_vm2 = vcmp.lt.s32.totalorder %v4236_v61, 1  ;;  %vm4258_vm14 = vcmp.lt.s32.totalorder %v4236_v61, 4 }
 0x3c4   : > { %v4103_v38 = vsel %vm8361_vm8, %v8140_v48, %v4100_v31  ;;  %v4185_v25 = vsub.s32 0, %v8427_v16  ;;  %vm4256_vm1 = vcmp.lt.s32.totalorder %v4236_v61, 2  ;;  %vm4257_vm3 = vcmp.lt.s32.totalorder %v4236_v61, 3 }
 0x3c5   : > { %4945 = vcosq.f32 %v4103_v38  ;;  %v4259_v51 = vsel %vm4255_vm2, %v4239_v54, %v4242_v35  ;;  %v4260_v50 = vsel %vm4258_vm14, %v4248_v58, 2102212464  ;;  %v4264_v49 = vsel %vm4258_vm14, %v4251_v41, 920167782 }
 0x3c6   : > { %4947 = vsinq.f32 %v4103_v38  ;;  %v4592_v3 = vmin.u32 %v4185_v25, %v8427_v16  ;;  %v4261_v22 = vsel %vm4257_vm3, %v4245_v36, %v4260_v50  ;;  %v4263_v19 = vsel %vm4255_vm2, %v4242_v35, %v4245_v36 }
 0x3c7   : > { %v4265_v0 = vsel %vm4257_vm3, %v4248_v58, %v4264_v49  ;;  %v4267_v34 = vsel %vm4255_vm2, %v4245_v36, %v4248_v58  ;;  %v4268_v28 = vsel %vm4258_vm14, %v4254_v7, 1326507024  ;;  %v4109_v8 = vand.u32 3, %v4108_v13 }
 0x3c8   : > { %v4187_v59 = vclz %v4592_v3  ;;  %v4262_v9 = vsel %vm4256_vm1, %v4259_v51, %v4261_v22  ;;  %v4266_v40 = vsel %vm4256_vm1, %v4263_v19, %v4265_v0  ;;  %v4269_v52 = vsel %vm4257_vm3, %v4251_v41, %v4268_v28 }
 0x3c9   : > { %v4342_v30 = vcombine.high %v5199_v10, %v5199_v10  ;;  %v4270_v45 = vsel %vm4256_vm1, %v4267_v34, %v4269_v52  ;;  %v8445_v33 = vmul.u32.u64.low %v8423_v5, %v4266_v40  ;;  %v8446_v17 = vmul.u32.u64.high %v8423_v5, %v4266_v40, %v8445_v33 }
 0x3ca   : > { %v4593_v2 = vadd.s32 4294967294, %v4187_v59  ;;  %v8449_v47 = vmul.u32.u64.low %v8423_v5, %v4270_v45  ;;  %v8450_v39 = vmul.u32.u64.high %v8423_v5, %v4270_v45, %v8449_v47  ;;  %v4343_v29 = vcombine.high %v5201_v11, %v5201_v11 }
 0x3cb   : > { %v4344_v15 = vcombine.high %v5203_v12, %v5203_v12  ;;  %4358 = vst [vmem:[%s5207_s16 + $0x158] sm:$0x7] %v4342_v30  ;;  %v4175_v10 = vadd.s32 %v8371_v1, %v8383_v44  ;;  %v4278_v46 = vmul.u32 %v8423_v5, %v4262_v9  ;;  %v4281_v56 = vadd.s32 1, %v8446_v17 }
 0x3cc   : > { %vm4594_vm4 = vcmp.lt.s32.totalorder %v4593_v2, 0  ;;  %4360 = vst [vmem:[%s5207_s16 + $0x168] sm:$0x7] %v4343_v29  ;;  %vm4111_vm6 = vcmp.eq.s32.totalorder %v4109_v8, 0  ;;  %vm4114_vm7 = vcmp.eq.s32.totalorder %v4109_v8, 2  ;;  %vm4280_vm5 = vc.u32 %v8450_v39, %v8445_v33 }
 0x3cd   : > { %v4190_v14 = vsel %vm4594_vm4, 0, %v4593_v2  ;;  %4362 = vst [vmem:[%s5207_s16 + $0x178] sm:$0x7] %v4344_v15  ;;  %v4282_v57 = vsel %vm4280_vm5, %v4281_v56, %v8446_v17  ;;  %vm4110_vm8 = vcmp.lt.s32.totalorder %v4109_v8, 2  ;;  %vm4107_vm9 = vweird.f32 %v8140_v48 }
 0x3ce   : > { %v4191_v32 = vsub.s32 32, %v4190_v14  ;;  %v4192_v20 = vshll.u32 %v8427_v16, %v4190_v14  ;;  %v4195_v6 = vsub.s32 4294967266, %v4190_v14  ;;  %v4283_v4 = vadd.s32 %v4282_v57, %v4278_v46 }
 0x3cf   : > { %v4946_v11 = vpop.eup %4945  ;;  %v4205_v21 = vsub.s32 4, %v8414_v18  ;;  %vm4121_vm10 = vcmp.lt.s32.totalorder %v8144_v42, 0  ;;  %vm4120_vm11 = vcmp.le.f32.partialorder %v4119_v43, 0.7853982  ;;  %v4279_v22 = vadd.s32 %v8445_v33, %v8450_v39 }
 0x3d0   : > { %v4948_v12 = vpop.eup %4947  ;;  %v4115_v26 = vxor.u32 2147483648, %v4946_v11  ;;  %v4193_v1 = vshrl.u32 %v4175_v10, %v4191_v32  ;;  %v4196_v44 = vadd.s32 127, %v4195_v6  ;;  %v4284_v13 = vadd.s32 536870912, %v4283_v4 }
 0x3d1   : > { %v4112_v24 = vxor.u32 2147483648, %v4948_v12  ;;  %v4206_v58 = vsel %vm4121_vm10, %v4205_v21, %v8414_v18  ;;  %vm4211_vm2 = vweird.f32 %v8144_v42  ;;  %vm4225_vm14 = vcmp.lt.s32.totalorder %v8173_v63, 0 }
 0x3d2   : > { %v4116_v53 = vsel %vm4114_vm7, %v4115_v26, %v4948_v12  ;;  %v4194_v61 = vor.u32 %v4193_v1, %v4192_v20  ;;  %v4197_v37 = vshll.u32 %v4196_v44, 23  ;;  %v4285_v54 = vshrl.u32 %v4284_v13, 30 }
 0x3d3   : > { %v4113_v55 = vsel %vm4111_vm6, %v4946_v11, %v4112_v24  ;;  %v4208_v25 = vsel %vm4120_vm11, 0, %v4206_v58  ;;  %vm4224_vm1 = vcmp.le.f32.partialorder %v4223_v23, 0.7853982  ;;  %vm4315_vm7 = vweird.f32 %v8173_v63 }
 0x3d4   : > { %v4117_v27 = vsel %vm4110_vm8, %v4113_v55, %v4116_v53  ;;  %v4198_v62 = vor.u32 4788187, %v4197_v37  ;;  %v4201_v5 = vcvt.s32.f32 %v4194_v61  ;;  %v4286_v16 = vshll.u32 %v4285_v54, 30 }
 0x3d5   : > { %v4118_v60 = vsel %vm4107_vm9, nan, %v4117_v27  ;;  %v4212_v49 = vadd.s32 3, %v4208_v25  ;;  %v4309_v15 = vsub.s32 4, %v4285_v54 }
 0x3d6   : > { %v4199_v41 = vand.u32 2147483647, %v4198_v62  ;;  %4336 = vst [vmem:[%s5207_s16 + $0x108] sm:$0xff] %v4118_v60  ;;  %v4287_v36 = vsub.s32 %v4283_v4, %v4286_v16 }
 0x3d7   : > { %v4213_v19 = vand.u32 3, %v4212_v49  ;;  %v4310_v32 = vsel %vm4225_vm14, %v4309_v15, %v4285_v54 }
 0x3d8   : > { %v4202_v35 = vmul.f32 %v4201_v5, %v4199_v41  ;;  %v4289_v31 = vsub.s32 0, %v4287_v36  ;;  %v4312_v6 = vsel %vm4224_vm1, 0, %v4310_v32 }
 0x3d9   : > { %vm4218_vm15 = vcmp.eq.s32.totalorder %v4213_v19, 2  ;;  %vm4215_vm13 = vcmp.eq.s32.totalorder %v4213_v19, 0  ;;  %vm4214_vm0 = vcmp.lt.s32.totalorder %v4213_v19, 2  ;;  %v4316_v56 = vadd.s32 3, %v4312_v6 }
 0x3da   : > { %v4203_v48 = vxor.u32 2147483648, %v4202_v35  ;;  %v4596_v51 = vmin.u32 %v4289_v31, %v4287_v36 }
 0x3db   : > { %v4317_v11 = vand.u32 3, %v4316_v56 }
 0x3dc   : > { %v4204_v7 = vsel %vm4121_vm10, %v4203_v48, %v4202_v35  ;;  %v4291_v50 = vclz %v4596_v51 }
 0x3dd   : > { %v4207_v38 = vsel %vm4120_vm11, %v8144_v42, %v4204_v7  ;;  %vm4322_vm3 = vcmp.eq.s32.totalorder %v4317_v11, 2  ;;  %vm4319_vm4 = vcmp.eq.s32.totalorder %v4317_v11, 0  ;;  %vm4318_vm6 = vcmp.lt.s32.totalorder %v4317_v11, 2 }
 0x3de   : > { %4949 = vcosq.f32 %v4207_v38  ;;  %v4597_v3 = vadd.s32 4294967294, %v4291_v50 }
 0x3df   : > { %4951 = vsinq.f32 %v4207_v38 }
 0x3e0   : > { %vm4598_vm12 = vcmp.lt.s32.totalorder %v4597_v3, 0 }
 0x3e1   : > { %v4294_v0 = vsel %vm4598_vm12, 0, %v4597_v3 }
 0x3e2   : > { %v4295_v43 = vsub.s32 32, %v4294_v0  ;;  %v4296_v34 = vshll.u32 %v4287_v36, %v4294_v0  ;;  %v4299_v28 = vsub.s32 4294967266, %v4294_v0 }
 0x3e4   : > { %v4297_v18 = vshrl.u32 %v4279_v22, %v4295_v43  ;;  %v4300_v8 = vadd.s32 127, %v4299_v28 }
 0x3e6   : > { %v4298_v52 = vor.u32 %v4297_v18, %v4296_v34  ;;  %v4301_v30 = vshll.u32 %v4300_v8, 23 }
 0x3e8   : > { %v4950_v59 = vpop.eup %4949  ;;  %v4302_v33 = vor.u32 4788187, %v4301_v30  ;;  %v4305_v17 = vcvt.s32.f32 %v4298_v52 }
 0x3e9   : > { %v4952_v9 = vpop.eup %4951  ;;  %v4219_v40 = vxor.u32 2147483648, %v4950_v59 }
 0x3ea   : > { %v4216_v2 = vxor.u32 2147483648, %v4952_v9  ;;  %v4303_v29 = vand.u32 2147483647, %v4302_v33 }
 0x3eb   : > { %v4220_v45 = vsel %vm4218_vm15, %v4219_v40, %v4952_v9 }
 0x3ec   : > { %v4217_v47 = vsel %vm4215_vm13, %v4950_v59, %v4216_v2  ;;  %v4306_v14 = vmul.f32 %v4305_v17, %v4303_v29 }
 0x3ed   : > { %v4221_v39 = vsel %vm4214_vm0, %v4217_v47, %v4220_v45 }
 0x3ee   : > { %v4222_v10 = vsel %vm4211_vm2, nan, %v4221_v39  ;;  %v4307_v46 = vxor.u32 2147483648, %v4306_v14 }
 0x3ef   : > { %4337 = vst [vmem:[%s5207_s16 + $0x110] sm:$0xff] %v4222_v10 }
 0x3f0   : > { %v4308_v42 = vsel %vm4225_vm14, %v4307_v46, %v4306_v14 }
 0x3f1   : > { %v4311_v20 = vsel %vm4224_vm1, %v8173_v63, %v4308_v42 }
 0x3f2   : > { %4953 = vcosq.f32 %v4311_v20 }
 0x3f3   : > { %4955 = vsinq.f32 %v4311_v20 }
 0x3fc   : > { %v4954_v12 = vpop.eup %4953 }
 0x3fd   : > { %v4956_v26 = vpop.eup %4955  ;;  %v4323_v23 = vxor.u32 2147483648, %v4954_v12 }
 0x3fe   : > { %v4320_v1 = vxor.u32 2147483648, %v4956_v26 }
 0x3ff   : > { %v4324_v44 = vsel %vm4322_vm3, %v4323_v23, %v4956_v26 }
 0x400   : > { %v4321_v57 = vsel %vm4319_vm4, %v4954_v12, %v4320_v1 }
 0x401   : > { %v4325_v24 = vsel %vm4318_vm6, %v4321_v57, %v4324_v44 }
 0x402   : > { %v4326_v4 = vsel %vm4315_vm7, nan, %v4325_v24 }
 0x403   : > { %4338 = vst [vmem:[%s5207_s16 + $0x118] sm:$0xff] %v4326_v4 }
 0x404   : > { %5000 = shalt.err (!%p4997_p4)
}
 0x405   : > { %s5001_s5 = scalar_lea.hbm %s8487_s29, 6144  ;;  %s5005_s14 = scalar_lea.hbm %s8535_s1, 12288 }
 0x406   : > { %p5002_p7 = scmp.ne.s32.totalorder %s8487_s29, %s5001_s5  ;;  %p5006_p0 = scmp.lt.u32.totalorder %s8487_s29, %s8535_s1 }
 0x407   : > { %p5007_p1 = scmp.lt.u32.totalorder %s5005_s14, %s5001_s5  ;;  %p5009_p6 = scmp.lt.u32.totalorder %s5001_s5, %s8487_s29 }
 0x408   : > { %p5003_p8 = pnand %p5002_p7, %p8628_p11 }
 0x409   : > { %p5008_p3 = por %p5007_p1, %p5006_p0 }
 0x40a   : > { %p5004_p9 = pneg %p5003_p8 }
 0x40b   : > { %p5010_p12 = por %p5009_p6, %p5008_p3 }
 0x40d   : > { %p5011_p13 = pnand %p5010_p12, %p5004_p9 }
 0x40f   : > { %5014 = shalt.err (!%p5011_p13)
}
 0x410   : > { %s5064_s22 = smov 1536   ;;  %s5065_s23 = smov 3072  }
 0x411   : > { %s5066_s24 = smov 96  }
 0x412   : > { %4753 = dma.vmem_to_hbm [thread:$0]  (%p8628_p11), %s8489_s26, 6144, %s8487_s29, %s4364_s10, %s5064_s22, %s5065_s23, %s5066_s24  }
 0x413 PF: > { %s4392_s16 = sand.u32 1, %s5041_s6   ;;  %p8629_p5 = scmp.ne.s32.totalorder %s8548_s18, 0 }
 0x414   : > { %p8630_p10 = scmp.ge.s32.totalorder %s5053_s9, 2  ;;  %s4393_s25 = scalar_lea.sflag [#allocation4], %s4392_s16 }
 0x416   : > { %p4760_p2 = pnand %p8630_p10, %p8629_p5 }
 0x418   : > { %5036 = dma.done.wait (!%p4760_p2), %s4393_s25, 6144  }
 0x419   : > { %5038 = vsyncadd (!%p4760_p2), %s4393_s25, 4294961152  ;;  %p14_p4 = scmp.ge.s32.totalorder %s5102_s12, 4   ;;  %s8631_s6 = smov %s5045_s7 }
 0x41a   : > { %s8632_s7 = smov %s5049_s8  ;;  %s8633_s8 = smov %s5114_s15 }
 0x41b   : > { %s8634_s9 = smov %s5102_s12  ;;  %16 = sbr.rel (!%p14_p4) target bundleno = 5 (0x5), region = 69 }
 0x422   :  { %4398 = vsyncpa [#allocation3], 1 }
 0x423   :  { %4400 = vsyncpa [#allocation3 + $0x1], 1 }
 0x424   :  { %4401 = vsyncpa [#allocation4], 1 }
 0x425   :  { %4403 = vsyncpa [#allocation4 + $0x1], 1 }

</bundles_post_ra>
